<compile_context>
chip_gen: v6e
topology: v6e:2x2x1
jax: 0.10.0
libtpu: 0.0.40
codegen_flags: <defaults>
</compile_context>

<pallas_src>
import math
from math import pi, cos, sin, log

import jax
import jax.numpy as jnp
import numpy as np
from jax.experimental import pallas as pl
from jax.experimental.pallas import tpu as pltpu

LANE = 128                       # lane width of a vreg
ROWS = 8                         # sublanes of a vreg
TILE_BOXES = ROWS * LANE         # 1024 boxes per (8, 128) tile
MAX_TILES_PER_STEP = 8           # up to 8192 boxes per grid step
_TINY = 1e-20


# ----------------------------- in-kernel helpers ------------------------------
def _newton_recip(x):
    """EUP approximate reciprocal refined with one Newton step (~f32 accuracy)."""
    r = pl.reciprocal(x, approx=True)
    return r * (2.0 - x * r)


def _rect_corners(t, r, b, l, th, x, y):
    """Vectorized dist2rect; every arg is an (8, 128) f32 tile.  Returns the 4
    rectangle corners [(x0,y0),...,(x3,y3)] in the same (CCW) order as the
    PyTorch reference."""
    th = 1.25 * math.pi + th * (0.5 * math.pi)
    # th % (pi/2) without jnp.mod (floor-based range reduction).
    th = th - jnp.floor(th * (2.0 / math.pi)) * (0.5 * math.pi)
    th = jnp.where(th < 0.25 * math.pi, th + 0.5 * math.pi, th)
    ct = jnp.cos(th)
    st = jnp.sin(th)
    t_c, t_s = t * ct, t * st
    r_c, r_s = r * ct, r * st
    b_c, b_s = b * ct, b * st
    l_c, l_s = l * ct, l * st
    return ((x - b_c - l_s, y - b_s + l_c),
            (x + r_s - b_c, y - r_c - b_s),
            (x + t_c + r_s, y + t_s - r_c),
            (x - l_s + t_c, y + l_c + t_s))


def _clipped_edges_cross_sum(poly, clip):
    """Sum over the 4 edges of `poly` of cross(S, E), where [S, E] is the part
    of the edge lying inside the convex quad `clip` (empty part contributes 0,
    since a degenerate segment gives cross(P, P) == 0 exactly in fp).

    Green's theorem: 0.5 * (this(P, Q) + this(Q, P)) == area(P ∩ Q), i.e. the
    same value the reference's Sutherland-Hodgman clip + shoelace produces."""
    # Half-plane coefficients of the clip quad (interior: a*x + b*y + c <= 0),
    # built exactly like the reference's Line(p, q).
    lines = []
    for j in range(4):
        px_, py_ = clip[j]
        qx_, qy_ = clip[(j + 1) % 4]
        lines.append((qy_ - py_, px_ - qx_, qx_ * py_ - qy_ * px_))
    # Signed line values of every poly vertex against every clip half-plane.
    lv = [[a * vx + b * vy + c for (a, b, c) in lines] for (vx, vy) in poly]

    zero = jnp.zeros_like(poly[0][0])
    one = zero + 1.0
    total = zero
    for i in range(4):
        ax_, ay_ = poly[i]
        bx_, by_ = poly[(i + 1) % 4]
        dx_ = bx_ - ax_
        dy_ = by_ - ay_
        # Parametric (Liang-Barsky) clip of segment A + t*(B-A), t in [0, 1],
        # against the 4 half-planes: la + t*(lb - la) <= 0.
        t_lo = zero
        t_hi = one
        for j in range(4):
            la = lv[i][j]
            lb = lv[(i + 1) % 4][j]
            d = lb - la
            up = d > 0.0                           # strictly increasing -> upper bound
            # Sign-preserving clamp away from 0; d == 0 is routed to the
            # lower-bound branch so that (la == 0, d == 0) imposes no constraint.
            d_safe = jnp.where(up, jnp.maximum(d, _TINY), jnp.minimum(d, -_TINY))
            tcut = la * (-_newton_recip(d_safe))   # -la / d  (no divide)
            t_hi = jnp.where(up, jnp.minimum(t_hi, tcut), t_hi)
            t_lo = jnp.where(up, t_lo, jnp.maximum(t_lo, tcut))
        # Empty / degenerate intervals collapse to a zero-length segment
        # (contributes exactly 0); also keeps the endpoints inside the segment
        # so nothing can overflow.
        t_lo = jnp.minimum(t_lo, 1.0)
        t_hi = jnp.maximum(t_hi, t_lo)
        sx = ax_ + t_lo * dx_
        sy = ay_ + t_lo * dy_
        ex = ax_ + t_hi * dx_
        ey = ay_ + t_hi * dy_
        total = total + (sx * ey - sy * ex)
    return total


def _make_kernel(tiles_per_step, eps):
    def process(pred_ref, gt_ref, pts_ref, out_ref, sb):
        t1, r1, b1, l1, th1 = [pred_ref[p, sb] for p in range(5)]
        t2, r2, b2, l2, th2 = [gt_ref[p, sb] for p in range(5)]
        x = pts_ref[0, sb]
        y = pts_ref[1, sb]

        area1 = (t1 + b1) * (l1 + r1)
        area2 = (t2 + b2) * (l2 + r2)
        rect1 = _rect_corners(t1, r1, b1, l1, th1, x, y)
        rect2 = _rect_corners(t2, r2, b2, l2, th2, x, y)

        inter = 0.5 * (_clipped_edges_cross_sum(rect1, rect2)
                       + _clipped_edges_cross_sum(rect2, rect1))
        union = jnp.maximum(area1 + area2 - inter, _TINY)
        iou = inter * _newton_recip(union)
        # Reference: overlap.clamp(min=eps).  The additional cap at 1.0 only
        # affects fp-degenerate shared-boundary cases (true IoU is always <= 1),
        # where it restores the reference value.
        iou = jnp.clip(iou, eps, 1.0)
        out_ref[sb] = -jnp.log(iou)               # dense (8, 128) lane-major store

    def kernel(pred_ref, gt_ref, pts_ref, out_ref):
        if tiles_per_step == 1:
            process(pred_ref, gt_ref, pts_ref, out_ref, 0)
        else:
            def body(sb, carry):
                process(pred_ref, gt_ref, pts_ref, out_ref, sb)
                return carry

            jax.lax.fori_loop(0, tiles_per_step, body, 0)

    return kernel


# --------------------------------- wrapper ------------------------------------
def skew_iou_per_box(pred, target, pos_point, eps=1e-6):
    """pred, target: (N, 5) = [t, r, b, l, theta]; pos_point: (N, 2) = [x, y].
    Returns the per-box loss -log(clamp(skew_iou, eps)) of shape (N,)."""
    n = pred.shape[0]
    assert pred.shape == (n, 5) and target.shape == (n, 5) and pos_point.shape == (n, 2)

    n_tiles = max(1, pl.cdiv(n, TILE_BOXES))
    # Keep the grid >= 2 steps when possible so v7x's two TensorCores both get
    # work; cap the per-step tile count so VMEM / per-iteration registers stay small.
    tiles_per_step = max(1, min(MAX_TILES_PER_STEP, (n_tiles + 1) // 2))
    n_steps = pl.cdiv(n_tiles, tiles_per_step)
    n_tiles = n_steps * tiles_per_step
    npad = n_tiles * TILE_BOXES

    def pack(arr):
        p = arr.shape[1]
        buf = jnp.zeros((p, npad), jnp.float32)
        buf = buf.at[:, :n].set(arr.astype(jnp.float32).T)
        return buf.reshape(p, n_tiles, ROWS, LANE)

    pred_t, gt_t, pts_t = pack(pred), pack(target), pack(pos_point)

    out = pl.pallas_call(
        _make_kernel(tiles_per_step, float(eps)),
        out_shape=jax.ShapeDtypeStruct((n_tiles, ROWS, LANE), jnp.float32),
        grid=(n_steps,),
        in_specs=[
            pl.BlockSpec((5, tiles_per_step, ROWS, LANE), lambda i: (0, i, 0, 0)),
            pl.BlockSpec((5, tiles_per_step, ROWS, LANE), lambda i: (0, i, 0, 0)),
            pl.BlockSpec((2, tiles_per_step, ROWS, LANE), lambda i: (0, i, 0, 0)),
        ],
        out_specs=pl.BlockSpec((tiles_per_step, ROWS, LANE), lambda i: (i, 0, 0)),
        compiler_params=pltpu.CompilerParams(dimension_semantics=("parallel",)),
    )(pred_t, gt_t, pts_t)
    return out.reshape(-1)[:n]


class SkewIoULossPallas:
    """JAX/Pallas port of skew_IoULoss.forward: loss_weight * sum_i -log(iou_i)."""

    def __init__(self, eps=1e-6, reduction="mean", loss_weight=1.0):
        self.eps = eps
        self.reduction = reduction
        self.loss_weight = loss_weight

    def __call__(self, pred, target, pos_point, weight=None, avg_factor=None,
                 reduction_override=None):
        assert reduction_override in (None, "none", "mean", "sum")
        # The reference inner loss already sums over boxes into a 0-d tensor, so
        # mean/sum/none reductions of that scalar are identical.
        # TODO(synk): elementwise `weight`/`avg_factor` from mmdet's
        # weight_reduce_loss is not meaningful for a 0-d loss and is ignored.
        per_box = skew_iou_per_box(pred, target, pos_point, eps=self.eps)
        return self.loss_weight * jnp.sum(per_box)


# --------------------- pure-Python reference (for validation) -----------------
def _ref_dist2rect(dist, pt):
    t, r, b, l, th = [float(v) for v in dist]
    x, y = [float(v) for v in pt]
    th = 5.0 / 4.0 * pi + th * pi / 2.0
    th = th % (pi / 2.0)
    if th < pi / 4.0:
        th += pi / 2.0
    ct, st = cos(th), sin(th)
    return [(x - b * ct - l * st, y - b * st + l * ct),
            (x + r * st - b * ct, y - r * ct - b * st),
            (x + t * ct + r * st, y + t * st - r * ct),
            (x - l * st + t * ct, y + l * ct + t * st)]


def _ref_intersection_area(r1, r2, pt):
    area1 = (float(r1[0]) + float(r1[2])) * (float(r1[3]) + float(r1[1]))
    area2 = (float(r2[0]) + float(r2[2])) * (float(r2[3]) + float(r2[1]))
    rect1 = _ref_dist2rect(r1, pt)
    rect2 = _ref_dist2rect(r2, pt)
    inter = rect1
    for p, q in zip(rect2, rect2[1:] + rect2[:1]):
        if len(inter) <= 2:
            break
        a = q[1] - p[1]; b = p[0] - q[0]; c = q[0] * p[1] - q[1] * p[0]
        vals = [a * v[0] + b * v[1] + c for v in inter]
        new = []
        for (s, t_), (sv, tv) in zip(zip(inter, inter[1:] + inter[:1]),
                                     zip(vals, vals[1:] + vals[:1])):
            if sv <= 0:
                new.append(s)
            if sv * tv < 0:
                a2 = t_[1] - s[1]; b2 = s[0] - t_[0]; c2 = t_[0] * s[1] - t_[1] * s[0]
                w = a * b2 - b * a2
                new.append(((b * c2 - c * b2) / w, (c * a2 - a * c2) / w))
        inter = new
    if len(inter) <= 2:
        return 0.0
    s = 0.0
    for pp, qq in zip(inter, inter[1:] + inter[:1]):
        s += pp[0] * qq[1] - pp[1] * qq[0]
    s *= 0.5
    return s / (area1 + area2 - s)


def _make_inputs(keys, n):
    k1, k2, k3, k4, k5 = keys
    pred = jnp.concatenate(
        [jax.random.uniform(k1, (n, 4), minval=0.5, maxval=2.0),
         jax.random.uniform(k2, (n, 1), minval=0.0, maxval=1.0)], axis=-1
    ).astype(jnp.float32)
    gt = jnp.concatenate(
        [jax.random.uniform(k3, (n, 4), minval=0.5, maxval=2.0),
         jax.random.uniform(k4, (n, 1), minval=0.0, maxval=1.0)], axis=-1
    ).astype(jnp.float32)
    pos = jax.random.uniform(k5, (n, 2), minval=-2.0, maxval=2.0).astype(jnp.float32)
    return pred, gt, pos


if __name__ == "__main__":
    keys = jax.random.split(jax.random.PRNGKey(0), 10)

    # --- small single-tile case -------------------------------------------------
    N = 200
    pred, gt, pos = _make_inputs(keys[:5], N)

    module = SkewIoULossPallas(eps=1e-6, reduction="mean", loss_weight=1.0)
    per_box = jax.block_until_ready(skew_iou_per_box(pred, gt, pos, eps=1e-6))
    loss = jax.block_until_ready(module(pred, gt, pos))

    pred_np = np.asarray(pred, dtype=np.float64)
    gt_np = np.asarray(gt, dtype=np.float64)
    pos_np = np.asarray(pos, dtype=np.float64)
    ref_per_box = np.array(
        [-log(max(_ref_intersection_area(pred_np[i], gt_np[i], pos_np[i]), 1e-6))
         for i in range(N)], dtype=np.float64)
    ref_loss = float(ref_per_box.sum())

    np.testing.assert_allclose(np.asarray(per_box, dtype=np.float64),
                               ref_per_box, rtol=2e-2, atol=2e-3)
    rel = abs(float(loss) - ref_loss) / max(abs(ref_loss), 1e-9)
    assert rel < 1e-3, (float(loss), ref_loss, rel)

    # --- multi-tile / multi-step case (in-kernel tile loop + 2-step grid) --------
    N2 = 2500
    pred2, gt2, pos2 = _make_inputs(keys[5:10], N2)
    per_box2 = jax.block_until_ready(skew_iou_per_box(pred2, gt2, pos2, eps=1e-6))
    p2 = np.asarray(pred2, dtype=np.float64)
    g2 = np.asarray(gt2, dtype=np.float64)
    s2 = np.asarray(pos2, dtype=np.float64)
    check_idx = list(range(0, N2, 37))
    ref2 = np.array(
        [-log(max(_ref_intersection_area(p2[i], g2[i], s2[i]), 1e-6))
         for i in check_idx], dtype=np.float64)
    np.testing.assert_allclose(np.asarray(per_box2, dtype=np.float64)[check_idx],
                               ref2, rtol=2e-2, atol=2e-3)

    print("KERNEL_OK")
</pallas_src>

<mosaic_0001>
module attributes {stable_mosaic.version = 11 : i64} {
  func.func @kernel(%arg0: i32, %arg1: memref<5x1x8x128xf32, #tpu.memory_space<vmem>>, %arg2: memref<5x1x8x128xf32, #tpu.memory_space<vmem>>, %arg3: memref<2x1x8x128xf32, #tpu.memory_space<vmem>>, %arg4: memref<1x8x128xf32, #tpu.memory_space<vmem>>) attributes {dimension_semantics = [#tpu.dimension_semantics<parallel>], iteration_bounds = array<i64: 1>, scalar_prefetch = 0 : i64, scratch_operands = 0 : i64, tpu.core_type = #tpu.core_type<tc>, window_params = [{transform_indices = @transform_0, window_bounds = array<i64: 5, 1, 8, 128>}, {transform_indices = @transform_1, window_bounds = array<i64: 5, 1, 8, 128>}, {transform_indices = @transform_2, window_bounds = array<i64: 2, 1, 8, 128>}, {transform_indices = @transform_3, window_bounds = array<i64: 1, 8, 128>}]} {
    %c0 = arith.constant 0 : index
    %c0_0 = arith.constant 0 : index
    %c0_1 = arith.constant 0 : index
    %c0_2 = arith.constant 0 : index
    %0 = vector.load %arg1[%c0, %c0_0, %c0_1, %c0_2] : memref<5x1x8x128xf32, #tpu.memory_space<vmem>>, vector<1x1x8x128xf32>
    %1 = vector.shape_cast %0 : vector<1x1x8x128xf32> to vector<8x128xf32>
    %c1 = arith.constant 1 : index
    %c0_3 = arith.constant 0 : index
    %c0_4 = arith.constant 0 : index
    %c0_5 = arith.constant 0 : index
    %2 = vector.load %arg1[%c1, %c0_3, %c0_4, %c0_5] : memref<5x1x8x128xf32, #tpu.memory_space<vmem>>, vector<1x1x8x128xf32>
    %3 = vector.shape_cast %2 : vector<1x1x8x128xf32> to vector<8x128xf32>
    %c2 = arith.constant 2 : index
    %c0_6 = arith.constant 0 : index
    %c0_7 = arith.constant 0 : index
    %c0_8 = arith.constant 0 : index
    %4 = vector.load %arg1[%c2, %c0_6, %c0_7, %c0_8] : memref<5x1x8x128xf32, #tpu.memory_space<vmem>>, vector<1x1x8x128xf32>
    %5 = vector.shape_cast %4 : vector<1x1x8x128xf32> to vector<8x128xf32>
    %c3 = arith.constant 3 : index
    %c0_9 = arith.constant 0 : index
    %c0_10 = arith.constant 0 : index
    %c0_11 = arith.constant 0 : index
    %6 = vector.load %arg1[%c3, %c0_9, %c0_10, %c0_11] : memref<5x1x8x128xf32, #tpu.memory_space<vmem>>, vector<1x1x8x128xf32>
    %7 = vector.shape_cast %6 : vector<1x1x8x128xf32> to vector<8x128xf32>
    %c4 = arith.constant 4 : index
    %c0_12 = arith.constant 0 : index
    %c0_13 = arith.constant 0 : index
    %c0_14 = arith.constant 0 : index
    %8 = vector.load %arg1[%c4, %c0_12, %c0_13, %c0_14] : memref<5x1x8x128xf32, #tpu.memory_space<vmem>>, vector<1x1x8x128xf32>
    %9 = vector.shape_cast %8 : vector<1x1x8x128xf32> to vector<8x128xf32>
    %c0_15 = arith.constant 0 : index
    %c0_16 = arith.constant 0 : index
    %c0_17 = arith.constant 0 : index
    %c0_18 = arith.constant 0 : index
    %10 = vector.load %arg2[%c0_15, %c0_16, %c0_17, %c0_18] : memref<5x1x8x128xf32, #tpu.memory_space<vmem>>, vector<1x1x8x128xf32>
    %11 = vector.shape_cast %10 : vector<1x1x8x128xf32> to vector<8x128xf32>
    %c1_19 = arith.constant 1 : index
    %c0_20 = arith.constant 0 : index
    %c0_21 = arith.constant 0 : index
    %c0_22 = arith.constant 0 : index
    %12 = vector.load %arg2[%c1_19, %c0_20, %c0_21, %c0_22] : memref<5x1x8x128xf32, #tpu.memory_space<vmem>>, vector<1x1x8x128xf32>
    %13 = vector.shape_cast %12 : vector<1x1x8x128xf32> to vector<8x128xf32>
    %c2_23 = arith.constant 2 : index
    %c0_24 = arith.constant 0 : index
    %c0_25 = arith.constant 0 : index
    %c0_26 = arith.constant 0 : index
    %14 = vector.load %arg2[%c2_23, %c0_24, %c0_25, %c0_26] : memref<5x1x8x128xf32, #tpu.memory_space<vmem>>, vector<1x1x8x128xf32>
    %15 = vector.shape_cast %14 : vector<1x1x8x128xf32> to vector<8x128xf32>
    %c3_27 = arith.constant 3 : index
    %c0_28 = arith.constant 0 : index
    %c0_29 = arith.constant 0 : index
    %c0_30 = arith.constant 0 : index
    %16 = vector.load %arg2[%c3_27, %c0_28, %c0_29, %c0_30] : memref<5x1x8x128xf32, #tpu.memory_space<vmem>>, vector<1x1x8x128xf32>
    %17 = vector.shape_cast %16 : vector<1x1x8x128xf32> to vector<8x128xf32>
    %c4_31 = arith.constant 4 : index
    %c0_32 = arith.constant 0 : index
    %c0_33 = arith.constant 0 : index
    %c0_34 = arith.constant 0 : index
    %18 = vector.load %arg2[%c4_31, %c0_32, %c0_33, %c0_34] : memref<5x1x8x128xf32, #tpu.memory_space<vmem>>, vector<1x1x8x128xf32>
    %19 = vector.shape_cast %18 : vector<1x1x8x128xf32> to vector<8x128xf32>
    %c0_35 = arith.constant 0 : index
    %c0_36 = arith.constant 0 : index
    %c0_37 = arith.constant 0 : index
    %c0_38 = arith.constant 0 : index
    %20 = vector.load %arg3[%c0_35, %c0_36, %c0_37, %c0_38] : memref<2x1x8x128xf32, #tpu.memory_space<vmem>>, vector<1x1x8x128xf32>
    %21 = vector.shape_cast %20 : vector<1x1x8x128xf32> to vector<8x128xf32>
    %c1_39 = arith.constant 1 : index
    %c0_40 = arith.constant 0 : index
    %c0_41 = arith.constant 0 : index
    %c0_42 = arith.constant 0 : index
    %22 = vector.load %arg3[%c1_39, %c0_40, %c0_41, %c0_42] : memref<2x1x8x128xf32, #tpu.memory_space<vmem>>, vector<1x1x8x128xf32>
    %23 = vector.shape_cast %22 : vector<1x1x8x128xf32> to vector<8x128xf32>
    %24 = arith.addf %1, %5 : vector<8x128xf32>
    %25 = arith.addf %7, %3 : vector<8x128xf32>
    %26 = arith.mulf %24, %25 : vector<8x128xf32>
    %27 = arith.addf %11, %15 : vector<8x128xf32>
    %28 = arith.addf %17, %13 : vector<8x128xf32>
    %29 = arith.mulf %27, %28 : vector<8x128xf32>
    %cst = arith.constant 1.57079637 : f32
    %30 = vector.broadcast %cst : f32 to vector<8x128xf32>
    %31 = arith.mulf %9, %30 : vector<8x128xf32>
    %cst_43 = arith.constant 3.92699075 : f32
    %32 = vector.broadcast %cst_43 : f32 to vector<8x128xf32>
    %33 = arith.addf %32, %31 : vector<8x128xf32>
    %cst_44 = arith.constant 0.636619746 : f32
    %34 = vector.broadcast %cst_44 : f32 to vector<8x128xf32>
    %35 = arith.mulf %33, %34 : vector<8x128xf32>
    %36 = math.floor %35 : vector<8x128xf32>
    %cst_45 = arith.constant 1.57079637 : f32
    %37 = vector.broadcast %cst_45 : f32 to vector<8x128xf32>
    %38 = arith.mulf %36, %37 : vector<8x128xf32>
    %39 = arith.subf %33, %38 : vector<8x128xf32>
    %cst_46 = arith.constant 0.785398185 : f32
    %40 = vector.broadcast %cst_46 : f32 to vector<8x128xf32>
    %41 = arith.cmpf olt, %39, %40 : vector<8x128xf32>
    %cst_47 = arith.constant 1.57079637 : f32
    %42 = vector.broadcast %cst_47 : f32 to vector<8x128xf32>
    %43 = arith.addf %39, %42 : vector<8x128xf32>
    %44 = arith.select %41, %43, %39 : vector<8x128xi1>, vector<8x128xf32>
    %45 = math.cos %44 : vector<8x128xf32>
    %46 = math.sin %44 : vector<8x128xf32>
    %47 = arith.mulf %1, %45 : vector<8x128xf32>
    %48 = arith.mulf %1, %46 : vector<8x128xf32>
    %49 = arith.mulf %3, %45 : vector<8x128xf32>
    %50 = arith.mulf %3, %46 : vector<8x128xf32>
    %51 = arith.mulf %5, %45 : vector<8x128xf32>
    %52 = arith.mulf %5, %46 : vector<8x128xf32>
    %53 = arith.mulf %7, %45 : vector<8x128xf32>
    %54 = arith.mulf %7, %46 : vector<8x128xf32>
    %55 = arith.subf %21, %51 : vector<8x128xf32>
    %56 = arith.subf %55, %54 : vector<8x128xf32>
    %57 = arith.subf %23, %52 : vector<8x128xf32>
    %58 = arith.addf %57, %53 : vector<8x128xf32>
    %59 = arith.addf %21, %50 : vector<8x128xf32>
    %60 = arith.subf %59, %51 : vector<8x128xf32>
    %61 = arith.subf %23, %49 : vector<8x128xf32>
    %62 = arith.subf %61, %52 : vector<8x128xf32>
    %63 = arith.addf %21, %47 : vector<8x128xf32>
    %64 = arith.addf %63, %50 : vector<8x128xf32>
    %65 = arith.addf %23, %48 : vector<8x128xf32>
    %66 = arith.subf %65, %49 : vector<8x128xf32>
    %67 = arith.subf %21, %54 : vector<8x128xf32>
    %68 = arith.addf %67, %47 : vector<8x128xf32>
    %69 = arith.addf %23, %53 : vector<8x128xf32>
    %70 = arith.addf %69, %48 : vector<8x128xf32>
    %cst_48 = arith.constant 1.57079637 : f32
    %71 = vector.broadcast %cst_48 : f32 to vector<8x128xf32>
    %72 = arith.mulf %19, %71 : vector<8x128xf32>
    %cst_49 = arith.constant 3.92699075 : f32
    %73 = vector.broadcast %cst_49 : f32 to vector<8x128xf32>
    %74 = arith.addf %73, %72 : vector<8x128xf32>
    %cst_50 = arith.constant 0.636619746 : f32
    %75 = vector.broadcast %cst_50 : f32 to vector<8x128xf32>
    %76 = arith.mulf %74, %75 : vector<8x128xf32>
    %77 = math.floor %76 : vector<8x128xf32>
    %cst_51 = arith.constant 1.57079637 : f32
    %78 = vector.broadcast %cst_51 : f32 to vector<8x128xf32>
    %79 = arith.mulf %77, %78 : vector<8x128xf32>
    %80 = arith.subf %74, %79 : vector<8x128xf32>
    %cst_52 = arith.constant 0.785398185 : f32
    %81 = vector.broadcast %cst_52 : f32 to vector<8x128xf32>
    %82 = arith.cmpf olt, %80, %81 : vector<8x128xf32>
    %cst_53 = arith.constant 1.57079637 : f32
    %83 = vector.broadcast %cst_53 : f32 to vector<8x128xf32>
    %84 = arith.addf %80, %83 : vector<8x128xf32>
    %85 = arith.select %82, %84, %80 : vector<8x128xi1>, vector<8x128xf32>
    %86 = math.cos %85 : vector<8x128xf32>
    %87 = math.sin %85 : vector<8x128xf32>
    %88 = arith.mulf %11, %86 : vector<8x128xf32>
    %89 = arith.mulf %11, %87 : vector<8x128xf32>
    %90 = arith.mulf %13, %86 : vector<8x128xf32>
    %91 = arith.mulf %13, %87 : vector<8x128xf32>
    %92 = arith.mulf %15, %86 : vector<8x128xf32>
    %93 = arith.mulf %15, %87 : vector<8x128xf32>
    %94 = arith.mulf %17, %86 : vector<8x128xf32>
    %95 = arith.mulf %17, %87 : vector<8x128xf32>
    %96 = arith.subf %21, %92 : vector<8x128xf32>
    %97 = arith.subf %96, %95 : vector<8x128xf32>
    %98 = arith.subf %23, %93 : vector<8x128xf32>
    %99 = arith.addf %98, %94 : vector<8x128xf32>
    %100 = arith.addf %21, %91 : vector<8x128xf32>
    %101 = arith.subf %100, %92 : vector<8x128xf32>
    %102 = arith.subf %23, %90 : vector<8x128xf32>
    %103 = arith.subf %102, %93 : vector<8x128xf32>
    %104 = arith.addf %21, %88 : vector<8x128xf32>
    %105 = arith.addf %104, %91 : vector<8x128xf32>
    %106 = arith.addf %23, %89 : vector<8x128xf32>
    %107 = arith.subf %106, %90 : vector<8x128xf32>
    %108 = arith.subf %21, %95 : vector<8x128xf32>
    %109 = arith.addf %108, %88 : vector<8x128xf32>
    %110 = arith.addf %23, %94 : vector<8x128xf32>
    %111 = arith.addf %110, %89 : vector<8x128xf32>
    %112 = arith.subf %103, %99 : vector<8x128xf32>
    %113 = arith.subf %97, %101 : vector<8x128xf32>
    %114 = arith.mulf %101, %99 : vector<8x128xf32>
    %115 = arith.mulf %103, %97 : vector<8x128xf32>
    %116 = arith.subf %114, %115 : vector<8x128xf32>
    %117 = arith.subf %107, %103 : vector<8x128xf32>
    %118 = arith.subf %101, %105 : vector<8x128xf32>
    %119 = arith.mulf %105, %103 : vector<8x128xf32>
    %120 = arith.mulf %107, %101 : vector<8x128xf32>
    %121 = arith.subf %119, %120 : vector<8x128xf32>
    %122 = arith.subf %111, %107 : vector<8x128xf32>
    %123 = arith.subf %105, %109 : vector<8x128xf32>
    %124 = arith.mulf %109, %107 : vector<8x128xf32>
    %125 = arith.mulf %111, %105 : vector<8x128xf32>
    %126 = arith.subf %124, %125 : vector<8x128xf32>
    %127 = arith.subf %99, %111 : vector<8x128xf32>
    %128 = arith.subf %109, %97 : vector<8x128xf32>
    %129 = arith.mulf %97, %111 : vector<8x128xf32>
    %130 = arith.mulf %99, %109 : vector<8x128xf32>
    %131 = arith.subf %129, %130 : vector<8x128xf32>
    %132 = arith.mulf %112, %56 : vector<8x128xf32>
    %133 = arith.mulf %113, %58 : vector<8x128xf32>
    %134 = arith.addf %132, %133 : vector<8x128xf32>
    %135 = arith.addf %134, %116 : vector<8x128xf32>
    %136 = arith.mulf %117, %56 : vector<8x128xf32>
    %137 = arith.mulf %118, %58 : vector<8x128xf32>
    %138 = arith.addf %136, %137 : vector<8x128xf32>
    %139 = arith.addf %138, %121 : vector<8x128xf32>
    %140 = arith.mulf %122, %56 : vector<8x128xf32>
    %141 = arith.mulf %123, %58 : vector<8x128xf32>
    %142 = arith.addf %140, %141 : vector<8x128xf32>
    %143 = arith.addf %142, %126 : vector<8x128xf32>
    %144 = arith.mulf %127, %56 : vector<8x128xf32>
    %145 = arith.mulf %128, %58 : vector<8x128xf32>
    %146 = arith.addf %144, %145 : vector<8x128xf32>
    %147 = arith.addf %146, %131 : vector<8x128xf32>
    %148 = arith.mulf %112, %60 : vector<8x128xf32>
    %149 = arith.mulf %113, %62 : vector<8x128xf32>
    %150 = arith.addf %148, %149 : vector<8x128xf32>
    %151 = arith.addf %150, %116 : vector<8x128xf32>
    %152 = arith.mulf %117, %60 : vector<8x128xf32>
    %153 = arith.mulf %118, %62 : vector<8x128xf32>
    %154 = arith.addf %152, %153 : vector<8x128xf32>
    %155 = arith.addf %154, %121 : vector<8x128xf32>
    %156 = arith.mulf %122, %60 : vector<8x128xf32>
    %157 = arith.mulf %123, %62 : vector<8x128xf32>
    %158 = arith.addf %156, %157 : vector<8x128xf32>
    %159 = arith.addf %158, %126 : vector<8x128xf32>
    %160 = arith.mulf %127, %60 : vector<8x128xf32>
    %161 = arith.mulf %128, %62 : vector<8x128xf32>
    %162 = arith.addf %160, %161 : vector<8x128xf32>
    %163 = arith.addf %162, %131 : vector<8x128xf32>
    %164 = arith.mulf %112, %64 : vector<8x128xf32>
    %165 = arith.mulf %113, %66 : vector<8x128xf32>
    %166 = arith.addf %164, %165 : vector<8x128xf32>
    %167 = arith.addf %166, %116 : vector<8x128xf32>
    %168 = arith.mulf %117, %64 : vector<8x128xf32>
    %169 = arith.mulf %118, %66 : vector<8x128xf32>
    %170 = arith.addf %168, %169 : vector<8x128xf32>
    %171 = arith.addf %170, %121 : vector<8x128xf32>
    %172 = arith.mulf %122, %64 : vector<8x128xf32>
    %173 = arith.mulf %123, %66 : vector<8x128xf32>
    %174 = arith.addf %172, %173 : vector<8x128xf32>
    %175 = arith.addf %174, %126 : vector<8x128xf32>
    %176 = arith.mulf %127, %64 : vector<8x128xf32>
    %177 = arith.mulf %128, %66 : vector<8x128xf32>
    %178 = arith.addf %176, %177 : vector<8x128xf32>
    %179 = arith.addf %178, %131 : vector<8x128xf32>
    %180 = arith.mulf %112, %68 : vector<8x128xf32>
    %181 = arith.mulf %113, %70 : vector<8x128xf32>
    %182 = arith.addf %180, %181 : vector<8x128xf32>
    %183 = arith.addf %182, %116 : vector<8x128xf32>
    %184 = arith.mulf %117, %68 : vector<8x128xf32>
    %185 = arith.mulf %118, %70 : vector<8x128xf32>
    %186 = arith.addf %184, %185 : vector<8x128xf32>
    %187 = arith.addf %186, %121 : vector<8x128xf32>
    %188 = arith.mulf %122, %68 : vector<8x128xf32>
    %189 = arith.mulf %123, %70 : vector<8x128xf32>
    %190 = arith.addf %188, %189 : vector<8x128xf32>
    %191 = arith.addf %190, %126 : vector<8x128xf32>
    %192 = arith.mulf %127, %68 : vector<8x128xf32>
    %193 = arith.mulf %128, %70 : vector<8x128xf32>
    %194 = arith.addf %192, %193 : vector<8x128xf32>
    %195 = arith.addf %194, %131 : vector<8x128xf32>
    %cst_54 = arith.constant 0.000000e+00 : f32
    %196 = vector.broadcast %cst_54 : f32 to vector<8x128xf32>
    %cst_55 = arith.constant 1.000000e+00 : f32
    %197 = vector.broadcast %cst_55 : f32 to vector<8x128xf32>
    %198 = arith.addf %196, %197 : vector<8x128xf32>
    %199 = arith.subf %60, %56 : vector<8x128xf32>
    %200 = arith.subf %62, %58 : vector<8x128xf32>
    %201 = arith.subf %151, %135 : vector<8x128xf32>
    %cst_56 = arith.constant 0.000000e+00 : f32
    %202 = vector.broadcast %cst_56 : f32 to vector<8x128xf32>
    %203 = arith.cmpf ogt, %201, %202 : vector<8x128xf32>
    %cst_57 = arith.constant 9.99999968E-21 : f32
    %204 = vector.broadcast %cst_57 : f32 to vector<8x128xf32>
    %205 = arith.maximumf %201, %204 : vector<8x128xf32>
    %cst_58 = arith.constant -9.99999968E-21 : f32
    %206 = vector.broadcast %cst_58 : f32 to vector<8x128xf32>
    %207 = arith.minimumf %201, %206 : vector<8x128xf32>
    %208 = arith.select %203, %205, %207 : vector<8x128xi1>, vector<8x128xf32>
    %209 = tpu.reciprocal %208 {approx = true} : vector<8x128xf32> -> vector<8x128xf32>
    %210 = arith.mulf %208, %209 : vector<8x128xf32>
    %cst_59 = arith.constant 2.000000e+00 : f32
    %211 = vector.broadcast %cst_59 : f32 to vector<8x128xf32>
    %212 = arith.subf %211, %210 : vector<8x128xf32>
    %213 = arith.mulf %209, %212 : vector<8x128xf32>
    %cst_60 = arith.constant 0.000000e+00 : f32
    %214 = vector.broadcast %cst_60 : f32 to vector<8x128xf32>
    %215 = arith.subf %214, %213 : vector<8x128xf32>
    %216 = arith.mulf %135, %215 : vector<8x128xf32>
    %217 = arith.minimumf %198, %216 : vector<8x128xf32>
    %218 = arith.select %203, %217, %198 : vector<8x128xi1>, vector<8x128xf32>
    %219 = arith.maximumf %196, %216 : vector<8x128xf32>
    %220 = arith.select %203, %196, %219 : vector<8x128xi1>, vector<8x128xf32>
    %221 = arith.subf %155, %139 : vector<8x128xf32>
    %cst_61 = arith.constant 0.000000e+00 : f32
    %222 = vector.broadcast %cst_61 : f32 to vector<8x128xf32>
    %223 = arith.cmpf ogt, %221, %222 : vector<8x128xf32>
    %cst_62 = arith.constant 9.99999968E-21 : f32
    %224 = vector.broadcast %cst_62 : f32 to vector<8x128xf32>
    %225 = arith.maximumf %221, %224 : vector<8x128xf32>
    %cst_63 = arith.constant -9.99999968E-21 : f32
    %226 = vector.broadcast %cst_63 : f32 to vector<8x128xf32>
    %227 = arith.minimumf %221, %226 : vector<8x128xf32>
    %228 = arith.select %223, %225, %227 : vector<8x128xi1>, vector<8x128xf32>
    %229 = tpu.reciprocal %228 {approx = true} : vector<8x128xf32> -> vector<8x128xf32>
    %230 = arith.mulf %228, %229 : vector<8x128xf32>
    %cst_64 = arith.constant 2.000000e+00 : f32
    %231 = vector.broadcast %cst_64 : f32 to vector<8x128xf32>
    %232 = arith.subf %231, %230 : vector<8x128xf32>
    %233 = arith.mulf %229, %232 : vector<8x128xf32>
    %cst_65 = arith.constant 0.000000e+00 : f32
    %234 = vector.broadcast %cst_65 : f32 to vector<8x128xf32>
    %235 = arith.subf %234, %233 : vector<8x128xf32>
    %236 = arith.mulf %139, %235 : vector<8x128xf32>
    %237 = arith.minimumf %218, %236 : vector<8x128xf32>
    %238 = arith.select %223, %237, %218 : vector<8x128xi1>, vector<8x128xf32>
    %239 = arith.maximumf %220, %236 : vector<8x128xf32>
    %240 = arith.select %223, %220, %239 : vector<8x128xi1>, vector<8x128xf32>
    %241 = arith.subf %159, %143 : vector<8x128xf32>
    %cst_66 = arith.constant 0.000000e+00 : f32
    %242 = vector.broadcast %cst_66 : f32 to vector<8x128xf32>
    %243 = arith.cmpf ogt, %241, %242 : vector<8x128xf32>
    %cst_67 = arith.constant 9.99999968E-21 : f32
    %244 = vector.broadcast %cst_67 : f32 to vector<8x128xf32>
    %245 = arith.maximumf %241, %244 : vector<8x128xf32>
    %cst_68 = arith.constant -9.99999968E-21 : f32
    %246 = vector.broadcast %cst_68 : f32 to vector<8x128xf32>
    %247 = arith.minimumf %241, %246 : vector<8x128xf32>
    %248 = arith.select %243, %245, %247 : vector<8x128xi1>, vector<8x128xf32>
    %249 = tpu.reciprocal %248 {approx = true} : vector<8x128xf32> -> vector<8x128xf32>
    %250 = arith.mulf %248, %249 : vector<8x128xf32>
    %cst_69 = arith.constant 2.000000e+00 : f32
    %251 = vector.broadcast %cst_69 : f32 to vector<8x128xf32>
    %252 = arith.subf %251, %250 : vector<8x128xf32>
    %253 = arith.mulf %249, %252 : vector<8x128xf32>
    %cst_70 = arith.constant 0.000000e+00 : f32
    %254 = vector.broadcast %cst_70 : f32 to vector<8x128xf32>
    %255 = arith.subf %254, %253 : vector<8x128xf32>
    %256 = arith.mulf %143, %255 : vector<8x128xf32>
    %257 = arith.minimumf %238, %256 : vector<8x128xf32>
    %258 = arith.select %243, %257, %238 : vector<8x128xi1>, vector<8x128xf32>
    %259 = arith.maximumf %240, %256 : vector<8x128xf32>
    %260 = arith.select %243, %240, %259 : vector<8x128xi1>, vector<8x128xf32>
    %261 = arith.subf %163, %147 : vector<8x128xf32>
    %cst_71 = arith.constant 0.000000e+00 : f32
    %262 = vector.broadcast %cst_71 : f32 to vector<8x128xf32>
    %263 = arith.cmpf ogt, %261, %262 : vector<8x128xf32>
    %cst_72 = arith.constant 9.99999968E-21 : f32
    %264 = vector.broadcast %cst_72 : f32 to vector<8x128xf32>
    %265 = arith.maximumf %261, %264 : vector<8x128xf32>
    %cst_73 = arith.constant -9.99999968E-21 : f32
    %266 = vector.broadcast %cst_73 : f32 to vector<8x128xf32>
    %267 = arith.minimumf %261, %266 : vector<8x128xf32>
    %268 = arith.select %263, %265, %267 : vector<8x128xi1>, vector<8x128xf32>
    %269 = tpu.reciprocal %268 {approx = true} : vector<8x128xf32> -> vector<8x128xf32>
    %270 = arith.mulf %268, %269 : vector<8x128xf32>
    %cst_74 = arith.constant 2.000000e+00 : f32
    %271 = vector.broadcast %cst_74 : f32 to vector<8x128xf32>
    %272 = arith.subf %271, %270 : vector<8x128xf32>
    %273 = arith.mulf %269, %272 : vector<8x128xf32>
    %cst_75 = arith.constant 0.000000e+00 : f32
    %274 = vector.broadcast %cst_75 : f32 to vector<8x128xf32>
    %275 = arith.subf %274, %273 : vector<8x128xf32>
    %276 = arith.mulf %147, %275 : vector<8x128xf32>
    %277 = arith.minimumf %258, %276 : vector<8x128xf32>
    %278 = arith.select %263, %277, %258 : vector<8x128xi1>, vector<8x128xf32>
    %279 = arith.maximumf %260, %276 : vector<8x128xf32>
    %280 = arith.select %263, %260, %279 : vector<8x128xi1>, vector<8x128xf32>
    %cst_76 = arith.constant 1.000000e+00 : f32
    %281 = vector.broadcast %cst_76 : f32 to vector<8x128xf32>
    %282 = arith.minimumf %280, %281 : vector<8x128xf32>
    %283 = arith.maximumf %278, %282 : vector<8x128xf32>
    %284 = arith.mulf %282, %199 : vector<8x128xf32>
    %285 = arith.addf %56, %284 : vector<8x128xf32>
    %286 = arith.mulf %282, %200 : vector<8x128xf32>
    %287 = arith.addf %58, %286 : vector<8x128xf32>
    %288 = arith.mulf %283, %199 : vector<8x128xf32>
    %289 = arith.addf %56, %288 : vector<8x128xf32>
    %290 = arith.mulf %283, %200 : vector<8x128xf32>
    %291 = arith.addf %58, %290 : vector<8x128xf32>
    %292 = arith.mulf %285, %291 : vector<8x128xf32>
    %293 = arith.mulf %287, %289 : vector<8x128xf32>
    %294 = arith.subf %292, %293 : vector<8x128xf32>
    %295 = arith.addf %196, %294 : vector<8x128xf32>
    %296 = arith.subf %64, %60 : vector<8x128xf32>
    %297 = arith.subf %66, %62 : vector<8x128xf32>
    %298 = arith.subf %167, %151 : vector<8x128xf32>
    %cst_77 = arith.constant 0.000000e+00 : f32
    %299 = vector.broadcast %cst_77 : f32 to vector<8x128xf32>
    %300 = arith.cmpf ogt, %298, %299 : vector<8x128xf32>
    %cst_78 = arith.constant 9.99999968E-21 : f32
    %301 = vector.broadcast %cst_78 : f32 to vector<8x128xf32>
    %302 = arith.maximumf %298, %301 : vector<8x128xf32>
    %cst_79 = arith.constant -9.99999968E-21 : f32
    %303 = vector.broadcast %cst_79 : f32 to vector<8x128xf32>
    %304 = arith.minimumf %298, %303 : vector<8x128xf32>
    %305 = arith.select %300, %302, %304 : vector<8x128xi1>, vector<8x128xf32>
    %306 = tpu.reciprocal %305 {approx = true} : vector<8x128xf32> -> vector<8x128xf32>
    %307 = arith.mulf %305, %306 : vector<8x128xf32>
    %cst_80 = arith.constant 2.000000e+00 : f32
    %308 = vector.broadcast %cst_80 : f32 to vector<8x128xf32>
    %309 = arith.subf %308, %307 : vector<8x128xf32>
    %310 = arith.mulf %306, %309 : vector<8x128xf32>
    %cst_81 = arith.constant 0.000000e+00 : f32
    %311 = vector.broadcast %cst_81 : f32 to vector<8x128xf32>
    %312 = arith.subf %311, %310 : vector<8x128xf32>
    %313 = arith.mulf %151, %312 : vector<8x128xf32>
    %314 = arith.minimumf %198, %313 : vector<8x128xf32>
    %315 = arith.select %300, %314, %198 : vector<8x128xi1>, vector<8x128xf32>
    %316 = arith.maximumf %196, %313 : vector<8x128xf32>
    %317 = arith.select %300, %196, %316 : vector<8x128xi1>, vector<8x128xf32>
    %318 = arith.subf %171, %155 : vector<8x128xf32>
    %cst_82 = arith.constant 0.000000e+00 : f32
    %319 = vector.broadcast %cst_82 : f32 to vector<8x128xf32>
    %320 = arith.cmpf ogt, %318, %319 : vector<8x128xf32>
    %cst_83 = arith.constant 9.99999968E-21 : f32
    %321 = vector.broadcast %cst_83 : f32 to vector<8x128xf32>
    %322 = arith.maximumf %318, %321 : vector<8x128xf32>
    %cst_84 = arith.constant -9.99999968E-21 : f32
    %323 = vector.broadcast %cst_84 : f32 to vector<8x128xf32>
    %324 = arith.minimumf %318, %323 : vector<8x128xf32>
    %325 = arith.select %320, %322, %324 : vector<8x128xi1>, vector<8x128xf32>
    %326 = tpu.reciprocal %325 {approx = true} : vector<8x128xf32> -> vector<8x128xf32>
    %327 = arith.mulf %325, %326 : vector<8x128xf32>
    %cst_85 = arith.constant 2.000000e+00 : f32
    %328 = vector.broadcast %cst_85 : f32 to vector<8x128xf32>
    %329 = arith.subf %328, %327 : vector<8x128xf32>
    %330 = arith.mulf %326, %329 : vector<8x128xf32>
    %cst_86 = arith.constant 0.000000e+00 : f32
    %331 = vector.broadcast %cst_86 : f32 to vector<8x128xf32>
    %332 = arith.subf %331, %330 : vector<8x128xf32>
    %333 = arith.mulf %155, %332 : vector<8x128xf32>
    %334 = arith.minimumf %315, %333 : vector<8x128xf32>
    %335 = arith.select %320, %334, %315 : vector<8x128xi1>, vector<8x128xf32>
    %336 = arith.maximumf %317, %333 : vector<8x128xf32>
    %337 = arith.select %320, %317, %336 : vector<8x128xi1>, vector<8x128xf32>
    %338 = arith.subf %175, %159 : vector<8x128xf32>
    %cst_87 = arith.constant 0.000000e+00 : f32
    %339 = vector.broadcast %cst_87 : f32 to vector<8x128xf32>
    %340 = arith.cmpf ogt, %338, %339 : vector<8x128xf32>
    %cst_88 = arith.constant 9.99999968E-21 : f32
    %341 = vector.broadcast %cst_88 : f32 to vector<8x128xf32>
    %342 = arith.maximumf %338, %341 : vector<8x128xf32>
    %cst_89 = arith.constant -9.99999968E-21 : f32
    %343 = vector.broadcast %cst_89 : f32 to vector<8x128xf32>
    %344 = arith.minimumf %338, %343 : vector<8x128xf32>
    %345 = arith.select %340, %342, %344 : vector<8x128xi1>, vector<8x128xf32>
    %346 = tpu.reciprocal %345 {approx = true} : vector<8x128xf32> -> vector<8x128xf32>
    %347 = arith.mulf %345, %346 : vector<8x128xf32>
    %cst_90 = arith.constant 2.000000e+00 : f32
    %348 = vector.broadcast %cst_90 : f32 to vector<8x128xf32>
    %349 = arith.subf %348, %347 : vector<8x128xf32>
    %350 = arith.mulf %346, %349 : vector<8x128xf32>
    %cst_91 = arith.constant 0.000000e+00 : f32
    %351 = vector.broadcast %cst_91 : f32 to vector<8x128xf32>
    %352 = arith.subf %351, %350 : vector<8x128xf32>
    %353 = arith.mulf %159, %352 : vector<8x128xf32>
    %354 = arith.minimumf %335, %353 : vector<8x128xf32>
    %355 = arith.select %340, %354, %335 : vector<8x128xi1>, vector<8x128xf32>
    %356 = arith.maximumf %337, %353 : vector<8x128xf32>
    %357 = arith.select %340, %337, %356 : vector<8x128xi1>, vector<8x128xf32>
    %358 = arith.subf %179, %163 : vector<8x128xf32>
    %cst_92 = arith.constant 0.000000e+00 : f32
    %359 = vector.broadcast %cst_92 : f32 to vector<8x128xf32>
    %360 = arith.cmpf ogt, %358, %359 : vector<8x128xf32>
    %cst_93 = arith.constant 9.99999968E-21 : f32
    %361 = vector.broadcast %cst_93 : f32 to vector<8x128xf32>
    %362 = arith.maximumf %358, %361 : vector<8x128xf32>
    %cst_94 = arith.constant -9.99999968E-21 : f32
    %363 = vector.broadcast %cst_94 : f32 to vector<8x128xf32>
    %364 = arith.minimumf %358, %363 : vector<8x128xf32>
    %365 = arith.select %360, %362, %364 : vector<8x128xi1>, vector<8x128xf32>
    %366 = tpu.reciprocal %365 {approx = true} : vector<8x128xf32> -> vector<8x128xf32>
    %367 = arith.mulf %365, %366 : vector<8x128xf32>
    %cst_95 = arith.constant 2.000000e+00 : f32
    %368 = vector.broadcast %cst_95 : f32 to vector<8x128xf32>
    %369 = arith.subf %368, %367 : vector<8x128xf32>
    %370 = arith.mulf %366, %369 : vector<8x128xf32>
    %cst_96 = arith.constant 0.000000e+00 : f32
    %371 = vector.broadcast %cst_96 : f32 to vector<8x128xf32>
    %372 = arith.subf %371, %370 : vector<8x128xf32>
    %373 = arith.mulf %163, %372 : vector<8x128xf32>
    %374 = arith.minimumf %355, %373 : vector<8x128xf32>
    %375 = arith.select %360, %374, %355 : vector<8x128xi1>, vector<8x128xf32>
    %376 = arith.maximumf %357, %373 : vector<8x128xf32>
    %377 = arith.select %360, %357, %376 : vector<8x128xi1>, vector<8x128xf32>
    %cst_97 = arith.constant 1.000000e+00 : f32
    %378 = vector.broadcast %cst_97 : f32 to vector<8x128xf32>
    %379 = arith.minimumf %377, %378 : vector<8x128xf32>
    %380 = arith.maximumf %375, %379 : vector<8x128xf32>
    %381 = arith.mulf %379, %296 : vector<8x128xf32>
    %382 = arith.addf %60, %381 : vector<8x128xf32>
    %383 = arith.mulf %379, %297 : vector<8x128xf32>
    %384 = arith.addf %62, %383 : vector<8x128xf32>
    %385 = arith.mulf %380, %296 : vector<8x128xf32>
    %386 = arith.addf %60, %385 : vector<8x128xf32>
    %387 = arith.mulf %380, %297 : vector<8x128xf32>
    %388 = arith.addf %62, %387 : vector<8x128xf32>
    %389 = arith.mulf %382, %388 : vector<8x128xf32>
    %390 = arith.mulf %384, %386 : vector<8x128xf32>
    %391 = arith.subf %389, %390 : vector<8x128xf32>
    %392 = arith.addf %295, %391 : vector<8x128xf32>
    %393 = arith.subf %68, %64 : vector<8x128xf32>
    %394 = arith.subf %70, %66 : vector<8x128xf32>
    %395 = arith.subf %183, %167 : vector<8x128xf32>
    %cst_98 = arith.constant 0.000000e+00 : f32
    %396 = vector.broadcast %cst_98 : f32 to vector<8x128xf32>
    %397 = arith.cmpf ogt, %395, %396 : vector<8x128xf32>
    %cst_99 = arith.constant 9.99999968E-21 : f32
    %398 = vector.broadcast %cst_99 : f32 to vector<8x128xf32>
    %399 = arith.maximumf %395, %398 : vector<8x128xf32>
    %cst_100 = arith.constant -9.99999968E-21 : f32
    %400 = vector.broadcast %cst_100 : f32 to vector<8x128xf32>
    %401 = arith.minimumf %395, %400 : vector<8x128xf32>
    %402 = arith.select %397, %399, %401 : vector<8x128xi1>, vector<8x128xf32>
    %403 = tpu.reciprocal %402 {approx = true} : vector<8x128xf32> -> vector<8x128xf32>
    %404 = arith.mulf %402, %403 : vector<8x128xf32>
    %cst_101 = arith.constant 2.000000e+00 : f32
    %405 = vector.broadcast %cst_101 : f32 to vector<8x128xf32>
    %406 = arith.subf %405, %404 : vector<8x128xf32>
    %407 = arith.mulf %403, %406 : vector<8x128xf32>
    %cst_102 = arith.constant 0.000000e+00 : f32
    %408 = vector.broadcast %cst_102 : f32 to vector<8x128xf32>
    %409 = arith.subf %408, %407 : vector<8x128xf32>
    %410 = arith.mulf %167, %409 : vector<8x128xf32>
    %411 = arith.minimumf %198, %410 : vector<8x128xf32>
    %412 = arith.select %397, %411, %198 : vector<8x128xi1>, vector<8x128xf32>
    %413 = arith.maximumf %196, %410 : vector<8x128xf32>
    %414 = arith.select %397, %196, %413 : vector<8x128xi1>, vector<8x128xf32>
    %415 = arith.subf %187, %171 : vector<8x128xf32>
    %cst_103 = arith.constant 0.000000e+00 : f32
    %416 = vector.broadcast %cst_103 : f32 to vector<8x128xf32>
    %417 = arith.cmpf ogt, %415, %416 : vector<8x128xf32>
    %cst_104 = arith.constant 9.99999968E-21 : f32
    %418 = vector.broadcast %cst_104 : f32 to vector<8x128xf32>
    %419 = arith.maximumf %415, %418 : vector<8x128xf32>
    %cst_105 = arith.constant -9.99999968E-21 : f32
    %420 = vector.broadcast %cst_105 : f32 to vector<8x128xf32>
    %421 = arith.minimumf %415, %420 : vector<8x128xf32>
    %422 = arith.select %417, %419, %421 : vector<8x128xi1>, vector<8x128xf32>
    %423 = tpu.reciprocal %422 {approx = true} : vector<8x128xf32> -> vector<8x128xf32>
    %424 = arith.mulf %422, %423 : vector<8x128xf32>
    %cst_106 = arith.constant 2.000000e+00 : f32
    %425 = vector.broadcast %cst_106 : f32 to vector<8x128xf32>
    %426 = arith.subf %425, %424 : vector<8x128xf32>
    %427 = arith.mulf %423, %426 : vector<8x128xf32>
    %cst_107 = arith.constant 0.000000e+00 : f32
    %428 = vector.broadcast %cst_107 : f32 to vector<8x128xf32>
    %429 = arith.subf %428, %427 : vector<8x128xf32>
    %430 = arith.mulf %171, %429 : vector<8x128xf32>
    %431 = arith.minimumf %412, %430 : vector<8x128xf32>
    %432 = arith.select %417, %431, %412 : vector<8x128xi1>, vector<8x128xf32>
    %433 = arith.maximumf %414, %430 : vector<8x128xf32>
    %434 = arith.select %417, %414, %433 : vector<8x128xi1>, vector<8x128xf32>
    %435 = arith.subf %191, %175 : vector<8x128xf32>
    %cst_108 = arith.constant 0.000000e+00 : f32
    %436 = vector.broadcast %cst_108 : f32 to vector<8x128xf32>
    %437 = arith.cmpf ogt, %435, %436 : vector<8x128xf32>
    %cst_109 = arith.constant 9.99999968E-21 : f32
    %438 = vector.broadcast %cst_109 : f32 to vector<8x128xf32>
    %439 = arith.maximumf %435, %438 : vector<8x128xf32>
    %cst_110 = arith.constant -9.99999968E-21 : f32
    %440 = vector.broadcast %cst_110 : f32 to vector<8x128xf32>
    %441 = arith.minimumf %435, %440 : vector<8x128xf32>
    %442 = arith.select %437, %439, %441 : vector<8x128xi1>, vector<8x128xf32>
    %443 = tpu.reciprocal %442 {approx = true} : vector<8x128xf32> -> vector<8x128xf32>
    %444 = arith.mulf %442, %443 : vector<8x128xf32>
    %cst_111 = arith.constant 2.000000e+00 : f32
    %445 = vector.broadcast %cst_111 : f32 to vector<8x128xf32>
    %446 = arith.subf %445, %444 : vector<8x128xf32>
    %447 = arith.mulf %443, %446 : vector<8x128xf32>
    %cst_112 = arith.constant 0.000000e+00 : f32
    %448 = vector.broadcast %cst_112 : f32 to vector<8x128xf32>
    %449 = arith.subf %448, %447 : vector<8x128xf32>
    %450 = arith.mulf %175, %449 : vector<8x128xf32>
    %451 = arith.minimumf %432, %450 : vector<8x128xf32>
    %452 = arith.select %437, %451, %432 : vector<8x128xi1>, vector<8x128xf32>
    %453 = arith.maximumf %434, %450 : vector<8x128xf32>
    %454 = arith.select %437, %434, %453 : vector<8x128xi1>, vector<8x128xf32>
    %455 = arith.subf %195, %179 : vector<8x128xf32>
    %cst_113 = arith.constant 0.000000e+00 : f32
    %456 = vector.broadcast %cst_113 : f32 to vector<8x128xf32>
    %457 = arith.cmpf ogt, %455, %456 : vector<8x128xf32>
    %cst_114 = arith.constant 9.99999968E-21 : f32
    %458 = vector.broadcast %cst_114 : f32 to vector<8x128xf32>
    %459 = arith.maximumf %455, %458 : vector<8x128xf32>
    %cst_115 = arith.constant -9.99999968E-21 : f32
    %460 = vector.broadcast %cst_115 : f32 to vector<8x128xf32>
    %461 = arith.minimumf %455, %460 : vector<8x128xf32>
    %462 = arith.select %457, %459, %461 : vector<8x128xi1>, vector<8x128xf32>
    %463 = tpu.reciprocal %462 {approx = true} : vector<8x128xf32> -> vector<8x128xf32>
    %464 = arith.mulf %462, %463 : vector<8x128xf32>
    %cst_116 = arith.constant 2.000000e+00 : f32
    %465 = vector.broadcast %cst_116 : f32 to vector<8x128xf32>
    %466 = arith.subf %465, %464 : vector<8x128xf32>
    %467 = arith.mulf %463, %466 : vector<8x128xf32>
    %cst_117 = arith.constant 0.000000e+00 : f32
    %468 = vector.broadcast %cst_117 : f32 to vector<8x128xf32>
    %469 = arith.subf %468, %467 : vector<8x128xf32>
    %470 = arith.mulf %179, %469 : vector<8x128xf32>
    %471 = arith.minimumf %452, %470 : vector<8x128xf32>
    %472 = arith.select %457, %471, %452 : vector<8x128xi1>, vector<8x128xf32>
    %473 = arith.maximumf %454, %470 : vector<8x128xf32>
    %474 = arith.select %457, %454, %473 : vector<8x128xi1>, vector<8x128xf32>
    %cst_118 = arith.constant 1.000000e+00 : f32
    %475 = vector.broadcast %cst_118 : f32 to vector<8x128xf32>
    %476 = arith.minimumf %474, %475 : vector<8x128xf32>
    %477 = arith.maximumf %472, %476 : vector<8x128xf32>
    %478 = arith.mulf %476, %393 : vector<8x128xf32>
    %479 = arith.addf %64, %478 : vector<8x128xf32>
    %480 = arith.mulf %476, %394 : vector<8x128xf32>
    %481 = arith.addf %66, %480 : vector<8x128xf32>
    %482 = arith.mulf %477, %393 : vector<8x128xf32>
    %483 = arith.addf %64, %482 : vector<8x128xf32>
    %484 = arith.mulf %477, %394 : vector<8x128xf32>
    %485 = arith.addf %66, %484 : vector<8x128xf32>
    %486 = arith.mulf %479, %485 : vector<8x128xf32>
    %487 = arith.mulf %481, %483 : vector<8x128xf32>
    %488 = arith.subf %486, %487 : vector<8x128xf32>
    %489 = arith.addf %392, %488 : vector<8x128xf32>
    %490 = arith.subf %56, %68 : vector<8x128xf32>
    %491 = arith.subf %58, %70 : vector<8x128xf32>
    %492 = arith.subf %135, %183 : vector<8x128xf32>
    %cst_119 = arith.constant 0.000000e+00 : f32
    %493 = vector.broadcast %cst_119 : f32 to vector<8x128xf32>
    %494 = arith.cmpf ogt, %492, %493 : vector<8x128xf32>
    %cst_120 = arith.constant 9.99999968E-21 : f32
    %495 = vector.broadcast %cst_120 : f32 to vector<8x128xf32>
    %496 = arith.maximumf %492, %495 : vector<8x128xf32>
    %cst_121 = arith.constant -9.99999968E-21 : f32
    %497 = vector.broadcast %cst_121 : f32 to vector<8x128xf32>
    %498 = arith.minimumf %492, %497 : vector<8x128xf32>
    %499 = arith.select %494, %496, %498 : vector<8x128xi1>, vector<8x128xf32>
    %500 = tpu.reciprocal %499 {approx = true} : vector<8x128xf32> -> vector<8x128xf32>
    %501 = arith.mulf %499, %500 : vector<8x128xf32>
    %cst_122 = arith.constant 2.000000e+00 : f32
    %502 = vector.broadcast %cst_122 : f32 to vector<8x128xf32>
    %503 = arith.subf %502, %501 : vector<8x128xf32>
    %504 = arith.mulf %500, %503 : vector<8x128xf32>
    %cst_123 = arith.constant 0.000000e+00 : f32
    %505 = vector.broadcast %cst_123 : f32 to vector<8x128xf32>
    %506 = arith.subf %505, %504 : vector<8x128xf32>
    %507 = arith.mulf %183, %506 : vector<8x128xf32>
    %508 = arith.minimumf %198, %507 : vector<8x128xf32>
    %509 = arith.select %494, %508, %198 : vector<8x128xi1>, vector<8x128xf32>
    %510 = arith.maximumf %196, %507 : vector<8x128xf32>
    %511 = arith.select %494, %196, %510 : vector<8x128xi1>, vector<8x128xf32>
    %512 = arith.subf %139, %187 : vector<8x128xf32>
    %cst_124 = arith.constant 0.000000e+00 : f32
    %513 = vector.broadcast %cst_124 : f32 to vector<8x128xf32>
    %514 = arith.cmpf ogt, %512, %513 : vector<8x128xf32>
    %cst_125 = arith.constant 9.99999968E-21 : f32
    %515 = vector.broadcast %cst_125 : f32 to vector<8x128xf32>
    %516 = arith.maximumf %512, %515 : vector<8x128xf32>
    %cst_126 = arith.constant -9.99999968E-21 : f32
    %517 = vector.broadcast %cst_126 : f32 to vector<8x128xf32>
    %518 = arith.minimumf %512, %517 : vector<8x128xf32>
    %519 = arith.select %514, %516, %518 : vector<8x128xi1>, vector<8x128xf32>
    %520 = tpu.reciprocal %519 {approx = true} : vector<8x128xf32> -> vector<8x128xf32>
    %521 = arith.mulf %519, %520 : vector<8x128xf32>
    %cst_127 = arith.constant 2.000000e+00 : f32
    %522 = vector.broadcast %cst_127 : f32 to vector<8x128xf32>
    %523 = arith.subf %522, %521 : vector<8x128xf32>
    %524 = arith.mulf %520, %523 : vector<8x128xf32>
    %cst_128 = arith.constant 0.000000e+00 : f32
    %525 = vector.broadcast %cst_128 : f32 to vector<8x128xf32>
    %526 = arith.subf %525, %524 : vector<8x128xf32>
    %527 = arith.mulf %187, %526 : vector<8x128xf32>
    %528 = arith.minimumf %509, %527 : vector<8x128xf32>
    %529 = arith.select %514, %528, %509 : vector<8x128xi1>, vector<8x128xf32>
    %530 = arith.maximumf %511, %527 : vector<8x128xf32>
    %531 = arith.select %514, %511, %530 : vector<8x128xi1>, vector<8x128xf32>
    %532 = arith.subf %143, %191 : vector<8x128xf32>
    %cst_129 = arith.constant 0.000000e+00 : f32
    %533 = vector.broadcast %cst_129 : f32 to vector<8x128xf32>
    %534 = arith.cmpf ogt, %532, %533 : vector<8x128xf32>
    %cst_130 = arith.constant 9.99999968E-21 : f32
    %535 = vector.broadcast %cst_130 : f32 to vector<8x128xf32>
    %536 = arith.maximumf %532, %535 : vector<8x128xf32>
    %cst_131 = arith.constant -9.99999968E-21 : f32
    %537 = vector.broadcast %cst_131 : f32 to vector<8x128xf32>
    %538 = arith.minimumf %532, %537 : vector<8x128xf32>
    %539 = arith.select %534, %536, %538 : vector<8x128xi1>, vector<8x128xf32>
    %540 = tpu.reciprocal %539 {approx = true} : vector<8x128xf32> -> vector<8x128xf32>
    %541 = arith.mulf %539, %540 : vector<8x128xf32>
    %cst_132 = arith.constant 2.000000e+00 : f32
    %542 = vector.broadcast %cst_132 : f32 to vector<8x128xf32>
    %543 = arith.subf %542, %541 : vector<8x128xf32>
    %544 = arith.mulf %540, %543 : vector<8x128xf32>
    %cst_133 = arith.constant 0.000000e+00 : f32
    %545 = vector.broadcast %cst_133 : f32 to vector<8x128xf32>
    %546 = arith.subf %545, %544 : vector<8x128xf32>
    %547 = arith.mulf %191, %546 : vector<8x128xf32>
    %548 = arith.minimumf %529, %547 : vector<8x128xf32>
    %549 = arith.select %534, %548, %529 : vector<8x128xi1>, vector<8x128xf32>
    %550 = arith.maximumf %531, %547 : vector<8x128xf32>
    %551 = arith.select %534, %531, %550 : vector<8x128xi1>, vector<8x128xf32>
    %552 = arith.subf %147, %195 : vector<8x128xf32>
    %cst_134 = arith.constant 0.000000e+00 : f32
    %553 = vector.broadcast %cst_134 : f32 to vector<8x128xf32>
    %554 = arith.cmpf ogt, %552, %553 : vector<8x128xf32>
    %cst_135 = arith.constant 9.99999968E-21 : f32
    %555 = vector.broadcast %cst_135 : f32 to vector<8x128xf32>
    %556 = arith.maximumf %552, %555 : vector<8x128xf32>
    %cst_136 = arith.constant -9.99999968E-21 : f32
    %557 = vector.broadcast %cst_136 : f32 to vector<8x128xf32>
    %558 = arith.minimumf %552, %557 : vector<8x128xf32>
    %559 = arith.select %554, %556, %558 : vector<8x128xi1>, vector<8x128xf32>
    %560 = tpu.reciprocal %559 {approx = true} : vector<8x128xf32> -> vector<8x128xf32>
    %561 = arith.mulf %559, %560 : vector<8x128xf32>
    %cst_137 = arith.constant 2.000000e+00 : f32
    %562 = vector.broadcast %cst_137 : f32 to vector<8x128xf32>
    %563 = arith.subf %562, %561 : vector<8x128xf32>
    %564 = arith.mulf %560, %563 : vector<8x128xf32>
    %cst_138 = arith.constant 0.000000e+00 : f32
    %565 = vector.broadcast %cst_138 : f32 to vector<8x128xf32>
    %566 = arith.subf %565, %564 : vector<8x128xf32>
    %567 = arith.mulf %195, %566 : vector<8x128xf32>
    %568 = arith.minimumf %549, %567 : vector<8x128xf32>
    %569 = arith.select %554, %568, %549 : vector<8x128xi1>, vector<8x128xf32>
    %570 = arith.maximumf %551, %567 : vector<8x128xf32>
    %571 = arith.select %554, %551, %570 : vector<8x128xi1>, vector<8x128xf32>
    %cst_139 = arith.constant 1.000000e+00 : f32
    %572 = vector.broadcast %cst_139 : f32 to vector<8x128xf32>
    %573 = arith.minimumf %571, %572 : vector<8x128xf32>
    %574 = arith.maximumf %569, %573 : vector<8x128xf32>
    %575 = arith.mulf %573, %490 : vector<8x128xf32>
    %576 = arith.addf %68, %575 : vector<8x128xf32>
    %577 = arith.mulf %573, %491 : vector<8x128xf32>
    %578 = arith.addf %70, %577 : vector<8x128xf32>
    %579 = arith.mulf %574, %490 : vector<8x128xf32>
    %580 = arith.addf %68, %579 : vector<8x128xf32>
    %581 = arith.mulf %574, %491 : vector<8x128xf32>
    %582 = arith.addf %70, %581 : vector<8x128xf32>
    %583 = arith.mulf %576, %582 : vector<8x128xf32>
    %584 = arith.mulf %578, %580 : vector<8x128xf32>
    %585 = arith.subf %583, %584 : vector<8x128xf32>
    %586 = arith.addf %489, %585 : vector<8x128xf32>
    %587 = arith.subf %62, %58 : vector<8x128xf32>
    %588 = arith.subf %56, %60 : vector<8x128xf32>
    %589 = arith.mulf %60, %58 : vector<8x128xf32>
    %590 = arith.mulf %62, %56 : vector<8x128xf32>
    %591 = arith.subf %589, %590 : vector<8x128xf32>
    %592 = arith.subf %66, %62 : vector<8x128xf32>
    %593 = arith.subf %60, %64 : vector<8x128xf32>
    %594 = arith.mulf %64, %62 : vector<8x128xf32>
    %595 = arith.mulf %66, %60 : vector<8x128xf32>
    %596 = arith.subf %594, %595 : vector<8x128xf32>
    %597 = arith.subf %70, %66 : vector<8x128xf32>
    %598 = arith.subf %64, %68 : vector<8x128xf32>
    %599 = arith.mulf %68, %66 : vector<8x128xf32>
    %600 = arith.mulf %70, %64 : vector<8x128xf32>
    %601 = arith.subf %599, %600 : vector<8x128xf32>
    %602 = arith.subf %58, %70 : vector<8x128xf32>
    %603 = arith.subf %68, %56 : vector<8x128xf32>
    %604 = arith.mulf %56, %70 : vector<8x128xf32>
    %605 = arith.mulf %58, %68 : vector<8x128xf32>
    %606 = arith.subf %604, %605 : vector<8x128xf32>
    %607 = arith.mulf %587, %97 : vector<8x128xf32>
    %608 = arith.mulf %588, %99 : vector<8x128xf32>
    %609 = arith.addf %607, %608 : vector<8x128xf32>
    %610 = arith.addf %609, %591 : vector<8x128xf32>
    %611 = arith.mulf %592, %97 : vector<8x128xf32>
    %612 = arith.mulf %593, %99 : vector<8x128xf32>
    %613 = arith.addf %611, %612 : vector<8x128xf32>
    %614 = arith.addf %613, %596 : vector<8x128xf32>
    %615 = arith.mulf %597, %97 : vector<8x128xf32>
    %616 = arith.mulf %598, %99 : vector<8x128xf32>
    %617 = arith.addf %615, %616 : vector<8x128xf32>
    %618 = arith.addf %617, %601 : vector<8x128xf32>
    %619 = arith.mulf %602, %97 : vector<8x128xf32>
    %620 = arith.mulf %603, %99 : vector<8x128xf32>
    %621 = arith.addf %619, %620 : vector<8x128xf32>
    %622 = arith.addf %621, %606 : vector<8x128xf32>
    %623 = arith.mulf %587, %101 : vector<8x128xf32>
    %624 = arith.mulf %588, %103 : vector<8x128xf32>
    %625 = arith.addf %623, %624 : vector<8x128xf32>
    %626 = arith.addf %625, %591 : vector<8x128xf32>
    %627 = arith.mulf %592, %101 : vector<8x128xf32>
    %628 = arith.mulf %593, %103 : vector<8x128xf32>
    %629 = arith.addf %627, %628 : vector<8x128xf32>
    %630 = arith.addf %629, %596 : vector<8x128xf32>
    %631 = arith.mulf %597, %101 : vector<8x128xf32>
    %632 = arith.mulf %598, %103 : vector<8x128xf32>
    %633 = arith.addf %631, %632 : vector<8x128xf32>
    %634 = arith.addf %633, %601 : vector<8x128xf32>
    %635 = arith.mulf %602, %101 : vector<8x128xf32>
    %636 = arith.mulf %603, %103 : vector<8x128xf32>
    %637 = arith.addf %635, %636 : vector<8x128xf32>
    %638 = arith.addf %637, %606 : vector<8x128xf32>
    %639 = arith.mulf %587, %105 : vector<8x128xf32>
    %640 = arith.mulf %588, %107 : vector<8x128xf32>
    %641 = arith.addf %639, %640 : vector<8x128xf32>
    %642 = arith.addf %641, %591 : vector<8x128xf32>
    %643 = arith.mulf %592, %105 : vector<8x128xf32>
    %644 = arith.mulf %593, %107 : vector<8x128xf32>
    %645 = arith.addf %643, %644 : vector<8x128xf32>
    %646 = arith.addf %645, %596 : vector<8x128xf32>
    %647 = arith.mulf %597, %105 : vector<8x128xf32>
    %648 = arith.mulf %598, %107 : vector<8x128xf32>
    %649 = arith.addf %647, %648 : vector<8x128xf32>
    %650 = arith.addf %649, %601 : vector<8x128xf32>
    %651 = arith.mulf %602, %105 : vector<8x128xf32>
    %652 = arith.mulf %603, %107 : vector<8x128xf32>
    %653 = arith.addf %651, %652 : vector<8x128xf32>
    %654 = arith.addf %653, %606 : vector<8x128xf32>
    %655 = arith.mulf %587, %109 : vector<8x128xf32>
    %656 = arith.mulf %588, %111 : vector<8x128xf32>
    %657 = arith.addf %655, %656 : vector<8x128xf32>
    %658 = arith.addf %657, %591 : vector<8x128xf32>
    %659 = arith.mulf %592, %109 : vector<8x128xf32>
    %660 = arith.mulf %593, %111 : vector<8x128xf32>
    %661 = arith.addf %659, %660 : vector<8x128xf32>
    %662 = arith.addf %661, %596 : vector<8x128xf32>
    %663 = arith.mulf %597, %109 : vector<8x128xf32>
    %664 = arith.mulf %598, %111 : vector<8x128xf32>
    %665 = arith.addf %663, %664 : vector<8x128xf32>
    %666 = arith.addf %665, %601 : vector<8x128xf32>
    %667 = arith.mulf %602, %109 : vector<8x128xf32>
    %668 = arith.mulf %603, %111 : vector<8x128xf32>
    %669 = arith.addf %667, %668 : vector<8x128xf32>
    %670 = arith.addf %669, %606 : vector<8x128xf32>
    %cst_140 = arith.constant 0.000000e+00 : f32
    %671 = vector.broadcast %cst_140 : f32 to vector<8x128xf32>
    %cst_141 = arith.constant 1.000000e+00 : f32
    %672 = vector.broadcast %cst_141 : f32 to vector<8x128xf32>
    %673 = arith.addf %671, %672 : vector<8x128xf32>
    %674 = arith.subf %101, %97 : vector<8x128xf32>
    %675 = arith.subf %103, %99 : vector<8x128xf32>
    %676 = arith.subf %626, %610 : vector<8x128xf32>
    %cst_142 = arith.constant 0.000000e+00 : f32
    %677 = vector.broadcast %cst_142 : f32 to vector<8x128xf32>
    %678 = arith.cmpf ogt, %676, %677 : vector<8x128xf32>
    %cst_143 = arith.constant 9.99999968E-21 : f32
    %679 = vector.broadcast %cst_143 : f32 to vector<8x128xf32>
    %680 = arith.maximumf %676, %679 : vector<8x128xf32>
    %cst_144 = arith.constant -9.99999968E-21 : f32
    %681 = vector.broadcast %cst_144 : f32 to vector<8x128xf32>
    %682 = arith.minimumf %676, %681 : vector<8x128xf32>
    %683 = arith.select %678, %680, %682 : vector<8x128xi1>, vector<8x128xf32>
    %684 = tpu.reciprocal %683 {approx = true} : vector<8x128xf32> -> vector<8x128xf32>
    %685 = arith.mulf %683, %684 : vector<8x128xf32>
    %cst_145 = arith.constant 2.000000e+00 : f32
    %686 = vector.broadcast %cst_145 : f32 to vector<8x128xf32>
    %687 = arith.subf %686, %685 : vector<8x128xf32>
    %688 = arith.mulf %684, %687 : vector<8x128xf32>
    %cst_146 = arith.constant 0.000000e+00 : f32
    %689 = vector.broadcast %cst_146 : f32 to vector<8x128xf32>
    %690 = arith.subf %689, %688 : vector<8x128xf32>
    %691 = arith.mulf %610, %690 : vector<8x128xf32>
    %692 = arith.minimumf %673, %691 : vector<8x128xf32>
    %693 = arith.select %678, %692, %673 : vector<8x128xi1>, vector<8x128xf32>
    %694 = arith.maximumf %671, %691 : vector<8x128xf32>
    %695 = arith.select %678, %671, %694 : vector<8x128xi1>, vector<8x128xf32>
    %696 = arith.subf %630, %614 : vector<8x128xf32>
    %cst_147 = arith.constant 0.000000e+00 : f32
    %697 = vector.broadcast %cst_147 : f32 to vector<8x128xf32>
    %698 = arith.cmpf ogt, %696, %697 : vector<8x128xf32>
    %cst_148 = arith.constant 9.99999968E-21 : f32
    %699 = vector.broadcast %cst_148 : f32 to vector<8x128xf32>
    %700 = arith.maximumf %696, %699 : vector<8x128xf32>
    %cst_149 = arith.constant -9.99999968E-21 : f32
    %701 = vector.broadcast %cst_149 : f32 to vector<8x128xf32>
    %702 = arith.minimumf %696, %701 : vector<8x128xf32>
    %703 = arith.select %698, %700, %702 : vector<8x128xi1>, vector<8x128xf32>
    %704 = tpu.reciprocal %703 {approx = true} : vector<8x128xf32> -> vector<8x128xf32>
    %705 = arith.mulf %703, %704 : vector<8x128xf32>
    %cst_150 = arith.constant 2.000000e+00 : f32
    %706 = vector.broadcast %cst_150 : f32 to vector<8x128xf32>
    %707 = arith.subf %706, %705 : vector<8x128xf32>
    %708 = arith.mulf %704, %707 : vector<8x128xf32>
    %cst_151 = arith.constant 0.000000e+00 : f32
    %709 = vector.broadcast %cst_151 : f32 to vector<8x128xf32>
    %710 = arith.subf %709, %708 : vector<8x128xf32>
    %711 = arith.mulf %614, %710 : vector<8x128xf32>
    %712 = arith.minimumf %693, %711 : vector<8x128xf32>
    %713 = arith.select %698, %712, %693 : vector<8x128xi1>, vector<8x128xf32>
    %714 = arith.maximumf %695, %711 : vector<8x128xf32>
    %715 = arith.select %698, %695, %714 : vector<8x128xi1>, vector<8x128xf32>
    %716 = arith.subf %634, %618 : vector<8x128xf32>
    %cst_152 = arith.constant 0.000000e+00 : f32
    %717 = vector.broadcast %cst_152 : f32 to vector<8x128xf32>
    %718 = arith.cmpf ogt, %716, %717 : vector<8x128xf32>
    %cst_153 = arith.constant 9.99999968E-21 : f32
    %719 = vector.broadcast %cst_153 : f32 to vector<8x128xf32>
    %720 = arith.maximumf %716, %719 : vector<8x128xf32>
    %cst_154 = arith.constant -9.99999968E-21 : f32
    %721 = vector.broadcast %cst_154 : f32 to vector<8x128xf32>
    %722 = arith.minimumf %716, %721 : vector<8x128xf32>
    %723 = arith.select %718, %720, %722 : vector<8x128xi1>, vector<8x128xf32>
    %724 = tpu.reciprocal %723 {approx = true} : vector<8x128xf32> -> vector<8x128xf32>
    %725 = arith.mulf %723, %724 : vector<8x128xf32>
    %cst_155 = arith.constant 2.000000e+00 : f32
    %726 = vector.broadcast %cst_155 : f32 to vector<8x128xf32>
    %727 = arith.subf %726, %725 : vector<8x128xf32>
    %728 = arith.mulf %724, %727 : vector<8x128xf32>
    %cst_156 = arith.constant 0.000000e+00 : f32
    %729 = vector.broadcast %cst_156 : f32 to vector<8x128xf32>
    %730 = arith.subf %729, %728 : vector<8x128xf32>
    %731 = arith.mulf %618, %730 : vector<8x128xf32>
    %732 = arith.minimumf %713, %731 : vector<8x128xf32>
    %733 = arith.select %718, %732, %713 : vector<8x128xi1>, vector<8x128xf32>
    %734 = arith.maximumf %715, %731 : vector<8x128xf32>
    %735 = arith.select %718, %715, %734 : vector<8x128xi1>, vector<8x128xf32>
    %736 = arith.subf %638, %622 : vector<8x128xf32>
    %cst_157 = arith.constant 0.000000e+00 : f32
    %737 = vector.broadcast %cst_157 : f32 to vector<8x128xf32>
    %738 = arith.cmpf ogt, %736, %737 : vector<8x128xf32>
    %cst_158 = arith.constant 9.99999968E-21 : f32
    %739 = vector.broadcast %cst_158 : f32 to vector<8x128xf32>
    %740 = arith.maximumf %736, %739 : vector<8x128xf32>
    %cst_159 = arith.constant -9.99999968E-21 : f32
    %741 = vector.broadcast %cst_159 : f32 to vector<8x128xf32>
    %742 = arith.minimumf %736, %741 : vector<8x128xf32>
    %743 = arith.select %738, %740, %742 : vector<8x128xi1>, vector<8x128xf32>
    %744 = tpu.reciprocal %743 {approx = true} : vector<8x128xf32> -> vector<8x128xf32>
    %745 = arith.mulf %743, %744 : vector<8x128xf32>
    %cst_160 = arith.constant 2.000000e+00 : f32
    %746 = vector.broadcast %cst_160 : f32 to vector<8x128xf32>
    %747 = arith.subf %746, %745 : vector<8x128xf32>
    %748 = arith.mulf %744, %747 : vector<8x128xf32>
    %cst_161 = arith.constant 0.000000e+00 : f32
    %749 = vector.broadcast %cst_161 : f32 to vector<8x128xf32>
    %750 = arith.subf %749, %748 : vector<8x128xf32>
    %751 = arith.mulf %622, %750 : vector<8x128xf32>
    %752 = arith.minimumf %733, %751 : vector<8x128xf32>
    %753 = arith.select %738, %752, %733 : vector<8x128xi1>, vector<8x128xf32>
    %754 = arith.maximumf %735, %751 : vector<8x128xf32>
    %755 = arith.select %738, %735, %754 : vector<8x128xi1>, vector<8x128xf32>
    %cst_162 = arith.constant 1.000000e+00 : f32
    %756 = vector.broadcast %cst_162 : f32 to vector<8x128xf32>
    %757 = arith.minimumf %755, %756 : vector<8x128xf32>
    %758 = arith.maximumf %753, %757 : vector<8x128xf32>
    %759 = arith.mulf %757, %674 : vector<8x128xf32>
    %760 = arith.addf %97, %759 : vector<8x128xf32>
    %761 = arith.mulf %757, %675 : vector<8x128xf32>
    %762 = arith.addf %99, %761 : vector<8x128xf32>
    %763 = arith.mulf %758, %674 : vector<8x128xf32>
    %764 = arith.addf %97, %763 : vector<8x128xf32>
    %765 = arith.mulf %758, %675 : vector<8x128xf32>
    %766 = arith.addf %99, %765 : vector<8x128xf32>
    %767 = arith.mulf %760, %766 : vector<8x128xf32>
    %768 = arith.mulf %762, %764 : vector<8x128xf32>
    %769 = arith.subf %767, %768 : vector<8x128xf32>
    %770 = arith.addf %671, %769 : vector<8x128xf32>
    %771 = arith.subf %105, %101 : vector<8x128xf32>
    %772 = arith.subf %107, %103 : vector<8x128xf32>
    %773 = arith.subf %642, %626 : vector<8x128xf32>
    %cst_163 = arith.constant 0.000000e+00 : f32
    %774 = vector.broadcast %cst_163 : f32 to vector<8x128xf32>
    %775 = arith.cmpf ogt, %773, %774 : vector<8x128xf32>
    %cst_164 = arith.constant 9.99999968E-21 : f32
    %776 = vector.broadcast %cst_164 : f32 to vector<8x128xf32>
    %777 = arith.maximumf %773, %776 : vector<8x128xf32>
    %cst_165 = arith.constant -9.99999968E-21 : f32
    %778 = vector.broadcast %cst_165 : f32 to vector<8x128xf32>
    %779 = arith.minimumf %773, %778 : vector<8x128xf32>
    %780 = arith.select %775, %777, %779 : vector<8x128xi1>, vector<8x128xf32>
    %781 = tpu.reciprocal %780 {approx = true} : vector<8x128xf32> -> vector<8x128xf32>
    %782 = arith.mulf %780, %781 : vector<8x128xf32>
    %cst_166 = arith.constant 2.000000e+00 : f32
    %783 = vector.broadcast %cst_166 : f32 to vector<8x128xf32>
    %784 = arith.subf %783, %782 : vector<8x128xf32>
    %785 = arith.mulf %781, %784 : vector<8x128xf32>
    %cst_167 = arith.constant 0.000000e+00 : f32
    %786 = vector.broadcast %cst_167 : f32 to vector<8x128xf32>
    %787 = arith.subf %786, %785 : vector<8x128xf32>
    %788 = arith.mulf %626, %787 : vector<8x128xf32>
    %789 = arith.minimumf %673, %788 : vector<8x128xf32>
    %790 = arith.select %775, %789, %673 : vector<8x128xi1>, vector<8x128xf32>
    %791 = arith.maximumf %671, %788 : vector<8x128xf32>
    %792 = arith.select %775, %671, %791 : vector<8x128xi1>, vector<8x128xf32>
    %793 = arith.subf %646, %630 : vector<8x128xf32>
    %cst_168 = arith.constant 0.000000e+00 : f32
    %794 = vector.broadcast %cst_168 : f32 to vector<8x128xf32>
    %795 = arith.cmpf ogt, %793, %794 : vector<8x128xf32>
    %cst_169 = arith.constant 9.99999968E-21 : f32
    %796 = vector.broadcast %cst_169 : f32 to vector<8x128xf32>
    %797 = arith.maximumf %793, %796 : vector<8x128xf32>
    %cst_170 = arith.constant -9.99999968E-21 : f32
    %798 = vector.broadcast %cst_170 : f32 to vector<8x128xf32>
    %799 = arith.minimumf %793, %798 : vector<8x128xf32>
    %800 = arith.select %795, %797, %799 : vector<8x128xi1>, vector<8x128xf32>
    %801 = tpu.reciprocal %800 {approx = true} : vector<8x128xf32> -> vector<8x128xf32>
    %802 = arith.mulf %800, %801 : vector<8x128xf32>
    %cst_171 = arith.constant 2.000000e+00 : f32
    %803 = vector.broadcast %cst_171 : f32 to vector<8x128xf32>
    %804 = arith.subf %803, %802 : vector<8x128xf32>
    %805 = arith.mulf %801, %804 : vector<8x128xf32>
    %cst_172 = arith.constant 0.000000e+00 : f32
    %806 = vector.broadcast %cst_172 : f32 to vector<8x128xf32>
    %807 = arith.subf %806, %805 : vector<8x128xf32>
    %808 = arith.mulf %630, %807 : vector<8x128xf32>
    %809 = arith.minimumf %790, %808 : vector<8x128xf32>
    %810 = arith.select %795, %809, %790 : vector<8x128xi1>, vector<8x128xf32>
    %811 = arith.maximumf %792, %808 : vector<8x128xf32>
    %812 = arith.select %795, %792, %811 : vector<8x128xi1>, vector<8x128xf32>
    %813 = arith.subf %650, %634 : vector<8x128xf32>
    %cst_173 = arith.constant 0.000000e+00 : f32
    %814 = vector.broadcast %cst_173 : f32 to vector<8x128xf32>
    %815 = arith.cmpf ogt, %813, %814 : vector<8x128xf32>
    %cst_174 = arith.constant 9.99999968E-21 : f32
    %816 = vector.broadcast %cst_174 : f32 to vector<8x128xf32>
    %817 = arith.maximumf %813, %816 : vector<8x128xf32>
    %cst_175 = arith.constant -9.99999968E-21 : f32
    %818 = vector.broadcast %cst_175 : f32 to vector<8x128xf32>
    %819 = arith.minimumf %813, %818 : vector<8x128xf32>
    %820 = arith.select %815, %817, %819 : vector<8x128xi1>, vector<8x128xf32>
    %821 = tpu.reciprocal %820 {approx = true} : vector<8x128xf32> -> vector<8x128xf32>
    %822 = arith.mulf %820, %821 : vector<8x128xf32>
    %cst_176 = arith.constant 2.000000e+00 : f32
    %823 = vector.broadcast %cst_176 : f32 to vector<8x128xf32>
    %824 = arith.subf %823, %822 : vector<8x128xf32>
    %825 = arith.mulf %821, %824 : vector<8x128xf32>
    %cst_177 = arith.constant 0.000000e+00 : f32
    %826 = vector.broadcast %cst_177 : f32 to vector<8x128xf32>
    %827 = arith.subf %826, %825 : vector<8x128xf32>
    %828 = arith.mulf %634, %827 : vector<8x128xf32>
    %829 = arith.minimumf %810, %828 : vector<8x128xf32>
    %830 = arith.select %815, %829, %810 : vector<8x128xi1>, vector<8x128xf32>
    %831 = arith.maximumf %812, %828 : vector<8x128xf32>
    %832 = arith.select %815, %812, %831 : vector<8x128xi1>, vector<8x128xf32>
    %833 = arith.subf %654, %638 : vector<8x128xf32>
    %cst_178 = arith.constant 0.000000e+00 : f32
    %834 = vector.broadcast %cst_178 : f32 to vector<8x128xf32>
    %835 = arith.cmpf ogt, %833, %834 : vector<8x128xf32>
    %cst_179 = arith.constant 9.99999968E-21 : f32
    %836 = vector.broadcast %cst_179 : f32 to vector<8x128xf32>
    %837 = arith.maximumf %833, %836 : vector<8x128xf32>
    %cst_180 = arith.constant -9.99999968E-21 : f32
    %838 = vector.broadcast %cst_180 : f32 to vector<8x128xf32>
    %839 = arith.minimumf %833, %838 : vector<8x128xf32>
    %840 = arith.select %835, %837, %839 : vector<8x128xi1>, vector<8x128xf32>
    %841 = tpu.reciprocal %840 {approx = true} : vector<8x128xf32> -> vector<8x128xf32>
    %842 = arith.mulf %840, %841 : vector<8x128xf32>
    %cst_181 = arith.constant 2.000000e+00 : f32
    %843 = vector.broadcast %cst_181 : f32 to vector<8x128xf32>
    %844 = arith.subf %843, %842 : vector<8x128xf32>
    %845 = arith.mulf %841, %844 : vector<8x128xf32>
    %cst_182 = arith.constant 0.000000e+00 : f32
    %846 = vector.broadcast %cst_182 : f32 to vector<8x128xf32>
    %847 = arith.subf %846, %845 : vector<8x128xf32>
    %848 = arith.mulf %638, %847 : vector<8x128xf32>
    %849 = arith.minimumf %830, %848 : vector<8x128xf32>
    %850 = arith.select %835, %849, %830 : vector<8x128xi1>, vector<8x128xf32>
    %851 = arith.maximumf %832, %848 : vector<8x128xf32>
    %852 = arith.select %835, %832, %851 : vector<8x128xi1>, vector<8x128xf32>
    %cst_183 = arith.constant 1.000000e+00 : f32
    %853 = vector.broadcast %cst_183 : f32 to vector<8x128xf32>
    %854 = arith.minimumf %852, %853 : vector<8x128xf32>
    %855 = arith.maximumf %850, %854 : vector<8x128xf32>
    %856 = arith.mulf %854, %771 : vector<8x128xf32>
    %857 = arith.addf %101, %856 : vector<8x128xf32>
    %858 = arith.mulf %854, %772 : vector<8x128xf32>
    %859 = arith.addf %103, %858 : vector<8x128xf32>
    %860 = arith.mulf %855, %771 : vector<8x128xf32>
    %861 = arith.addf %101, %860 : vector<8x128xf32>
    %862 = arith.mulf %855, %772 : vector<8x128xf32>
    %863 = arith.addf %103, %862 : vector<8x128xf32>
    %864 = arith.mulf %857, %863 : vector<8x128xf32>
    %865 = arith.mulf %859, %861 : vector<8x128xf32>
    %866 = arith.subf %864, %865 : vector<8x128xf32>
    %867 = arith.addf %770, %866 : vector<8x128xf32>
    %868 = arith.subf %109, %105 : vector<8x128xf32>
    %869 = arith.subf %111, %107 : vector<8x128xf32>
    %870 = arith.subf %658, %642 : vector<8x128xf32>
    %cst_184 = arith.constant 0.000000e+00 : f32
    %871 = vector.broadcast %cst_184 : f32 to vector<8x128xf32>
    %872 = arith.cmpf ogt, %870, %871 : vector<8x128xf32>
    %cst_185 = arith.constant 9.99999968E-21 : f32
    %873 = vector.broadcast %cst_185 : f32 to vector<8x128xf32>
    %874 = arith.maximumf %870, %873 : vector<8x128xf32>
    %cst_186 = arith.constant -9.99999968E-21 : f32
    %875 = vector.broadcast %cst_186 : f32 to vector<8x128xf32>
    %876 = arith.minimumf %870, %875 : vector<8x128xf32>
    %877 = arith.select %872, %874, %876 : vector<8x128xi1>, vector<8x128xf32>
    %878 = tpu.reciprocal %877 {approx = true} : vector<8x128xf32> -> vector<8x128xf32>
    %879 = arith.mulf %877, %878 : vector<8x128xf32>
    %cst_187 = arith.constant 2.000000e+00 : f32
    %880 = vector.broadcast %cst_187 : f32 to vector<8x128xf32>
    %881 = arith.subf %880, %879 : vector<8x128xf32>
    %882 = arith.mulf %878, %881 : vector<8x128xf32>
    %cst_188 = arith.constant 0.000000e+00 : f32
    %883 = vector.broadcast %cst_188 : f32 to vector<8x128xf32>
    %884 = arith.subf %883, %882 : vector<8x128xf32>
    %885 = arith.mulf %642, %884 : vector<8x128xf32>
    %886 = arith.minimumf %673, %885 : vector<8x128xf32>
    %887 = arith.select %872, %886, %673 : vector<8x128xi1>, vector<8x128xf32>
    %888 = arith.maximumf %671, %885 : vector<8x128xf32>
    %889 = arith.select %872, %671, %888 : vector<8x128xi1>, vector<8x128xf32>
    %890 = arith.subf %662, %646 : vector<8x128xf32>
    %cst_189 = arith.constant 0.000000e+00 : f32
    %891 = vector.broadcast %cst_189 : f32 to vector<8x128xf32>
    %892 = arith.cmpf ogt, %890, %891 : vector<8x128xf32>
    %cst_190 = arith.constant 9.99999968E-21 : f32
    %893 = vector.broadcast %cst_190 : f32 to vector<8x128xf32>
    %894 = arith.maximumf %890, %893 : vector<8x128xf32>
    %cst_191 = arith.constant -9.99999968E-21 : f32
    %895 = vector.broadcast %cst_191 : f32 to vector<8x128xf32>
    %896 = arith.minimumf %890, %895 : vector<8x128xf32>
    %897 = arith.select %892, %894, %896 : vector<8x128xi1>, vector<8x128xf32>
    %898 = tpu.reciprocal %897 {approx = true} : vector<8x128xf32> -> vector<8x128xf32>
    %899 = arith.mulf %897, %898 : vector<8x128xf32>
    %cst_192 = arith.constant 2.000000e+00 : f32
    %900 = vector.broadcast %cst_192 : f32 to vector<8x128xf32>
    %901 = arith.subf %900, %899 : vector<8x128xf32>
    %902 = arith.mulf %898, %901 : vector<8x128xf32>
    %cst_193 = arith.constant 0.000000e+00 : f32
    %903 = vector.broadcast %cst_193 : f32 to vector<8x128xf32>
    %904 = arith.subf %903, %902 : vector<8x128xf32>
    %905 = arith.mulf %646, %904 : vector<8x128xf32>
    %906 = arith.minimumf %887, %905 : vector<8x128xf32>
    %907 = arith.select %892, %906, %887 : vector<8x128xi1>, vector<8x128xf32>
    %908 = arith.maximumf %889, %905 : vector<8x128xf32>
    %909 = arith.select %892, %889, %908 : vector<8x128xi1>, vector<8x128xf32>
    %910 = arith.subf %666, %650 : vector<8x128xf32>
    %cst_194 = arith.constant 0.000000e+00 : f32
    %911 = vector.broadcast %cst_194 : f32 to vector<8x128xf32>
    %912 = arith.cmpf ogt, %910, %911 : vector<8x128xf32>
    %cst_195 = arith.constant 9.99999968E-21 : f32
    %913 = vector.broadcast %cst_195 : f32 to vector<8x128xf32>
    %914 = arith.maximumf %910, %913 : vector<8x128xf32>
    %cst_196 = arith.constant -9.99999968E-21 : f32
    %915 = vector.broadcast %cst_196 : f32 to vector<8x128xf32>
    %916 = arith.minimumf %910, %915 : vector<8x128xf32>
    %917 = arith.select %912, %914, %916 : vector<8x128xi1>, vector<8x128xf32>
    %918 = tpu.reciprocal %917 {approx = true} : vector<8x128xf32> -> vector<8x128xf32>
    %919 = arith.mulf %917, %918 : vector<8x128xf32>
    %cst_197 = arith.constant 2.000000e+00 : f32
    %920 = vector.broadcast %cst_197 : f32 to vector<8x128xf32>
    %921 = arith.subf %920, %919 : vector<8x128xf32>
    %922 = arith.mulf %918, %921 : vector<8x128xf32>
    %cst_198 = arith.constant 0.000000e+00 : f32
    %923 = vector.broadcast %cst_198 : f32 to vector<8x128xf32>
    %924 = arith.subf %923, %922 : vector<8x128xf32>
    %925 = arith.mulf %650, %924 : vector<8x128xf32>
    %926 = arith.minimumf %907, %925 : vector<8x128xf32>
    %927 = arith.select %912, %926, %907 : vector<8x128xi1>, vector<8x128xf32>
    %928 = arith.maximumf %909, %925 : vector<8x128xf32>
    %929 = arith.select %912, %909, %928 : vector<8x128xi1>, vector<8x128xf32>
    %930 = arith.subf %670, %654 : vector<8x128xf32>
    %cst_199 = arith.constant 0.000000e+00 : f32
    %931 = vector.broadcast %cst_199 : f32 to vector<8x128xf32>
    %932 = arith.cmpf ogt, %930, %931 : vector<8x128xf32>
    %cst_200 = arith.constant 9.99999968E-21 : f32
    %933 = vector.broadcast %cst_200 : f32 to vector<8x128xf32>
    %934 = arith.maximumf %930, %933 : vector<8x128xf32>
    %cst_201 = arith.constant -9.99999968E-21 : f32
    %935 = vector.broadcast %cst_201 : f32 to vector<8x128xf32>
    %936 = arith.minimumf %930, %935 : vector<8x128xf32>
    %937 = arith.select %932, %934, %936 : vector<8x128xi1>, vector<8x128xf32>
    %938 = tpu.reciprocal %937 {approx = true} : vector<8x128xf32> -> vector<8x128xf32>
    %939 = arith.mulf %937, %938 : vector<8x128xf32>
    %cst_202 = arith.constant 2.000000e+00 : f32
    %940 = vector.broadcast %cst_202 : f32 to vector<8x128xf32>
    %941 = arith.subf %940, %939 : vector<8x128xf32>
    %942 = arith.mulf %938, %941 : vector<8x128xf32>
    %cst_203 = arith.constant 0.000000e+00 : f32
    %943 = vector.broadcast %cst_203 : f32 to vector<8x128xf32>
    %944 = arith.subf %943, %942 : vector<8x128xf32>
    %945 = arith.mulf %654, %944 : vector<8x128xf32>
    %946 = arith.minimumf %927, %945 : vector<8x128xf32>
    %947 = arith.select %932, %946, %927 : vector<8x128xi1>, vector<8x128xf32>
    %948 = arith.maximumf %929, %945 : vector<8x128xf32>
    %949 = arith.select %932, %929, %948 : vector<8x128xi1>, vector<8x128xf32>
    %cst_204 = arith.constant 1.000000e+00 : f32
    %950 = vector.broadcast %cst_204 : f32 to vector<8x128xf32>
    %951 = arith.minimumf %949, %950 : vector<8x128xf32>
    %952 = arith.maximumf %947, %951 : vector<8x128xf32>
    %953 = arith.mulf %951, %868 : vector<8x128xf32>
    %954 = arith.addf %105, %953 : vector<8x128xf32>
    %955 = arith.mulf %951, %869 : vector<8x128xf32>
    %956 = arith.addf %107, %955 : vector<8x128xf32>
    %957 = arith.mulf %952, %868 : vector<8x128xf32>
    %958 = arith.addf %105, %957 : vector<8x128xf32>
    %959 = arith.mulf %952, %869 : vector<8x128xf32>
    %960 = arith.addf %107, %959 : vector<8x128xf32>
    %961 = arith.mulf %954, %960 : vector<8x128xf32>
    %962 = arith.mulf %956, %958 : vector<8x128xf32>
    %963 = arith.subf %961, %962 : vector<8x128xf32>
    %964 = arith.addf %867, %963 : vector<8x128xf32>
    %965 = arith.subf %97, %109 : vector<8x128xf32>
    %966 = arith.subf %99, %111 : vector<8x128xf32>
    %967 = arith.subf %610, %658 : vector<8x128xf32>
    %cst_205 = arith.constant 0.000000e+00 : f32
    %968 = vector.broadcast %cst_205 : f32 to vector<8x128xf32>
    %969 = arith.cmpf ogt, %967, %968 : vector<8x128xf32>
    %cst_206 = arith.constant 9.99999968E-21 : f32
    %970 = vector.broadcast %cst_206 : f32 to vector<8x128xf32>
    %971 = arith.maximumf %967, %970 : vector<8x128xf32>
    %cst_207 = arith.constant -9.99999968E-21 : f32
    %972 = vector.broadcast %cst_207 : f32 to vector<8x128xf32>
    %973 = arith.minimumf %967, %972 : vector<8x128xf32>
    %974 = arith.select %969, %971, %973 : vector<8x128xi1>, vector<8x128xf32>
    %975 = tpu.reciprocal %974 {approx = true} : vector<8x128xf32> -> vector<8x128xf32>
    %976 = arith.mulf %974, %975 : vector<8x128xf32>
    %cst_208 = arith.constant 2.000000e+00 : f32
    %977 = vector.broadcast %cst_208 : f32 to vector<8x128xf32>
    %978 = arith.subf %977, %976 : vector<8x128xf32>
    %979 = arith.mulf %975, %978 : vector<8x128xf32>
    %cst_209 = arith.constant 0.000000e+00 : f32
    %980 = vector.broadcast %cst_209 : f32 to vector<8x128xf32>
    %981 = arith.subf %980, %979 : vector<8x128xf32>
    %982 = arith.mulf %658, %981 : vector<8x128xf32>
    %983 = arith.minimumf %673, %982 : vector<8x128xf32>
    %984 = arith.select %969, %983, %673 : vector<8x128xi1>, vector<8x128xf32>
    %985 = arith.maximumf %671, %982 : vector<8x128xf32>
    %986 = arith.select %969, %671, %985 : vector<8x128xi1>, vector<8x128xf32>
    %987 = arith.subf %614, %662 : vector<8x128xf32>
    %cst_210 = arith.constant 0.000000e+00 : f32
    %988 = vector.broadcast %cst_210 : f32 to vector<8x128xf32>
    %989 = arith.cmpf ogt, %987, %988 : vector<8x128xf32>
    %cst_211 = arith.constant 9.99999968E-21 : f32
    %990 = vector.broadcast %cst_211 : f32 to vector<8x128xf32>
    %991 = arith.maximumf %987, %990 : vector<8x128xf32>
    %cst_212 = arith.constant -9.99999968E-21 : f32
    %992 = vector.broadcast %cst_212 : f32 to vector<8x128xf32>
    %993 = arith.minimumf %987, %992 : vector<8x128xf32>
    %994 = arith.select %989, %991, %993 : vector<8x128xi1>, vector<8x128xf32>
    %995 = tpu.reciprocal %994 {approx = true} : vector<8x128xf32> -> vector<8x128xf32>
    %996 = arith.mulf %994, %995 : vector<8x128xf32>
    %cst_213 = arith.constant 2.000000e+00 : f32
    %997 = vector.broadcast %cst_213 : f32 to vector<8x128xf32>
    %998 = arith.subf %997, %996 : vector<8x128xf32>
    %999 = arith.mulf %995, %998 : vector<8x128xf32>
    %cst_214 = arith.constant 0.000000e+00 : f32
    %1000 = vector.broadcast %cst_214 : f32 to vector<8x128xf32>
    %1001 = arith.subf %1000, %999 : vector<8x128xf32>
    %1002 = arith.mulf %662, %1001 : vector<8x128xf32>
    %1003 = arith.minimumf %984, %1002 : vector<8x128xf32>
    %1004 = arith.select %989, %1003, %984 : vector<8x128xi1>, vector<8x128xf32>
    %1005 = arith.maximumf %986, %1002 : vector<8x128xf32>
    %1006 = arith.select %989, %986, %1005 : vector<8x128xi1>, vector<8x128xf32>
    %1007 = arith.subf %618, %666 : vector<8x128xf32>
    %cst_215 = arith.constant 0.000000e+00 : f32
    %1008 = vector.broadcast %cst_215 : f32 to vector<8x128xf32>
    %1009 = arith.cmpf ogt, %1007, %1008 : vector<8x128xf32>
    %cst_216 = arith.constant 9.99999968E-21 : f32
    %1010 = vector.broadcast %cst_216 : f32 to vector<8x128xf32>
    %1011 = arith.maximumf %1007, %1010 : vector<8x128xf32>
    %cst_217 = arith.constant -9.99999968E-21 : f32
    %1012 = vector.broadcast %cst_217 : f32 to vector<8x128xf32>
    %1013 = arith.minimumf %1007, %1012 : vector<8x128xf32>
    %1014 = arith.select %1009, %1011, %1013 : vector<8x128xi1>, vector<8x128xf32>
    %1015 = tpu.reciprocal %1014 {approx = true} : vector<8x128xf32> -> vector<8x128xf32>
    %1016 = arith.mulf %1014, %1015 : vector<8x128xf32>
    %cst_218 = arith.constant 2.000000e+00 : f32
    %1017 = vector.broadcast %cst_218 : f32 to vector<8x128xf32>
    %1018 = arith.subf %1017, %1016 : vector<8x128xf32>
    %1019 = arith.mulf %1015, %1018 : vector<8x128xf32>
    %cst_219 = arith.constant 0.000000e+00 : f32
    %1020 = vector.broadcast %cst_219 : f32 to vector<8x128xf32>
    %1021 = arith.subf %1020, %1019 : vector<8x128xf32>
    %1022 = arith.mulf %666, %1021 : vector<8x128xf32>
    %1023 = arith.minimumf %1004, %1022 : vector<8x128xf32>
    %1024 = arith.select %1009, %1023, %1004 : vector<8x128xi1>, vector<8x128xf32>
    %1025 = arith.maximumf %1006, %1022 : vector<8x128xf32>
    %1026 = arith.select %1009, %1006, %1025 : vector<8x128xi1>, vector<8x128xf32>
    %1027 = arith.subf %622, %670 : vector<8x128xf32>
    %cst_220 = arith.constant 0.000000e+00 : f32
    %1028 = vector.broadcast %cst_220 : f32 to vector<8x128xf32>
    %1029 = arith.cmpf ogt, %1027, %1028 : vector<8x128xf32>
    %cst_221 = arith.constant 9.99999968E-21 : f32
    %1030 = vector.broadcast %cst_221 : f32 to vector<8x128xf32>
    %1031 = arith.maximumf %1027, %1030 : vector<8x128xf32>
    %cst_222 = arith.constant -9.99999968E-21 : f32
    %1032 = vector.broadcast %cst_222 : f32 to vector<8x128xf32>
    %1033 = arith.minimumf %1027, %1032 : vector<8x128xf32>
    %1034 = arith.select %1029, %1031, %1033 : vector<8x128xi1>, vector<8x128xf32>
    %1035 = tpu.reciprocal %1034 {approx = true} : vector<8x128xf32> -> vector<8x128xf32>
    %1036 = arith.mulf %1034, %1035 : vector<8x128xf32>
    %cst_223 = arith.constant 2.000000e+00 : f32
    %1037 = vector.broadcast %cst_223 : f32 to vector<8x128xf32>
    %1038 = arith.subf %1037, %1036 : vector<8x128xf32>
    %1039 = arith.mulf %1035, %1038 : vector<8x128xf32>
    %cst_224 = arith.constant 0.000000e+00 : f32
    %1040 = vector.broadcast %cst_224 : f32 to vector<8x128xf32>
    %1041 = arith.subf %1040, %1039 : vector<8x128xf32>
    %1042 = arith.mulf %670, %1041 : vector<8x128xf32>
    %1043 = arith.minimumf %1024, %1042 : vector<8x128xf32>
    %1044 = arith.select %1029, %1043, %1024 : vector<8x128xi1>, vector<8x128xf32>
    %1045 = arith.maximumf %1026, %1042 : vector<8x128xf32>
    %1046 = arith.select %1029, %1026, %1045 : vector<8x128xi1>, vector<8x128xf32>
    %cst_225 = arith.constant 1.000000e+00 : f32
    %1047 = vector.broadcast %cst_225 : f32 to vector<8x128xf32>
    %1048 = arith.minimumf %1046, %1047 : vector<8x128xf32>
    %1049 = arith.maximumf %1044, %1048 : vector<8x128xf32>
    %1050 = arith.mulf %1048, %965 : vector<8x128xf32>
    %1051 = arith.addf %109, %1050 : vector<8x128xf32>
    %1052 = arith.mulf %1048, %966 : vector<8x128xf32>
    %1053 = arith.addf %111, %1052 : vector<8x128xf32>
    %1054 = arith.mulf %1049, %965 : vector<8x128xf32>
    %1055 = arith.addf %109, %1054 : vector<8x128xf32>
    %1056 = arith.mulf %1049, %966 : vector<8x128xf32>
    %1057 = arith.addf %111, %1056 : vector<8x128xf32>
    %1058 = arith.mulf %1051, %1057 : vector<8x128xf32>
    %1059 = arith.mulf %1053, %1055 : vector<8x128xf32>
    %1060 = arith.subf %1058, %1059 : vector<8x128xf32>
    %1061 = arith.addf %964, %1060 : vector<8x128xf32>
    %1062 = arith.addf %586, %1061 : vector<8x128xf32>
    %cst_226 = arith.constant 5.000000e-01 : f32
    %1063 = vector.broadcast %cst_226 : f32 to vector<8x128xf32>
    %1064 = arith.mulf %1063, %1062 : vector<8x128xf32>
    %1065 = arith.addf %26, %29 : vector<8x128xf32>
    %1066 = arith.subf %1065, %1064 : vector<8x128xf32>
    %cst_227 = arith.constant 9.99999968E-21 : f32
    %1067 = vector.broadcast %cst_227 : f32 to vector<8x128xf32>
    %1068 = arith.maximumf %1066, %1067 : vector<8x128xf32>
    %1069 = tpu.reciprocal %1068 {approx = true} : vector<8x128xf32> -> vector<8x128xf32>
    %1070 = arith.mulf %1068, %1069 : vector<8x128xf32>
    %cst_228 = arith.constant 2.000000e+00 : f32
    %1071 = vector.broadcast %cst_228 : f32 to vector<8x128xf32>
    %1072 = arith.subf %1071, %1070 : vector<8x128xf32>
    %1073 = arith.mulf %1069, %1072 : vector<8x128xf32>
    %1074 = arith.mulf %1064, %1073 : vector<8x128xf32>
    %cst_229 = arith.constant 9.99999997E-7 : f32
    %cst_230 = arith.constant 1.000000e+00 : f32
    %1075 = vector.broadcast %cst_229 : f32 to vector<8x128xf32>
    %1076 = arith.maximumf %1075, %1074 : vector<8x128xf32>
    %1077 = vector.broadcast %cst_230 : f32 to vector<8x128xf32>
    %1078 = arith.minimumf %1077, %1076 : vector<8x128xf32>
    %1079 = math.log %1078 : vector<8x128xf32>
    %cst_231 = arith.constant 0.000000e+00 : f32
    %1080 = vector.broadcast %cst_231 : f32 to vector<8x128xf32>
    %1081 = arith.subf %1080, %1079 : vector<8x128xf32>
    %c0_232 = arith.constant 0 : index
    %c0_233 = arith.constant 0 : index
    %c0_234 = arith.constant 0 : index
    %1082 = vector.load %arg4[%c0_232, %c0_233, %c0_234] : memref<1x8x128xf32, #tpu.memory_space<vmem>>, vector<1x8x128xf32>
    %1083 = vector.shape_cast %1082 : vector<1x8x128xf32> to vector<8x128xf32>
    %1084 = vector.shape_cast %1081 : vector<8x128xf32> to vector<1x8x128xf32>
    tpu.vector_store %arg4[%c0_232, %c0_233, %c0_234], %1084 {strides = array<i32>} : memref<1x8x128xf32, #tpu.memory_space<vmem>>, vector<1x8x128xf32>,
    return
  }
  func.func @transform_0(%arg0: i32) -> (i32, i32, i32, i32) {
    %c0_i32 = arith.constant 0 : i32
    %c0_i32_0 = arith.constant 0 : i32
    %c0_i32_1 = arith.constant 0 : i32
    %c0_i32_2 = arith.constant 0 : i32
    return %c0_i32, %arg0, %c0_i32_0, %c0_i32_1 : i32, i32, i32, i32
  }
  func.func @transform_1(%arg0: i32) -> (i32, i32, i32, i32) {
    %c0_i32 = arith.constant 0 : i32
    %c0_i32_0 = arith.constant 0 : i32
    %c0_i32_1 = arith.constant 0 : i32
    %c0_i32_2 = arith.constant 0 : i32
    return %c0_i32, %arg0, %c0_i32_0, %c0_i32_1 : i32, i32, i32, i32
  }
  func.func @transform_2(%arg0: i32) -> (i32, i32, i32, i32) {
    %c0_i32 = arith.constant 0 : i32
    %c0_i32_0 = arith.constant 0 : i32
    %c0_i32_1 = arith.constant 0 : i32
    %c0_i32_2 = arith.constant 0 : i32
    return %c0_i32, %arg0, %c0_i32_0, %c0_i32_1 : i32, i32, i32, i32
  }
  func.func @transform_3(%arg0: i32) -> (i32, i32, i32) {
    %c0_i32 = arith.constant 0 : i32
    %c0_i32_0 = arith.constant 0 : i32
    %c0_i32_1 = arith.constant 0 : i32
    return %arg0, %c0_i32, %c0_i32_0 : i32, i32, i32
  }
}

</mosaic_0001>

<bundles_post_ra>
// kernel: tpu_custom_call.1
= control target key start
LH: loop header
LB: loop body
LE: loop exit
PB: predicated region body
PF: predicated region fallthrough
CT: control target
= control target key end

     0   :  { %8 = vsyncpa [#allocation3], 0  ;;  %s2817_s0 = inlined_call_operand.hbm [shape: f32[5,1,8,128], index: 0, kind: input, shape index: {}]   ;;  %s2818_s1 = inlined_call_operand.hbm [shape: f32[5,1,8,128], index: 1, kind: input, shape index: {}]   ;;  %s2819_s2 = inlined_call_operand.hbm [shape: f32[2,1,8,128], index: 2, kind: input, shape index: {}]   ;;  %s2820_s3 = inlined_call_operand.hbm [shape: f32[1,8,128], index: 3, kind: output, shape index: {}]  }
   0x1   :  { %9 = vsyncpa [#allocation6], 0 }
   0x2   :  { %10 = vsyncpa [#allocation4], 0  ;;  %s1569_s12 = smov [#allocation5]   ;;  %s1570_s14 = smov [#allocation2]  }
   0x3   :  { %s28_s13 = sshll.u32 %s1569_s12, 4  ;;  %s16_s15 = sshll.u32 %s1570_s14, 4  ;;  %s29_s13 = int_to_ptr.vmem [resolvable:$true] %s28_s13  ;;  %s17_s15 = int_to_ptr.vmem [resolvable:$true] %s16_s15 }
   0x4   :  { %s1491_s16 = scalar_lea.vmem %s29_s13, 640  ;;  %p1496_p1 = scmp.lt.s32.totalorder %s29_s13, %s29_s13 }
   0x5   :  { %p1492_p0 = scmp.ne.s32.totalorder %s29_s13, %s1491_s16  ;;  %p1497_p2 = scmp.lt.s32.totalorder %s1491_s16, %s1491_s16 }
   0x7   :  { %p1498_p3 = por %p1497_p2, %p1496_p1 }
   0x9   :  { %p1499_p4 = pnand %p1498_p3, %p1492_p0 }
   0xb   :  { %1502 = shalt.err (!%p1499_p4)
}
   0xc   :  { %s1571_s17 = smov 128   ;;  %s1572_s18 = smov 8  }
   0xd   :  { %34 = dma.hbm_to_vmem [thread:$0]  %s2818_s1, 640, %s29_s13, [#allocation6], %s1571_s17, %s1571_s17, %s1572_s18  }
   0xe   :  { %s1511_s21 = scalar_lea.vmem %s17_s15, 640  ;;  %p1516_p6 = scmp.lt.s32.totalorder %s17_s15, %s17_s15 }
   0xf   :  { %p1512_p5 = scmp.ne.s32.totalorder %s17_s15, %s1511_s21  ;;  %p1517_p7 = scmp.lt.s32.totalorder %s1511_s21, %s1511_s21 }
  0x11   :  { %p1518_p8 = por %p1517_p7, %p1516_p6 }
  0x13   :  { %p1519_p9 = pnand %p1518_p8, %p1512_p5 }
  0x15   :  { %1522 = shalt.err (!%p1519_p9)
}
  0x16   :  { %22 = dma.hbm_to_vmem [thread:$0]  %s2817_s0, 640, %s17_s15, [#allocation3], %s1571_s17, %s1571_s17, %s1572_s18  }
  0x17   :  { %s1573_s24 = smov [#allocation7]  }
  0x18   :  { %s40_s25 = sshll.u32 %s1573_s24, 4  ;;  %s41_s25 = int_to_ptr.vmem [resolvable:$true] %s40_s25 }
  0x19   :  { %s1531_s26 = scalar_lea.vmem %s41_s25, 256  ;;  %p1536_p11 = scmp.lt.s32.totalorder %s41_s25, %s41_s25 }
  0x1a   :  { %p1532_p10 = scmp.ne.s32.totalorder %s41_s25, %s1531_s26  ;;  %p1537_p12 = scmp.lt.s32.totalorder %s1531_s26, %s1531_s26 }
  0x1c   :  { %p1538_p13 = por %p1537_p12, %p1536_p11 }
  0x1e   :  { %p1539_p0 = pnand %p1538_p13, %p1532_p10 }
  0x20   :  { %1542 = shalt.err (!%p1539_p0)
}
  0x21   :  { %46 = dma.hbm_to_vmem [thread:$0]  %s2819_s2, 256, %s41_s25, [#allocation6], %s1571_s17, %s1571_s17, %s1572_s18  }
  0x22   :  { %1563 = dma.done.wait [#allocation3], 640  }
  0x23   :  { %1564 = vsyncadd [#allocation3], 4294966656 }
  0x24   :  { %1565 = dma.done.wait [#allocation6], 896  }
  0x25   :  { %1566 = vsyncadd [#allocation6], 4294966400  ;;  %v64_v0 = vld [vmem:[#allocation2 + $0x20] sm:$0xff]  ;;  %v73_v2 = vld [vmem:[#allocation5 + $0x20] sm:$0xff]  ;;  %v1574_v37 = vmov 683565275  }
  0x26   :  { %v83_v1 = vmul.f32 1.5707964, %v64_v0  ;;  %v323_v4 = vmul.f32 1.5707964, %v73_v2  ;;  %v1575_v39 = vmov 2475754826  }
  0x27   :  { %v1576_v41 = vmov 2131351028   ;;  %v1577_v43 = vmov 2102212464   ;;  %v1578_v45 = vmov 920167782  }
  0x28   :  { %v84_v3 = vadd.f32 3.9269907, %v83_v1  ;;  %v324_v6 = vadd.f32 3.9269907, %v323_v4  ;;  %v1579_v52 = vmov 1326507024  }
  0x29   :  { %s1580_s0 = smov [#allocation8]  }
  0x2a   :  { %v85_v5 = vmul.f32 0.63661975, %v84_v3  ;;  %v325_v8 = vmul.f32 0.63661975, %v324_v6  ;;  %s1353_s2 = sshll.u32 %s1580_s0, 4  ;;  %s1354_s2 = int_to_ptr.vmem [resolvable:$true] %s1353_s2 }
  0x2b   :  { %s1543_s28 = scalar_lea.vmem %s1354_s2, 128  ;;  %p1548_p2 = scmp.lt.s32.totalorder %s1354_s2, %s1354_s2 }
  0x2c   :  { %v86_v7 = vfloor.f32 %v85_v5  ;;  %v326_v10 = vfloor.f32 %v325_v8  ;;  %p1544_p1 = scmp.ne.s32.totalorder %s1354_s2, %s1543_s28  ;;  %p1549_p3 = scmp.lt.s32.totalorder %s1543_s28, %s1543_s28 }
  0x2e   :  { %v87_v9 = vmul.f32 1.5707964, %v86_v7  ;;  %v327_v12 = vmul.f32 1.5707964, %v326_v10  ;;  %p1550_p4 = por %p1549_p3, %p1548_p2 }
  0x30   :  { %v88_v11 = vsub.f32 %v84_v3, %v87_v9  ;;  %v328_v14 = vsub.f32 %v324_v6, %v327_v12  ;;  %p1551_p5 = pnand %p1550_p4, %p1544_p1 }
  0x32   :  { %vm89_vm0 = vcmp.lt.f32.partialorder %v88_v11, 0.7853982  ;;  %v90_v13 = vadd.f32 1.5707964, %v88_v11  ;;  %vm329_vm1 = vcmp.lt.f32.partialorder %v328_v14, 0.7853982 }
  0x33   :  { %v330_v16 = vadd.f32 1.5707964, %v328_v14 }
  0x34   :  { %v1610_v15 = vsel %vm89_vm0, %v90_v13, %v88_v11 }
  0x35   :  { %v92_v17 = vand.u32 2147483647, %v1610_v15  ;;  %v95_v18 = vand.u32 2139095040, %v1610_v15  ;;  %v1614_v19 = vsel %vm329_vm1, %v330_v16, %v328_v14  ;;  %vm94_vm0 = vcmp.lt.s32.totalorder %v1610_v15, 0 }
  0x36   :  { %v332_v22 = vand.u32 2147483647, %v1614_v19  ;;  %v335_v23 = vand.u32 2139095040, %v1614_v19 }
  0x37   :  { %v96_v20 = vshrl.u32 %v95_v18, 23  ;;  %v99_v21 = vand.u32 8388607, %v92_v17  ;;  %vm93_vm1 = vcmp.le.f32.partialorder %v92_v17, 0.7853982 }
  0x38   :  { %v336_v25 = vshrl.u32 %v335_v23, 23  ;;  %v1622_v29 = vand.u32 8388607, %v332_v22 }
  0x39   :  { %v1363_v24 = vadd.s32 4294967169, %v96_v20  ;;  %v100_v27 = vor.u32 8388608, %v99_v21 }
  0x3a   :  { %v1371_v28 = vadd.s32 4294967169, %v336_v25  ;;  %v340_v35 = vor.u32 8388608, %v1622_v29 }
  0x3b   :  { %v102_v26 = vadd.s32 1, %v1363_v24  ;;  %v1624_v34 = vshll.u32 %v100_v27, 8 }
  0x3c   :  { %v342_v31 = vadd.s32 1, %v1371_v28 }
  0x3d   :  { %vm103_vm2 = vcmp.gt.s32.totalorder %v102_v26, 0 }
  0x3e   :  { %v104_v30 = vsel %vm103_vm2, %v102_v26, 0  ;;  %vm343_vm3 = vcmp.gt.s32.totalorder %v342_v31, 0  ;;  %vm334_vm2 = vcmp.lt.s32.totalorder %v1614_v19, 0 }
  0x3f   :  { %v105_v32 = vshrl.u32 %v104_v30, 5  ;;  %v106_v33 = vand.u32 31, %v104_v30  ;;  %v344_v57 = vsel %vm343_vm3, %v342_v31, 0  ;;  %vm333_vm3 = vcmp.le.f32.partialorder %v332_v22, 0.7853982 }
  0x40   :  { %v345_v60 = vshrl.u32 %v344_v57, 5  ;;  %v346_v61 = vand.u32 31, %v344_v57 }
  0x41   :  { %v107_v36 = vsub.s32 32, %v106_v33  ;;  %v109_v38 = vshll.u32 %v1574_v37, %v106_v33  ;;  %v112_v40 = vshll.u32 %v1575_v39, %v106_v33  ;;  %v115_v42 = vshll.u32 %v1576_v41, %v106_v33 }
  0x42   :  { %v118_v44 = vshll.u32 %v1577_v43, %v106_v33  ;;  %v121_v46 = vshll.u32 %v1578_v45, %v106_v33  ;;  %vm124_vm4 = vcmp.lt.s32.totalorder %v105_v32, 1  ;;  %vm125_vm5 = vcmp.lt.s32.totalorder %v105_v32, 2 }
  0x43   :  { %v108_v47 = vshrl.u32 %v1574_v37, %v107_v36  ;;  %v110_v48 = vshrl.u32 %v1575_v39, %v107_v36  ;;  %v113_v49 = vshrl.u32 %v1576_v41, %v107_v36  ;;  %v116_v50 = vshrl.u32 %v1577_v43, %v107_v36 }
  0x44   :  { %v119_v51 = vshrl.u32 %v1578_v45, %v107_v36  ;;  %v122_v53 = vshrl.u32 %v1579_v52, %v107_v36  ;;  %vm126_vm6 = vcmp.lt.s32.totalorder %v105_v32, 3  ;;  %vm127_vm7 = vcmp.lt.s32.totalorder %v105_v32, 4 }
  0x45   :  { %v111_v54 = vor.u32 %v110_v48, %v109_v38  ;;  %v114_v55 = vor.u32 %v113_v49, %v112_v40  ;;  %v117_v56 = vor.u32 %v116_v50, %v115_v42  ;;  %v347_v5 = vsub.s32 32, %v346_v61 }
  0x46   :  { %v120_v58 = vor.u32 %v119_v51, %v118_v44  ;;  %v123_v59 = vor.u32 %v122_v53, %v121_v46  ;;  %v349_v9 = vshll.u32 %v1574_v37, %v346_v61  ;;  %v352_v23 = vshll.u32 %v1575_v39, %v346_v61 }
  0x47   :  { %v128_v62 = vsel %vm124_vm4, %v108_v47, %v111_v54  ;;  %v129_v63 = vsel %vm127_vm7, %v117_v56, 2102212464  ;;  %v132_v0 = vsel %vm124_vm4, %v111_v54, %v114_v55  ;;  %v136_v1 = vsel %vm124_vm4, %v114_v55, %v117_v56 }
  0x48   :  { %v130_v2 = vsel %vm126_vm6, %v114_v55, %v129_v63  ;;  %v133_v3 = vsel %vm127_vm7, %v120_v58, 920167782  ;;  %v137_v4 = vsel %vm127_vm7, %v123_v59, 1326507024  ;;  %v348_v13 = vshrl.u32 %v1574_v37, %v347_v5 }
  0x49   :  { %v131_v6 = vsel %vm125_vm5, %v128_v62, %v130_v2  ;;  %v134_v7 = vsel %vm126_vm6, %v117_v56, %v133_v3  ;;  %v138_v8 = vsel %vm126_vm6, %v120_v58, %v137_v4  ;;  %v350_v21 = vshrl.u32 %v1575_v39, %v347_v5 }
  0x4a   :  { %v135_v10 = vsel %vm125_vm5, %v132_v0, %v134_v7  ;;  %v139_v11 = vsel %vm125_vm5, %v136_v1, %v138_v8  ;;  %v147_v12 = vmul.u32 %v1624_v34, %v131_v6  ;;  %v353_v24 = vshrl.u32 %v1576_v41, %v347_v5 }
  0x4b   :  { %v1639_v14 = vmul.u32.u64.low %v1624_v34, %v139_v11  ;;  %v1640_v16 = vmul.u32.u64.high %v1624_v34, %v139_v11, %v1639_v14  ;;  %v1643_v18 = vmul.u32.u64.low %v1624_v34, %v135_v10  ;;  %v1644_v20 = vmul.u32.u64.high %v1624_v34, %v135_v10, %v1643_v18 }
  0x4c   :  { %v355_v25 = vshll.u32 %v1576_v41, %v346_v61  ;;  %v356_v26 = vshrl.u32 %v1577_v43, %v347_v5  ;;  %v358_v27 = vshll.u32 %v1577_v43, %v346_v61  ;;  %v359_v28 = vshrl.u32 %v1578_v45, %v347_v5 }
  0x4d   :  { %v361_v30 = vshll.u32 %v1578_v45, %v346_v61  ;;  %v351_v31 = vor.u32 %v350_v21, %v349_v9  ;;  %v354_v32 = vor.u32 %v353_v24, %v352_v23  ;;  %v362_v33 = vshrl.u32 %v1579_v52, %v347_v5 }
  0x4e   :  { %vm364_vm8 = vcmp.lt.s32.totalorder %v345_v60, 1  ;;  %vm149_vm9 = vc.u32 %v1640_v16, %v1643_v18  ;;  %v150_v36 = vadd.s32 1, %v1644_v20  ;;  %v357_v37 = vor.u32 %v356_v26, %v355_v25 }
  0x4f   :  { %v380_v34 = vshll.u32 %v340_v35, 8  ;;  %v360_v38 = vor.u32 %v359_v28, %v358_v27  ;;  %v363_v39 = vor.u32 %v362_v33, %v361_v30  ;;  %vm365_vm10 = vcmp.lt.s32.totalorder %v345_v60, 2 }
  0x50   :  { %vm366_vm11 = vcmp.lt.s32.totalorder %v345_v60, 3  ;;  %v151_v40 = vsel %vm149_vm9, %v150_v36, %v1644_v20  ;;  %vm367_vm12 = vcmp.lt.s32.totalorder %v345_v60, 4  ;;  %v368_v41 = vsel %vm364_vm8, %v348_v13, %v351_v31 }
  0x51   :  { %v372_v42 = vsel %vm364_vm8, %v351_v31, %v354_v32  ;;  %v152_v43 = vadd.s32 %v151_v40, %v147_v12  ;;  %v369_v44 = vsel %vm367_vm12, %v357_v37, 2102212464  ;;  %v373_v45 = vsel %vm367_vm12, %v360_v38, 920167782 }
  0x52   :  { %v376_v46 = vsel %vm364_vm8, %v354_v32, %v357_v37  ;;  %v370_v47 = vsel %vm366_vm11, %v354_v32, %v369_v44  ;;  %v374_v48 = vsel %vm366_vm11, %v357_v37, %v373_v45  ;;  %v377_v29 = vsel %vm367_vm12, %v363_v39, 1326507024 }
  0x53   :  { %v153_v35 = vadd.s32 536870912, %v152_v43  ;;  %v375_v49 = vsel %vm365_vm10, %v372_v42, %v374_v48  ;;  %v378_v50 = vsel %vm366_vm11, %v360_v38, %v377_v29  ;;  %v371_v51 = vsel %vm365_vm10, %v368_v41, %v370_v47 }
  0x54   :  { %v379_v52 = vsel %vm365_vm10, %v376_v46, %v378_v50  ;;  %v1657_v53 = vmul.u32.u64.low %v380_v34, %v375_v49  ;;  %v1658_v54 = vmul.u32.u64.high %v380_v34, %v375_v49, %v1657_v53  ;;  %v387_v59 = vmul.u32 %v380_v34, %v371_v51 }
  0x55   :  { %v154_v55 = vshrl.u32 %v153_v35, 30  ;;  %v1660_v56 = vmul.u32.u64.low %v380_v34, %v379_v52  ;;  %v1661_v57 = vmul.u32.u64.high %v380_v34, %v379_v52, %v1660_v56  ;;  %v148_v7 = vadd.s32 %v1643_v18, %v1640_v16 }
  0x56   :  { %v390_v61 = vadd.s32 1, %v1658_v54  ;;  %vm184_vm10 = vweird.f32 %v1610_v15  ;;  %vm424_vm11 = vweird.f32 %v1614_v19 }
  0x57   :  { %v155_v58 = vshll.u32 %v154_v55, 30  ;;  %vm389_vm13 = vc.u32 %v1661_v57, %v1657_v53  ;;  %v388_v31 = vadd.s32 %v1657_v53, %v1661_v57  ;;  %v178_v32 = vsub.s32 4, %v154_v55 }
  0x58   :  { %v391_v63 = vsel %vm389_vm13, %v390_v61, %v1658_v54 }
  0x59   :  { %v156_v62 = vsub.s32 %v152_v43, %v155_v58  ;;  %v392_v1 = vadd.s32 %v391_v63, %v387_v59  ;;  %v179_v41 = vsel %vm94_vm0, %v178_v32, %v154_v55 }
  0x5a   :  { %v181_v47 = vsel %vm93_vm1, 0, %v179_v41  ;;  %v69_v41 = vld [vmem:[#allocation5 + $0x10] sm:$0xff] }
  0x5b   :  { %v158_v0 = vsub.s32 0, %v156_v62  ;;  %v393_v2 = vadd.s32 536870912, %v392_v1  ;;  %v288_v29 = vadd.s32 3, %v181_v47  ;;  %v185_v50 = vand.u32 3, %v181_v47 }
  0x5d   :  { %v1364_v60 = vmin.u32 %v158_v0, %v156_v62  ;;  %v394_v4 = vshrl.u32 %v393_v2, 30  ;;  %v289_v51 = vand.u32 3, %v288_v29  ;;  %vm190_vm4 = vcmp.eq.s32.totalorder %v185_v50, 2  ;;  %v58_v2 = vld [vmem:[#allocation2 + $0x8] sm:$0xff] }
  0x5e   :  { %vm187_vm6 = vcmp.eq.s32.totalorder %v185_v50, 0  ;;  %vm186_vm8 = vcmp.lt.s32.totalorder %v185_v50, 2 }
  0x5f   :  { %v160_v3 = vclz %v1364_v60  ;;  %v395_v6 = vshll.u32 %v394_v4, 30  ;;  %v418_v17 = vsub.s32 4, %v394_v4  ;;  %vm294_vm5 = vcmp.eq.s32.totalorder %v289_v51, 2 }
  0x60   :  { %vm291_vm7 = vcmp.eq.s32.totalorder %v289_v51, 0  ;;  %vm290_vm9 = vcmp.lt.s32.totalorder %v289_v51, 2 }
  0x61   :  { %v1365_v5 = vadd.s32 4294967294, %v160_v3  ;;  %v396_v9 = vsub.s32 %v392_v1, %v395_v6  ;;  %v419_v53 = vsel %vm334_vm2, %v418_v17, %v394_v4  ;;  %v60_v6 = vld [vmem:[#allocation2 + $0x10] sm:$0xff] }
  0x62   :  { %v421_v56 = vsel %vm333_vm3, 0, %v419_v53 }
  0x63   :  { %vm1366_vm14 = vcmp.lt.s32.totalorder %v1365_v5, 0  ;;  %v398_v13 = vsub.s32 0, %v396_v9 }
  0x64   :  { %v163_v8 = vsel %vm1366_vm14, 0, %v1365_v5  ;;  %v56_v5 = vld [vmem:[#allocation2] sm:$0xff] }
  0x65   :  { %v164_v10 = vsub.s32 32, %v163_v8  ;;  %v165_v11 = vshll.u32 %v156_v62, %v163_v8  ;;  %v168_v12 = vsub.s32 4294967266, %v163_v8  ;;  %v1372_v21 = vmin.u32 %v398_v13, %v396_v9 }
  0x66   :  { %v528_v62 = vadd.s32 3, %v421_v56 }
  0x67   :  { %v166_v14 = vshrl.u32 %v148_v7, %v164_v10  ;;  %v169_v20 = vadd.s32 127, %v168_v12  ;;  %v400_v25 = vclz %v1372_v21  ;;  %v425_v7 = vand.u32 3, %v421_v56  ;;  %v1682_v12 = vld [vmem:[#allocation7 + $0x8] sm:$0xff] }
  0x68   :  { %v529_v8 = vand.u32 3, %v528_v62 }
  0x69   :  { %v167_v23 = vor.u32 %v166_v14, %v165_v11  ;;  %v170_v24 = vshll.u32 %v169_v20, 23  ;;  %v1373_v28 = vadd.s32 4294967294, %v400_v25  ;;  %vm426_vm12 = vcmp.lt.s32.totalorder %v425_v7, 2 }
  0x6a   :  { %vm427_vm13 = vcmp.eq.s32.totalorder %v425_v7, 0  ;;  %vm430_vm14 = vcmp.eq.s32.totalorder %v425_v7, 2 }
  0x6b   :  { %v171_v26 = vor.u32 4788187, %v170_v24  ;;  %v174_v27 = vcvt.s32.f32 %v167_v23  ;;  %vm1374_vm15 = vcmp.lt.s32.totalorder %v1373_v28, 0 }
  0x6c   :  { %v403_v18 = vsel %vm1374_vm15, 0, %v1373_v28  ;;  %vm530_vm15 = vcmp.lt.s32.totalorder %v529_v8, 2 }
  0x6d   :  { %v172_v30 = vand.u32 2147483647, %v171_v26  ;;  %v404_v33 = vsub.s32 32, %v403_v18  ;;  %v405_v36 = vshll.u32 %v396_v9, %v403_v18  ;;  %v408_v37 = vsub.s32 4294967266, %v403_v18  ;;  %v62_v9 = vld [vmem:[#allocation2 + $0x18] sm:$0xff] }
  0x6f   :  { %v175_v16 = vmul.f32 %v174_v27, %v172_v30  ;;  %v406_v38 = vshrl.u32 %v388_v31, %v404_v33  ;;  %v409_v39 = vadd.s32 127, %v408_v37  ;;  %v67_v37 = vld [vmem:[#allocation5 + $0x8] sm:$0xff] }
  0x71   :  { %v176_v34 = vxor.u32 2147483648, %v175_v16  ;;  %v407_v43 = vor.u32 %v406_v38, %v405_v36  ;;  %v410_v44 = vshll.u32 %v409_v39, 23  ;;  %v65_v36 = vld [vmem:[#allocation5] sm:$0xff] }
  0x73   :  { %v177_v40 = vsel %vm94_vm0, %v176_v34, %v175_v16  ;;  %v411_v45 = vor.u32 4788187, %v410_v44  ;;  %v414_v46 = vcvt.s32.f32 %v407_v43  ;;  %vm531_vm0 = vcmp.eq.s32.totalorder %v529_v8, 0 }
  0x74   :  { %v180_v42 = vsel %vm93_vm1, %v1610_v15, %v177_v40  ;;  %v1680_v15 = vld [vmem:[#allocation7] sm:$0xff]  ;;  %vm534_vm1 = vcmp.eq.s32.totalorder %v529_v8, 2 }
  0x75   :  { %1399 = vcosq.f32 %v180_v42  ;;  %v412_v48 = vand.u32 2147483647, %v411_v45 }
  0x76   :  { %1401 = vsinq.f32 %v180_v42  ;;  %v71_v42 = vld [vmem:[#allocation5 + $0x18] sm:$0xff] }
  0x77   :  { %v415_v35 = vmul.f32 %v414_v46, %v412_v48 }
  0x79   :  { %v416_v49 = vxor.u32 2147483648, %v415_v35 }
  0x7b   :  { %v417_v52 = vsel %vm334_vm2, %v416_v49, %v415_v35 }
  0x7c   :  { %v420_v54 = vsel %vm333_vm3, %v1614_v19, %v417_v52 }
  0x7d   :  { %1403 = vcosq.f32 %v420_v54 }
  0x7e   :  { %1405 = vsinq.f32 %v420_v54 }
  0x82   :  { %v1400_v55 = vpop.eup %1399 }
  0x83   :  { %v1402_v57 = vpop.eup %1401  ;;  %v191_v58 = vxor.u32 2147483648, %v1400_v55 }
  0x84   :  { %v188_v59 = vxor.u32 2147483648, %v1402_v57 }
  0x85   :  { %v192_v22 = vsel %vm190_vm4, %v191_v58, %v1402_v57  ;;  %v296_v61 = vsel %vm294_vm5, %v191_v58, %v1402_v57 }
  0x86   :  { %v189_v63 = vsel %vm187_vm6, %v1400_v55, %v188_v59  ;;  %v293_v0 = vsel %vm291_vm7, %v1400_v55, %v188_v59 }
  0x87   :  { %v193_v1 = vsel %vm186_vm8, %v189_v63, %v192_v22  ;;  %v297_v60 = vsel %vm290_vm9, %v293_v0, %v296_v61 }
  0x88   :  { %v194_v3 = vsel %vm184_vm10, nan, %v193_v1  ;;  %v298_v4 = vsel %vm184_vm10, nan, %v297_v60 }
  0x89   :  { %v1677_v10 = vmul.f32 %v194_v3, %v58_v2  ;;  %v302_v11 = vmul.f32 %v298_v4, %v58_v2  ;;  %v1684_v13 = vmul.f32 %v194_v3, %v56_v5  ;;  %v1686_v14 = vmul.f32 %v298_v4, %v56_v5 }
  0x8a   :  { %v303_v20 = vmul.f32 %v194_v3, %v60_v6  ;;  %v304_v21 = vmul.f32 %v298_v4, %v60_v6  ;;  %v1404_v23 = vpop.eup %1403  ;;  %v305_v25 = vmul.f32 %v194_v3, %v62_v9  ;;  %v306_v26 = vmul.f32 %v298_v4, %v62_v9 }
  0x8b   :  { %v1406_v24 = vpop.eup %1405  ;;  %v311_v27 = vadd.f32 %v302_v11, %v1680_v15  ;;  %v313_v28 = vsub.f32 %v1682_v12, %v1677_v10  ;;  %v431_v31 = vxor.u32 2147483648, %v1404_v23  ;;  %v315_v32 = vadd.f32 %v1684_v13, %v1680_v15 }
  0x8c   :  { %v428_v30 = vxor.u32 2147483648, %v1406_v24  ;;  %v307_v16 = vsub.f32 %v1680_v15, %v303_v20  ;;  %v309_v18 = vsub.f32 %v1682_v12, %v304_v21  ;;  %v317_v33 = vadd.f32 %v1686_v14, %v1682_v12 }
  0x8d   :  { %v432_v38 = vsel %vm430_vm14, %v431_v31, %v1406_v24  ;;  %v536_v40 = vsel %vm534_vm1, %v431_v31, %v1406_v24  ;;  %v319_v43 = vsub.f32 %v1680_v15, %v306_v26  ;;  %v321_v44 = vadd.f32 %v305_v25, %v1682_v12 }
  0x8e   :  { %v429_v34 = vsel %vm427_vm13, %v1404_v23, %v428_v30  ;;  %v533_v39 = vsel %vm531_vm0, %v1404_v23, %v428_v30  ;;  %v1703_v47 = vsub.f32 %v311_v27, %v303_v20  ;;  %v1705_v48 = vsub.f32 %v313_v28, %v304_v21 }
  0x8f   :  { %v433_v45 = vsel %vm426_vm12, %v429_v34, %v432_v38  ;;  %v537_v46 = vsel %vm530_vm15, %v533_v39, %v536_v40  ;;  %v1727_v2 = vadd.f32 %v315_v32, %v302_v11  ;;  %v1730_v3 = vsub.f32 %v317_v33, %v1677_v10 }
  0x90   :  { %v434_v29 = vsel %vm424_vm11, nan, %v433_v45  ;;  %v538_v35 = vsel %vm424_vm11, nan, %v537_v46  ;;  %v1736_v6 = vsub.f32 %v307_v16, %v306_v26  ;;  %v1738_v7 = vadd.f32 %v309_v18, %v305_v25 }
  0x91   :  { %v539_v17 = vmul.f32 %v434_v29, %v65_v36  ;;  %v540_v49 = vmul.f32 %v538_v35, %v65_v36  ;;  %v541_v50 = vmul.f32 %v434_v29, %v67_v37  ;;  %v542_v51 = vmul.f32 %v538_v35, %v67_v37  ;;  %2901 = vst [vmem:[#allocation16_spill] sm:$0xff] %v1727_v2 }
  0x92   :  { %v543_v52 = vmul.f32 %v434_v29, %v69_v41  ;;  %v544_v53 = vmul.f32 %v538_v35, %v69_v41  ;;  %v545_v54 = vmul.f32 %v434_v29, %v71_v42  ;;  %v546_v55 = vmul.f32 %v538_v35, %v71_v42  ;;  %2902 = vst [vmem:[#allocation17_spill] sm:$0xff] %v1730_v3 }
  0x93   :  { %v551_v56 = vadd.f32 %v542_v51, %v1680_v15  ;;  %v553_v57 = vsub.f32 %v1682_v12, %v541_v50  ;;  %v555_v58 = vadd.f32 %v539_v17, %v1680_v15  ;;  %v557_v59 = vadd.f32 %v540_v49, %v1682_v12 }
  0x94   :  { %v547_v22 = vsub.f32 %v1680_v15, %v543_v52  ;;  %v549_v19 = vsub.f32 %v1682_v12, %v544_v53  ;;  %v559_v61 = vsub.f32 %v1680_v15, %v546_v55  ;;  %v561_v62 = vadd.f32 %v545_v54, %v1682_v12 }
  0x95   :  { %v1719_v63 = vsub.f32 %v551_v56, %v543_v52  ;;  %v1721_v0 = vsub.f32 %v553_v57, %v544_v53  ;;  %v1723_v1 = vadd.f32 %v555_v58, %v542_v51  ;;  %v1725_v60 = vsub.f32 %v557_v59, %v541_v50 }
  0x96   :  { %v1732_v4 = vsub.f32 %v547_v22, %v546_v55  ;;  %v1734_v5 = vadd.f32 %v549_v19, %v545_v54  ;;  %v1740_v8 = vadd.f32 %v559_v61, %v539_v17  ;;  %v1742_v9 = vadd.f32 %v561_v62, %v540_v49 }
  0x97   :  { %2897 = vst [vmem:[#allocation12_spill] sm:$0xff] %v1719_v63  ;;  %2898 = vst [vmem:[#allocation13_spill] sm:$0xff] %v1721_v0  ;;  %v1745_v15 = vadd.f32 %v319_v43, %v1684_v13  ;;  %v1748_v11 = vadd.f32 %v321_v44, %v1686_v14  ;;  %v1760_v20 = vsub.f32 %v1725_v60, %v1721_v0 }
  0x98   :  { %2899 = vst [vmem:[#allocation14_spill] sm:$0xff] %v1723_v1  ;;  %2900 = vst [vmem:[#allocation15_spill] sm:$0xff] %v1725_v60  ;;  %v1752_v10 = vsub.f32 %v1721_v0, %v1734_v5  ;;  %v1756_v12 = vsub.f32 %v1732_v4, %v1719_v63  ;;  %v1764_v21 = vsub.f32 %v1719_v63, %v1723_v1 }
  0x99   :  { %2903 = vst [vmem:[#allocation18_spill] sm:$0xff] %v1732_v4  ;;  %2904 = vst [vmem:[#allocation19_spill] sm:$0xff] %v1734_v5  ;;  %v1768_v13 = vsub.f32 %v1742_v9, %v1725_v60  ;;  %v1772_v14 = vsub.f32 %v1723_v1, %v1740_v8  ;;  %v565_v23 = vmul.f32 %v1719_v63, %v1734_v5 }
  0x9a   :  { %2905 = vst [vmem:[#allocation20_spill] sm:$0xff] %v1740_v8  ;;  %2906 = vst [vmem:[#allocation21_spill] sm:$0xff] %v1742_v9  ;;  %v566_v24 = vmul.f32 %v1721_v0, %v1732_v4  ;;  %v570_v25 = vmul.f32 %v1723_v1, %v1721_v0  ;;  %v571_v26 = vmul.f32 %v1725_v60, %v1719_v63 }
  0x9b   :  { %2907 = vst [vmem:[#allocation22_spill] sm:$0xff] %v1745_v15  ;;  %2908 = vst [vmem:[#allocation23_spill] sm:$0xff] %v1748_v11  ;;  %v575_v27 = vmul.f32 %v1740_v8, %v1725_v60  ;;  %v576_v28 = vmul.f32 %v1742_v9, %v1723_v1  ;;  %v1788_v30 = vsub.f32 %v1734_v5, %v1742_v9 }
  0x9c   :  { %2909 = vst [vmem:[#allocation24_spill] sm:$0xff] %v1752_v10  ;;  %2910 = vst [vmem:[#allocation25_spill] sm:$0xff] %v1760_v20  ;;  %v1792_v31 = vsub.f32 %v1740_v8, %v1732_v4  ;;  %v580_v16 = vmul.f32 %v1742_v9, %v1732_v4  ;;  %v581_v18 = vmul.f32 %v1740_v8, %v1734_v5 }
  0x9d   :  { %2911 = vst [vmem:[#allocation26_spill] sm:$0xff] %v1768_v13  ;;  %2912 = vst [vmem:[#allocation27_spill] sm:$0xff] %v1788_v30  ;;  %v583_v32 = vmul.f32 %v1752_v10, %v1736_v6  ;;  %v584_v33 = vmul.f32 %v1756_v12, %v1738_v7  ;;  %v587_v36 = vmul.f32 %v1760_v20, %v1736_v6 }
  0x9e   :  { %v588_v37 = vmul.f32 %v1764_v21, %v1738_v7  ;;  %v591_v34 = vmul.f32 %v1768_v13, %v1736_v6  ;;  %v592_v38 = vmul.f32 %v1772_v14, %v1738_v7  ;;  %v1810_v39 = vsub.f32 %v565_v23, %v566_v24 }
  0x9f   :  { %v1812_v40 = vsub.f32 %v570_v25, %v571_v26  ;;  %v599_v41 = vmul.f32 %v1752_v10, %v1703_v47  ;;  %v600_v42 = vmul.f32 %v1756_v12, %v1705_v48  ;;  %v595_v43 = vmul.f32 %v1788_v30, %v1736_v6 }
  0xa0   :  { %v596_v44 = vmul.f32 %v1792_v31, %v1738_v7  ;;  %v603_v45 = vmul.f32 %v1760_v20, %v1703_v47  ;;  %v604_v46 = vmul.f32 %v1764_v21, %v1705_v48  ;;  %v1826_v29 = vsub.f32 %v575_v27, %v576_v28 }
  0xa1   :  { %v1828_v35 = vsub.f32 %v580_v16, %v581_v18  ;;  %v585_v17 = vadd.f32 %v584_v33, %v583_v32  ;;  %v607_v49 = vmul.f32 %v1768_v13, %v1703_v47  ;;  %v589_v50 = vadd.f32 %v588_v37, %v587_v36 }
  0xa2   :  { %v593_v51 = vadd.f32 %v592_v38, %v591_v34  ;;  %v608_v52 = vmul.f32 %v1772_v14, %v1705_v48  ;;  %v611_v53 = vmul.f32 %v1788_v30, %v1703_v47  ;;  %v601_v54 = vadd.f32 %v600_v42, %v599_v41 }
  0xa3   :  { %v605_v55 = vadd.f32 %v604_v46, %v603_v45  ;;  %v612_v56 = vmul.f32 %v1792_v31, %v1705_v48  ;;  %v615_v57 = vmul.f32 %v1752_v10, %v1727_v2  ;;  %v597_v58 = vadd.f32 %v596_v44, %v595_v43 }
  0xa4   :  { %v609_v59 = vadd.f32 %v608_v52, %v607_v49  ;;  %v616_v22 = vmul.f32 %v1756_v12, %v1730_v3  ;;  %v619_v19 = vmul.f32 %v1760_v20, %v1727_v2  ;;  %v620_v62 = vmul.f32 %v1764_v21, %v1730_v3 }
  0xa5   :  { %v613_v61 = vadd.f32 %v612_v56, %v611_v53  ;;  %v623_v23 = vmul.f32 %v1768_v13, %v1727_v2  ;;  %v624_v24 = vmul.f32 %v1772_v14, %v1730_v3  ;;  %v1851_v25 = vadd.f32 %v585_v17, %v1810_v39 }
  0xa6   :  { %v1854_v26 = vadd.f32 %v589_v50, %v1812_v40  ;;  %v627_v27 = vmul.f32 %v1788_v30, %v1727_v2  ;;  %v628_v28 = vmul.f32 %v1792_v31, %v1730_v3  ;;  %v1861_v16 = vadd.f32 %v593_v51, %v1826_v29 }
  0xa7   :  { %v1864_v18 = vadd.f32 %v601_v54, %v1810_v39  ;;  %v1867_v32 = vadd.f32 %v605_v55, %v1812_v40  ;;  %v617_v33 = vadd.f32 %v616_v22, %v615_v57  ;;  %v1870_v36 = vadd.f32 %v597_v58, %v1828_v35 }
  0xa8   :  { %v1873_v37 = vadd.f32 %v609_v59, %v1826_v29  ;;  %v1876_v34 = vadd.f32 %v613_v61, %v1828_v35  ;;  %v621_v38 = vadd.f32 %v620_v62, %v619_v19  ;;  %v625_v41 = vadd.f32 %v624_v24, %v623_v23 }
  0xa9   :  { %v629_v42 = vadd.f32 %v628_v28, %v627_v27  ;;  %v631_v43 = vmul.f32 %v1752_v10, %v1745_v15  ;;  %v1881_v44 = vadd.f32 %v617_v33, %v1810_v39  ;;  %v632_v45 = vmul.f32 %v1756_v12, %v1748_v11 }
  0xaa   :  { %v1887_v46 = vsub.f32 %v1864_v18, %v1851_v25  ;;  %v1891_v17 = vsub.f32 %v1867_v32, %v1854_v26  ;;  %v1894_v49 = vadd.f32 %v621_v38, %v1812_v40  ;;  %v635_v50 = vmul.f32 %v1760_v20, %v1745_v15 }
  0xab   :  { %v1900_v51 = vsub.f32 %v1873_v37, %v1861_v16  ;;  %v1904_v12 = vsub.f32 %v1876_v34, %v1870_v36  ;;  %v1907_v52 = vadd.f32 %v625_v41, %v1826_v29  ;;  %v636_v53 = vmul.f32 %v1764_v21, %v1748_v11 }
  0xac   :  { %vm650_vm2 = vcmp.gt.f32.partialorder %v1887_v46, 0.0  ;;  %v651_v54 = vmax.f32 %v1887_v46, 1e-20  ;;  %v1914_v55 = vadd.f32 %v629_v42, %v1828_v35  ;;  %v652_v56 = vmin.f32 %v1887_v46, -1e-20 }
  0xad   :  { %vm665_vm3 = vcmp.gt.f32.partialorder %v1891_v17, 0.0  ;;  %v666_v57 = vmax.f32 %v1891_v17, 1e-20  ;;  %v633_v58 = vadd.f32 %v632_v45, %v631_v43  ;;  %v667_v59 = vmin.f32 %v1891_v17, -1e-20 }
  0xae   :  { %vm680_vm4 = vcmp.gt.f32.partialorder %v1900_v51, 0.0  ;;  %v681_v21 = vmax.f32 %v1900_v51, 1e-20  ;;  %v653_v22 = vsel %vm650_vm2, %v651_v54, %v652_v56  ;;  %v682_v19 = vmin.f32 %v1900_v51, -1e-20 }
  0xaf   :  { %vm695_vm5 = vcmp.gt.f32.partialorder %v1904_v12, 0.0  ;;  %v696_v61 = vmax.f32 %v1904_v12, 1e-20  ;;  %1407 = vrcp.f32 %v653_v22  ;;  %v668_v62 = vsel %vm665_vm3, %v666_v57, %v667_v59 }
  0xb0   :  { %v697_v23 = vmin.f32 %v1904_v12, -1e-20  ;;  %v1932_v24 = vsub.f32 %v1881_v44, %v1864_v18  ;;  %1409 = vrcp.f32 %v668_v62  ;;  %v683_v27 = vsel %vm680_vm4, %v681_v21, %v682_v19 }
  0xb1   :  { %v1938_v28 = vsub.f32 %v1894_v49, %v1867_v32  ;;  %v1942_v33 = vsub.f32 %v1907_v52, %v1873_v37  ;;  %1411 = vrcp.f32 %v683_v27  ;;  %v1952_v45 = vadd.f32 %v633_v58, %v1810_v39 }
  0xb2   :  { %v698_v38 = vsel %vm695_vm5, %v696_v61, %v697_v23  ;;  %vm726_vm6 = vcmp.gt.f32.partialorder %v1932_v24, 0.0  ;;  %v727_v41 = vmax.f32 %v1932_v24, 1e-20  ;;  %v728_v42 = vmin.f32 %v1932_v24, -1e-20 }
  0xb3   :  { %1413 = vrcp.f32 %v698_v38  ;;  %vm741_vm7 = vcmp.gt.f32.partialorder %v1938_v28, 0.0  ;;  %v742_v43 = vmax.f32 %v1938_v28, 1e-20  ;;  %v743_v54 = vmin.f32 %v1938_v28, -1e-20 }
  0xb4   :  { %v757_v56 = vmax.f32 %v1942_v33, 1e-20  ;;  %v729_v57 = vsel %vm726_vm6, %v727_v41, %v728_v42  ;;  %vm756_vm8 = vcmp.gt.f32.partialorder %v1942_v33, 0.0  ;;  %v758_v59 = vmin.f32 %v1942_v33, -1e-20 }
  0xb5   :  { %v637_v21 = vadd.f32 %v636_v53, %v635_v50  ;;  %1415 = vrcp.f32 %v729_v57  ;;  %v744_v19 = vsel %vm741_vm7, %v742_v43, %v743_v54  ;;  %v1964_v39 = vsub.f32 %v1914_v55, %v1876_v34 }
  0xb6   :  { %1417 = vrcp.f32 %v744_v19  ;;  %v1968_v58 = vsel %vm756_vm8, %v757_v56, %v758_v59  ;;  %v1972_v61 = vsub.f32 %v1952_v45, %v1881_v44  ;;  %v639_v41 = vmul.f32 %v1768_v13, %v1745_v15 }
  0xb7   :  { %v1975_v23 = vadd.f32 %v637_v21, %v1812_v40  ;;  %1419 = vrcp.f32 %v1968_v58  ;;  %v772_v50 = vmax.f32 %v1964_v39, 1e-20  ;;  %v773_v53 = vmin.f32 %v1964_v39, -1e-20 }
  0xb8   :  { %vm771_vm9 = vcmp.gt.f32.partialorder %v1964_v39, 0.0  ;;  %v803_v42 = vmax.f32 %v1972_v61, 1e-20  ;;  %v804_v43 = vmin.f32 %v1972_v61, -1e-20  ;;  %v640_v40 = vmul.f32 %v1772_v14, %v1748_v11 }
  0xb9   :  { %v643_v56 = vmul.f32 %v1788_v30, %v1745_v15  ;;  %v644_v59 = vmul.f32 %v1792_v31, %v1748_v11  ;;  %vm802_vm10 = vcmp.gt.f32.partialorder %v1972_v61, 0.0  ;;  %v1994_v20 = vsub.f32 %v1975_v23, %v1894_v49 }
  0xba   :  { %v1998_v8 = vsel %vm771_vm9, %v772_v50, %v773_v53  ;;  %v2002_v31 = vsel %vm802_vm10, %v803_v42, %v804_v43  ;;  %v641_v1 = vadd.f32 %v640_v40, %v639_v41 }
  0xbb   :  { %v645_v0 = vadd.f32 %v644_v59, %v643_v56  ;;  %1421 = vrcp.f32 %v1998_v8  ;;  %vm817_vm11 = vcmp.gt.f32.partialorder %v1994_v20, 0.0 }
  0xbc   :  { %v1408_v54 = vpop.eup %1407  ;;  %1423 = vrcp.f32 %v2002_v31 }
  0xbd   :  { %v1410_v21 = vpop.eup %1409  ;;  %v655_v13 = vmul.f32 %v1408_v54, %v653_v22 }
  0xbe   :  { %v1412_v10 = vpop.eup %1411  ;;  %v670_v9 = vmul.f32 %v1410_v21, %v668_v62  ;;  %v818_v62 = vmax.f32 %v1994_v20, 1e-20 }
  0xbf   :  { %v656_v60 = vsub.f32 2.0, %v655_v13  ;;  %v685_v30 = vmul.f32 %v1412_v10, %v683_v27  ;;  %v819_v13 = vmin.f32 %v1994_v20, -1e-20 }
  0xc0   :  { %v1414_v14 = vpop.eup %1413  ;;  %v671_v22 = vsub.f32 2.0, %v670_v9  ;;  %v2010_v9 = vadd.f32 %v641_v1, %v1826_v29 }
  0xc1   :  { %v657_v63 = vmul.f32 %v1408_v54, %v656_v60  ;;  %v686_v5 = vsub.f32 2.0, %v685_v30  ;;  %v700_v50 = vmul.f32 %v1414_v14, %v698_v38  ;;  %v2014_v38 = vadd.f32 %v645_v0, %v1828_v35 }
  0xc2   :  { %v1416_v4 = vpop.eup %1415  ;;  %v672_v11 = vmul.f32 %v1410_v21, %v671_v22  ;;  %2913 = vst [vmem:[#allocation28_spill] sm:$0xff] %v2010_v9 }
  0xc3   :  { %v1418_v27 = vpop.eup %1417  ;;  %v658_v53 = vsub.f32 0.0, %v657_v63  ;;  %v731_v42 = vmul.f32 %v1416_v4, %v729_v57  ;;  %v687_v30 = vmul.f32 %v1412_v10, %v686_v5  ;;  %v701_v56 = vsub.f32 2.0, %v700_v50 }
  0xc4   :  { %v673_v60 = vsub.f32 0.0, %v672_v11  ;;  %v746_v41 = vmul.f32 %v1418_v27, %v744_v19  ;;  %v820_v63 = vsel %vm817_vm11, %v818_v62, %v819_v13  ;;  %v1420_v57 = vpop.eup %1419  ;;  %v2021_v5 = vsub.f32 %v2010_v9, %v1907_v52 }
  0xc5   :  { %v659_v43 = vmul.f32 %v658_v53, %v1851_v25  ;;  %v732_v54 = vsub.f32 2.0, %v731_v42  ;;  %v688_v11 = vsub.f32 0.0, %v687_v30  ;;  %1425 = vrcp.f32 %v820_v63 }
  0xc6   :  { %v674_v40 = vmul.f32 %v673_v60, %v1854_v26  ;;  %v747_v29 = vsub.f32 2.0, %v746_v41  ;;  %v761_v22 = vmul.f32 %v1420_v57, %v1968_v58  ;;  %v702_v62 = vmul.f32 %v1414_v14, %v701_v56 }
  0xc7   :  { %v660_v59 = vmin.f32 %v659_v43, 1.0  ;;  %v662_v21 = vmax.f32 %v659_v43, 0.0  ;;  %v733_v1 = vmul.f32 %v1416_v4, %v732_v54  ;;  %v2030_v4 = vsub.f32 %v2014_v38, %v1914_v55 }
  0xc8   :  { %v748_v50 = vmul.f32 %v1418_v27, %v747_v29  ;;  %v689_v13 = vmul.f32 %v688_v11, %v1861_v16  ;;  %v833_v42 = vmax.f32 %v2021_v5, 1e-20  ;;  %v834_v60 = vmin.f32 %v2021_v5, -1e-20  ;;  %v1422_v58 = vpop.eup %1421 }
  0xc9   :  { %v663_v0 = vsel %vm650_vm2, 0.0, %v662_v21  ;;  %v734_v10 = vsub.f32 0.0, %v733_v1  ;;  %v661_v35 = vsel %vm650_vm2, %v660_v59, 1.0  ;;  %2914 = vst [vmem:[#allocation29_spill] sm:$0xff] %v2030_v4  ;;  %vm832_vm12 = vcmp.gt.f32.partialorder %v2021_v5, 0.0  ;;  %v1424_v27 = vpop.eup %1423 }
  0xca   :  { %v677_v19 = vmax.f32 %v663_v0, %v674_v40  ;;  %v675_v30 = vmin.f32 %v661_v35, %v674_v40  ;;  %v762_v14 = vsub.f32 2.0, %v761_v22  ;;  %v703_v41 = vsub.f32 0.0, %v702_v62 }
  0xcb   :  { %v735_v53 = vmul.f32 %v734_v10, %v1864_v18  ;;  %v749_v43 = vsub.f32 0.0, %v748_v50  ;;  %v848_v54 = vmax.f32 %v2030_v4, 1e-20  ;;  %v849_v56 = vmin.f32 %v2030_v4, -1e-20 }
  0xcc   :  { %v678_v46 = vsel %vm665_vm3, %v663_v0, %v677_v19  ;;  %v835_v21 = vsel %vm832_vm12, %v833_v42, %v834_v60  ;;  %vm847_vm13 = vcmp.gt.f32.partialorder %v2030_v4, 0.0  ;;  %v676_v40 = vsel %vm665_vm3, %v675_v30, %v661_v35 }
  0xcd   :  { %v692_v18 = vmax.f32 %v678_v46, %v689_v13  ;;  %v738_v59 = vmax.f32 %v735_v53, 0.0  ;;  %v776_v1 = vmul.f32 %v1422_v58, %v1998_v8  ;;  %v2049_v29 = vsub.f32 %v1851_v25, %v1952_v45 }
  0xce   :  { %v763_v11 = vmul.f32 %v1420_v57, %v762_v14  ;;  %v807_v0 = vmul.f32 %v1424_v27, %v2002_v31  ;;  %v704_v10 = vmul.f32 %v703_v41, %v1870_v36  ;;  %v750_v19 = vmul.f32 %v749_v43, %v1867_v32 }
  0xcf   :  { %1427 = vrcp.f32 %v835_v21  ;;  %v850_v22 = vsel %vm847_vm13, %v848_v54, %v849_v56  ;;  %v690_v62 = vmin.f32 %v676_v40, %v689_v13  ;;  %v693_v17 = vsel %vm680_vm4, %v678_v46, %v692_v18 }
  0xd0   :  { %v736_v8 = vmin.f32 %v735_v53, 1.0  ;;  %v739_v25 = vsel %vm726_vm6, 0.0, %v738_v59  ;;  %v777_v35 = vsub.f32 2.0, %v776_v1  ;;  %v879_v57 = vmax.f32 %v2049_v29, 1e-20 }
  0xd1   :  { %v880_v31 = vmin.f32 %v2049_v29, -1e-20  ;;  %v2064_v32 = vsub.f32 %v1854_v26, %v1975_v23  ;;  %v764_v42 = vsub.f32 0.0, %v763_v11  ;;  %v808_v60 = vsub.f32 2.0, %v807_v0 }
  0xd2   :  { %v1426_v50 = vpop.eup %1425  ;;  %vm878_vm14 = vcmp.gt.f32.partialorder %v2049_v29, 0.0  ;;  %v707_v13 = vmax.f32 %v693_v17, %v704_v10  ;;  %v753_v30 = vmax.f32 %v739_v25, %v750_v19  ;;  %1429 = vrcp.f32 %v850_v22 }
  0xd3   :  { %2915 = vst [vmem:[#allocation30_spill] sm:$0xff] %v2064_v32  ;;  %v691_v53 = vsel %vm680_vm4, %v690_v62, %v676_v40  ;;  %v737_v46 = vsel %vm726_vm6, %v736_v8, 1.0  ;;  %v778_v14 = vmul.f32 %v1422_v58, %v777_v35  ;;  %v822_v41 = vmul.f32 %v1426_v50, %v820_v63 }
  0xd4   :  { %v2073_v26 = vsel %vm878_vm14, %v879_v57, %v880_v31  ;;  %vm893_vm15 = vcmp.gt.f32.partialorder %v2064_v32, 0.0  ;;  %v765_v43 = vmul.f32 %v764_v42, %v1873_v37  ;;  %v809_v54 = vmul.f32 %v1424_v27, %v808_v60 }
  0xd5   :  { %v894_v56 = vmax.f32 %v2064_v32, 1e-20  ;;  %v895_v18 = vmin.f32 %v2064_v32, -1e-20  ;;  %v705_v51 = vmin.f32 %v691_v53, %v704_v10  ;;  %v708_v24 = vsel %vm695_vm5, %v693_v17, %v707_v13 }
  0xd6   :  { %v751_v59 = vmin.f32 %v737_v46, %v750_v19  ;;  %v754_v63 = vsel %vm741_vm7, %v739_v25, %v753_v30  ;;  %v779_v58 = vsub.f32 0.0, %v778_v14  ;;  %v823_v40 = vsub.f32 2.0, %v822_v41 }
  0xd7   :  { %1431 = vrcp.f32 %v2073_v26  ;;  %v709_v1 = vmin.f32 %v708_v24, 1.0  ;;  %v768_v11 = vmax.f32 %v754_v63, %v765_v43  ;;  %v2086_v37 = vsel %vm893_vm15, %v894_v56, %v895_v18 }
  0xd8   :  { %v706_v27 = vsel %vm695_vm5, %v705_v51, %v691_v53  ;;  %v752_v0 = vsel %vm741_vm7, %v751_v59, %v737_v46  ;;  %v810_v10 = vsub.f32 0.0, %v809_v54  ;;  %v647_v62 = vsub.f32 %v1703_v47, %v1736_v6 }
  0xd9   :  { %v780_v17 = vmul.f32 %v779_v58, %v1876_v34  ;;  %v824_v8 = vmul.f32 %v1426_v50, %v823_v40  ;;  %1433 = vrcp.f32 %v2086_v37  ;;  %v710_v25 = vmax.f32 %v706_v27, %v709_v1 }
  0xda   :  { %v766_v35 = vmin.f32 %v752_v0, %v765_v43  ;;  %v769_v57 = vsel %vm756_vm8, %v754_v63, %v768_v11  ;;  %v811_v12 = vmul.f32 %v810_v10, %v1881_v44  ;;  %v2101_v42 = vsub.f32 %v1705_v48, %v1738_v7  ;;  %v2918_v10 = vld [vmem:[#allocation23_spill] sm:$0xff] }
  0xdb   :  { %v711_v60 = vmul.f32 %v709_v1, %v647_v62  ;;  %v783_v13 = vmax.f32 %v769_v57, %v780_v17  ;;  %v825_v30 = vsub.f32 0.0, %v824_v8  ;;  %v715_v50 = vmul.f32 %v710_v25, %v647_v62 }
  0xdc   :  { %v1428_v19 = vpop.eup %1427  ;;  %v713_v34 = vmul.f32 %v709_v1, %v2101_v42  ;;  %v717_v53 = vmul.f32 %v710_v25, %v2101_v42  ;;  %v767_v46 = vsel %vm756_vm8, %v766_v35, %v752_v0  ;;  %v812_v14 = vmin.f32 %v811_v12, 1.0 }
  0xdd   :  { %v837_v31 = vmul.f32 %v1428_v19, %v835_v21  ;;  %v814_v41 = vmax.f32 %v811_v12, 0.0  ;;  %v723_v43 = vsub.f32 %v1727_v2, %v1703_v47  ;;  %v2111_v54 = vsub.f32 %v1861_v16, %v2010_v9 }
  0xde   :  { %v712_v56 = vadd.f32 %v711_v60, %v1736_v6  ;;  %v2116_v18 = vsub.f32 %v1730_v3, %v1705_v48  ;;  %v781_v51 = vmin.f32 %v767_v46, %v780_v17  ;;  %v784_v33 = vsel %vm771_vm9, %v769_v57, %v783_v13 }
  0xdf   :  { %v1430_v28 = vpop.eup %1429  ;;  %v838_v44 = vsub.f32 2.0, %v837_v31  ;;  %2916 = vst [vmem:[#allocation31_spill] sm:$0xff] %v2111_v54  ;;  %v716_v59 = vadd.f32 %v715_v50, %v1736_v6  ;;  %v718_v63 = vadd.f32 %v717_v53, %v1738_v7  ;;  %v826_v16 = vmul.f32 %v825_v30, %v1894_v49 }
  0xe0   :  { %v852_v21 = vmul.f32 %v1430_v28, %v850_v22  ;;  %v714_v22 = vadd.f32 %v713_v34, %v1738_v7  ;;  %v813_v58 = vsel %vm802_vm10, %v812_v14, 1.0  ;;  %v815_v40 = vsel %vm802_vm10, 0.0, %v814_v41 }
  0xe1   :  { %v839_v1 = vmul.f32 %v1428_v19, %v838_v44  ;;  %v785_v27 = vmin.f32 %v784_v33, 1.0  ;;  %v2132_v0 = vsub.f32 %v1745_v15, %v1727_v2  ;;  %v2136_v62 = vsub.f32 %v2918_v10, %v1730_v3 }
  0xe2   :  { %v853_v11 = vsub.f32 2.0, %v852_v21  ;;  %vm908_vm0 = vcmp.gt.f32.partialorder %v2111_v54, 0.0  ;;  %v782_v49 = vsel %vm771_vm9, %v781_v51, %v767_v46  ;;  %v909_v19 = vmax.f32 %v2111_v54, 1e-20 }
  0xe3   :  { %2917 = vst [vmem:[#allocation32_spill] sm:$0xff] %v2132_v0  ;;  %2919 = vst [vmem:[#allocation33_spill] sm:$0xff] %v2136_v62  ;;  %v910_v17 = vmin.f32 %v2111_v54, -1e-20  ;;  %v2149_v25 = vmul.f32 %v718_v63, %v712_v56  ;;  %v2151_v35 = vmul.f32 %v716_v59, %v714_v22  ;;  %v827_v57 = vmin.f32 %v813_v58, %v826_v16 }
  0xe4   :  { %v2120_v24 = vpop.eup %1431  ;;  %v829_v12 = vmax.f32 %v815_v40, %v826_v16  ;;  %v787_v31 = vmul.f32 %v785_v27, %v723_v43  ;;  %v840_v60 = vsub.f32 0.0, %v839_v1  ;;  %v2153_v39 = vmul.f32 %v1430_v28, %v853_v11 }
  0xe5   :  { %v2143_v61 = vmul.f32 %v2120_v24, %v2073_v26  ;;  %2920 = vst [vmem:[#allocation34_spill] sm:$0xff] %v2149_v25  ;;  %2921 = vst [vmem:[#allocation35_spill] sm:$0xff] %v2151_v35  ;;  %v2157_v26 = vsub.f32 %v1736_v6, %v1745_v15  ;;  %v786_v13 = vmax.f32 %v782_v49, %v785_v27 }
  0xe6   :  { %v2147_v8 = vpop.eup %1433  ;;  %v789_v30 = vmul.f32 %v785_v27, %v2116_v18  ;;  %v2162_v34 = vsub.f32 %v1738_v7, %v2918_v10  ;;  %v2166_v50 = vsub.f32 %v1736_v6, %v1703_v47  ;;  %v2175_v46 = vsel %vm908_vm0, %v909_v19, %v910_v17  ;;  %v2927_v27 = vld [vmem:[#allocation19_spill] sm:$0xff] }
  0xe7   :  { %2922 = vst [vmem:[#allocation36_spill] sm:$0xff] %v2157_v26  ;;  %v2171_v28 = vmul.f32 %v2147_v8, %v2086_v37  ;;  %v952_v14 = vmul.f32 %v1703_v47, %v1738_v7  ;;  %v2183_v44 = vsel %vm817_vm11, %v827_v57, %v813_v58  ;;  %v2187_v21 = vsel %vm817_vm11, %v815_v40, %v829_v12 }
  0xe8   :  { %2923 = vst [vmem:[#allocation37_spill] sm:$0xff] %v2162_v34  ;;  %v2191_v37 = vsub.f32 %v1703_v47, %v1727_v2  ;;  %v2194_v56 = vadd.f32 %v787_v31, %v1703_v47  ;;  %v2197_v51 = vmul.f32 %v840_v60, %v1907_v52  ;;  %v2202_v22 = vsub.f32 %v1727_v2, %v1745_v15  ;;  %v2928_v31 = vld [vmem:[#allocation12_spill] sm:$0xff] }
  0xe9   :  { %v2205_v20 = vadd.f32 %v789_v30, %v1705_v48  ;;  %v2207_v59 = vmul.f32 %v786_v13, %v723_v43  ;;  %v953_v63 = vmul.f32 %v1705_v48, %v1736_v6  ;;  %v956_v16 = vmul.f32 %v1727_v2, %v1705_v48  ;;  %v2926_v43 = vld [vmem:[#allocation18_spill] sm:$0xff]  ;;  %v2929_v30 = vld [vmem:[#allocation13_spill] sm:$0xff] }
  0xea   :  { %2924 = vst [vmem:[#allocation38_spill] sm:$0xff] %v2194_v56  ;;  %v957_v52 = vmul.f32 %v1730_v3, %v1703_v47  ;;  %v960_v58 = vmul.f32 %v1745_v15, %v1730_v3  ;;  %v961_v40 = vmul.f32 %v2918_v10, %v1727_v2  ;;  %v2221_v1 = vsub.f32 %v1745_v15, %v1736_v6 }
  0xeb   :  { %2925 = vst [vmem:[#allocation39_spill] sm:$0xff] %v2205_v20  ;;  %v967_v11 = vmul.f32 %v2101_v42, %v2926_v43  ;;  %v968_v49 = vmul.f32 %v2166_v50, %v2927_v27  ;;  %v971_v19 = vmul.f32 %v2116_v18, %v2926_v43  ;;  %v972_v17 = vmul.f32 %v2191_v37, %v2927_v27 }
  0xec   :  { %v975_v57 = vmul.f32 %v2136_v62, %v2926_v43  ;;  %v976_v12 = vmul.f32 %v2202_v22, %v2927_v27  ;;  %v983_v60 = vmul.f32 %v2101_v42, %v2928_v31  ;;  %v984_v41 = vmul.f32 %v2166_v50, %v2929_v30 }
  0xed   :  { %v987_v33 = vmul.f32 %v2116_v18, %v2928_v31  ;;  %v988_v53 = vmul.f32 %v2191_v37, %v2929_v30  ;;  %v991_v35 = vmul.f32 %v2136_v62, %v2928_v31  ;;  %v992_v25 = vmul.f32 %v2202_v22, %v2929_v30 }
  0xee   :  { %v2248_v26 = vmul.f32 %v786_v13, %v2116_v18  ;;  %v2250_v3 = vsub.f32 %v952_v14, %v953_v63  ;;  %v2252_v2 = vsub.f32 %v956_v16, %v957_v52  ;;  %v964_v20 = vmul.f32 %v2918_v10, %v1736_v6 }
  0xef   :  { %v2256_v0 = vsub.f32 %v960_v58, %v961_v40  ;;  %v965_v56 = vmul.f32 %v1745_v15, %v1738_v7  ;;  %v969_v54 = vadd.f32 %v968_v49, %v967_v11  ;;  %v973_v9 = vadd.f32 %v972_v17, %v971_v19  ;;  %v2930_v58 = vld [vmem:[#allocation14_spill] sm:$0xff]  ;;  %v2931_v40 = vld [vmem:[#allocation15_spill] sm:$0xff] }
  0xf0   :  { %v977_v32 = vadd.f32 %v976_v12, %v975_v57  ;;  %v979_v4 = vmul.f32 %v2162_v34, %v2926_v43  ;;  %v980_v13 = vmul.f32 %v2221_v1, %v2927_v27  ;;  %v985_v14 = vadd.f32 %v984_v41, %v983_v60 }
  0xf1   :  { %v989_v63 = vadd.f32 %v988_v53, %v987_v33  ;;  %v993_v16 = vadd.f32 %v992_v25, %v991_v35  ;;  %v995_v6 = vmul.f32 %v2162_v34, %v2928_v31  ;;  %v996_v52 = vmul.f32 %v2221_v1, %v2929_v30 }
  0xf2   :  { %v999_v7 = vmul.f32 %v2101_v42, %v2930_v58  ;;  %v1000_v11 = vmul.f32 %v2166_v50, %v2931_v40  ;;  %v1003_v49 = vmul.f32 %v2116_v18, %v2930_v58  ;;  %v1004_v41 = vmul.f32 %v2191_v37, %v2931_v40 }
  0xf3   :  { %v2280_v35 = vsub.f32 %v1870_v36, %v2014_v38  ;;  %v1007_v53 = vmul.f32 %v2136_v62, %v2930_v58  ;;  %v1008_v33 = vmul.f32 %v2202_v22, %v2931_v40  ;;  %v2286_v19 = vsub.f32 %v964_v20, %v965_v56 }
  0xf4   :  { %v2289_v17 = vadd.f32 %v969_v54, %v2250_v3  ;;  %v2292_v57 = vadd.f32 %v973_v9, %v2252_v2  ;;  %v981_v12 = vadd.f32 %v980_v13, %v979_v4  ;;  %v2295_v60 = vadd.f32 %v977_v32, %v2256_v0  ;;  %v2933_v32 = vld [vmem:[#allocation20_spill] sm:$0xff] }
  0xf5   :  { %2932 = vst [vmem:[#allocation40_spill] sm:$0xff] %v2280_v35  ;;  %v2298_v36 = vadd.f32 %v985_v14, %v2250_v3  ;;  %v2301_v25 = vadd.f32 %v989_v63, %v2252_v2  ;;  %v997_v10 = vadd.f32 %v996_v52, %v995_v6  ;;  %v2304_v56 = vadd.f32 %v993_v16, %v2256_v0  ;;  %v2934_v14 = vld [vmem:[#allocation21_spill] sm:$0xff] }
  0xf6   :  { %v1001_v20 = vadd.f32 %v1000_v11, %v999_v7  ;;  %v1005_v54 = vadd.f32 %v1004_v41, %v1003_v49  ;;  %v1011_v9 = vmul.f32 %v2162_v34, %v2930_v58  ;;  %v1009_v15 = vadd.f32 %v1008_v33, %v1007_v53 }
  0xf7   :  { %v1012_v4 = vmul.f32 %v2221_v1, %v2931_v40  ;;  %v1015_v13 = vmul.f32 %v2101_v42, %v2933_v32  ;;  %v1016_v63 = vmul.f32 %v2166_v50, %v2934_v14  ;;  %v2935_v6 = vsub.f32 2.0, %v2143_v61 }
  0xf8   :  { %1435 = vrcp.f32 %v2175_v46  ;;  %v2322_v7 = vadd.f32 %v981_v12, %v2286_v19  ;;  %v2325_v11 = vadd.f32 %v997_v10, %v2286_v19  ;;  %v1019_v42 = vmul.f32 %v2116_v18, %v2933_v32 }
  0xf9   :  { %v2317_v16 = vmul.f32 %v2120_v24, %v2935_v6  ;;  %v1020_v50 = vmul.f32 %v2191_v37, %v2934_v14  ;;  %v2333_v24 = vsub.f32 %v2298_v36, %v2289_v17  ;;  %v2337_v49 = vadd.f32 %v1001_v20, %v2250_v3 }
  0xfa   :  { %2936 = vst [vmem:[#allocation41_spill] sm:$0xff] %v2325_v11  ;;  %v2340_v41 = vadd.f32 %v1005_v54, %v2252_v2  ;;  %v2344_v10 = vsub.f32 %v2301_v25, %v2292_v57  ;;  %v2347_v18 = vadd.f32 %v1009_v15, %v2256_v0  ;;  %v1013_v37 = vadd.f32 %v1012_v4, %v1011_v9 }
  0xfb   :  { %v1017_v53 = vadd.f32 %v1016_v63, %v1015_v13  ;;  %v2351_v33 = vsub.f32 %v2304_v56, %v2295_v60  ;;  %v1023_v12 = vmul.f32 %v2136_v62, %v2933_v32  ;;  %vm1033_vm1 = vcmp.gt.f32.partialorder %v2333_v24, 0.0 }
  0xfc   :  { %2937 = vst [vmem:[#allocation42_spill] sm:$0xff] %v2347_v18  ;;  %v1034_v20 = vmax.f32 %v2333_v24, 1e-20  ;;  %v1035_v54 = vmin.f32 %v2333_v24, -1e-20  ;;  %v1021_v6 = vadd.f32 %v1020_v50, %v1019_v42  ;;  %v1024_v15 = vmul.f32 %v2202_v22, %v2934_v14 }
  0xfd   :  { %vm1048_vm2 = vcmp.gt.f32.partialorder %v2344_v10, 0.0  ;;  %v2363_v9 = vsub.f32 %v2325_v11, %v2322_v7  ;;  %vm2888_vm3 = vcmp.gt.f32.partialorder %v2280_v35, 0.0  ;;  %v1027_v4 = vmul.f32 %v2162_v34, %v2933_v32 }
  0xfe   :  { %v1036_v13 = vsel %vm1033_vm1, %v1034_v20, %v1035_v54  ;;  %v1049_v63 = vmax.f32 %v2344_v10, 1e-20  ;;  %v1050_v42 = vmin.f32 %v2344_v10, -1e-20  ;;  %v1028_v22 = vmul.f32 %v2221_v1, %v2934_v14 }
  0xff   :  { %2938 = vst [vmem:[#allocation43_spill] sm:$0xff] %v2363_v9  ;;  %1437 = vrcp.f32 %v1036_v13  ;;  %vm1063_vm4 = vcmp.gt.f32.partialorder %v2351_v33, 0.0  ;;  %v1064_v50 = vmax.f32 %v2351_v33, 1e-20  ;;  %v925_v52 = vmin.f32 %v2280_v35, -1e-20 }
 0x100   :  { %v2378_v61 = vadd.f32 %v1013_v37, %v2286_v19  ;;  %v1051_v20 = vsel %vm1048_vm2, %v1049_v63, %v1050_v42  ;;  %v1065_v54 = vmin.f32 %v2351_v33, -1e-20  ;;  %v2384_v40 = vadd.f32 %v1017_v53, %v2250_v3 }
 0x101   :  { %1439 = vrcp.f32 %v1051_v20  ;;  %v1079_v1 = vmax.f32 %v2363_v9, 1e-20  ;;  %v1080_v14 = vmin.f32 %v2363_v9, -1e-20  ;;  %vm1078_vm5 = vcmp.gt.f32.partialorder %v2363_v9, 0.0 }
 0x102   :  { %2939 = vst [vmem:[#allocation44_spill] sm:$0xff] %v2378_v61  ;;  %2940 = vst [vmem:[#allocation45_spill] sm:$0xff] %v2384_v40  ;;  %v2390_v34 = vsel %vm1063_vm4, %v1064_v50, %v1065_v54  ;;  %v2395_v37 = vsub.f32 %v2337_v49, %v2298_v36  ;;  %v2399_v63 = vsub.f32 %v2340_v41, %v2301_v25 }
 0x103   :  { %v2402_v3 = vadd.f32 %v1021_v6, %v2252_v2  ;;  %v1025_v53 = vadd.f32 %v1024_v15, %v1023_v12  ;;  %v1029_v42 = vadd.f32 %v1028_v22, %v1027_v4  ;;  %v2406_v30 = vsub.f32 %v2347_v18, %v2304_v56 }
 0x104   :  { %1441 = vrcp.f32 %v2390_v34  ;;  %vm1108_vm6 = vcmp.gt.f32.partialorder %v2395_v37, 0.0  ;;  %v1109_v50 = vmax.f32 %v2395_v37, 1e-20  ;;  %v1110_v54 = vmin.f32 %v2395_v37, -1e-20 }
 0x105   :  { %2941 = vst [vmem:[#allocation46_spill] sm:$0xff] %v2406_v30  ;;  %v2412_v27 = vpop.eup %1435  ;;  %v2416_v2 = vsel %vm1078_vm5, %v1079_v1, %v1080_v14  ;;  %vm1123_vm7 = vcmp.gt.f32.partialorder %v2399_v63, 0.0  ;;  %v1124_v12 = vmax.f32 %v2399_v63, 1e-20  ;;  %v1125_v6 = vmin.f32 %v2399_v63, -1e-20 }
 0x106   :  { %v2423_v15 = vsel %vm1108_vm6, %v1109_v50, %v1110_v54  ;;  %vm1138_vm8 = vcmp.gt.f32.partialorder %v2406_v30, 0.0  ;;  %v1139_v4 = vmax.f32 %v2406_v30, 1e-20  ;;  %v1140_v22 = vmin.f32 %v2406_v30, -1e-20 }
 0x107   :  { %v2429_v32 = vadd.f32 %v1025_v53, %v2256_v0  ;;  %1443 = vrcp.f32 %v2423_v15  ;;  %v2434_v14 = vsel %vm1123_vm7, %v1124_v12, %v1125_v6  ;;  %v2438_v1 = vsub.f32 %v2378_v61, %v2325_v11 }
 0x108   :  { %1445 = vrcp.f32 %v2434_v14  ;;  %v2443_v50 = vsel %vm1138_vm8, %v1139_v4, %v1140_v22  ;;  %v2447_v0 = vsub.f32 %v2384_v40, %v2337_v49  ;;  %v2451_v53 = vsub.f32 %v2402_v3, %v2340_v41 }
 0x109   :  { %2942 = vst [vmem:[#allocation47_spill] sm:$0xff] %v2438_v1  ;;  %v886_v54 = vsub.f32 0.0, %v2317_v16  ;;  %v2944_v12 = vmax.f32 %v2280_v35, 1e-20  ;;  %v2461_v58 = vadd.f32 %v1029_v42, %v2286_v19  ;;  %1447 = vrcp.f32 %v2416_v2 }
 0x10a   :  { %2943 = vst [vmem:[#allocation48_spill] sm:$0xff] %v2451_v53  ;;  %vm1183_vm9 = vcmp.gt.f32.partialorder %v2447_v0, 0.0  ;;  %v1184_v4 = vmax.f32 %v2447_v0, 1e-20  ;;  %v1185_v22 = vmin.f32 %v2447_v0, -1e-20  ;;  %1449 = vrcp.f32 %v2443_v50 }
 0x10b   :  { %v2458_v6 = vsel %vm2888_vm3, %v2944_v12, %v925_v52  ;;  %vm1198_vm10 = vcmp.gt.f32.partialorder %v2451_v53, 0.0  ;;  %v1199_v16 = vmax.f32 %v2451_v53, 1e-20  ;;  %v1200_v52 = vmin.f32 %v2451_v53, -1e-20 }
 0x10c   :  { %v2473_v19 = vsub.f32 %v2429_v32, %v2347_v18  ;;  %v1438_v42 = vpop.eup %1437  ;;  %vm2891_vm11 = vcmp.gt.f32.partialorder %v2438_v1, 0.0  ;;  %v1154_v12 = vmax.f32 %v2438_v1, 1e-20  ;;  %v1155_v31 = vmin.f32 %v2438_v1, -1e-20 }
 0x10d   :  { %v2480_v43 = vsel %vm1183_vm9, %v1184_v4, %v1185_v22  ;;  %v1038_v35 = vmul.f32 %v1438_v42, %v1036_v13  ;;  %v2485_v62 = vsel %vm1198_vm10, %v1199_v16, %v1200_v52  ;;  %v2489_v9 = vsub.f32 %v2461_v58, %v2378_v61 }
 0x10e   :  { %1451 = vrcp.f32 %v2480_v43  ;;  %v1440_v30 = vpop.eup %1439  ;;  %v844_v11 = vmax.f32 %v2187_v21, %v2197_v51  ;;  %v887_v18 = vmul.f32 %v886_v54, %v1952_v45  ;;  %v2946_v4 = vsub.f32 2.0, %v2171_v28 }
 0x10f   :  { %2945 = vst [vmem:[#allocation49_spill] sm:$0xff] %v2489_v9  ;;  %1453 = vrcp.f32 %v2485_v62  ;;  %v1039_v22 = vsub.f32 2.0, %v1038_v35  ;;  %v1053_v53 = vmul.f32 %v1440_v30, %v1051_v20  ;;  %v1214_v16 = vmax.f32 %v2473_v19, 1e-20 }
 0x110   :  { %v900_v13 = vmul.f32 %v2147_v8, %v2946_v4  ;;  %v1215_v52 = vmin.f32 %v2473_v19, -1e-20  ;;  %v913_v61 = vmul.f32 %v2412_v27, %v2175_v46  ;;  %1455 = vrcp.f32 %v2458_v6 }
 0x111   :  { %v2505_v45 = vsel %vm2891_vm11, %v1154_v12, %v1155_v31  ;;  %vm1213_vm3 = vcmp.gt.f32.partialorder %v2473_v19, 0.0  ;;  %v1442_v8 = vpop.eup %1441  ;;  %v2947_v28 = vsub.f32 0.0, %v2153_v39  ;;  %v1040_v20 = vmul.f32 %v1438_v42, %v1039_v22 }
 0x112   :  { %v1229_v54 = vmax.f32 %v2489_v9, 1e-20  ;;  %v1230_v4 = vmin.f32 %v2489_v9, -1e-20  ;;  %v2517_v46 = vadd.f32 %v2207_v59, %v1703_v47  ;;  %v890_v1 = vmax.f32 %v887_v18, 0.0 }
 0x113   :  { %v2511_v35 = vmul.f32 %v2947_v28, %v1914_v55  ;;  %vm1228_vm11 = vcmp.gt.f32.partialorder %v2489_v9, 0.0  ;;  %v2522_v31 = vsub.f32 %v2289_v17, %v2384_v40  ;;  %v901_v12 = vsub.f32 0.0, %v900_v13 }
 0x114   :  { %2948 = vst [vmem:[#allocation50_spill] sm:$0xff] %v2517_v46  ;;  %v1054_v39 = vsub.f32 2.0, %v1053_v53  ;;  %1457 = vrcp.f32 %v2505_v45  ;;  %v2527_v55 = vsel %vm1213_vm3, %v1214_v16, %v1215_v52  ;;  %v1444_v42 = vpop.eup %1443  ;;  %v2950_v47 = vmin.f32 %v2183_v44, %v2197_v51 }
 0x115   :  { %2949 = vst [vmem:[#allocation51_spill] sm:$0xff] %v2522_v31  ;;  %v845_v13 = vsel %vm832_vm12, %v2187_v21, %v844_v11  ;;  %v914_v53 = vsub.f32 2.0, %v913_v61  ;;  %v1041_v22 = vsub.f32 0.0, %v1040_v20  ;;  %v1446_v28 = vpop.eup %1445  ;;  %v888_v40 = vmin.f32 %v887_v18, 1.0 }
 0x116   :  { %v2535_v59 = vsel %vm832_vm12, %v2950_v47, %v2183_v44  ;;  %v1068_v16 = vmul.f32 %v1442_v8, %v2390_v34  ;;  %v1113_v52 = vmul.f32 %v1444_v42, %v2423_v15  ;;  %v2544_v46 = vsel %vm1228_vm11, %v1229_v54, %v1230_v4  ;;  %v2546_v51 = vpop.eup %1447 }
 0x117   :  { %v1128_v44 = vmul.f32 %v1446_v28, %v2434_v14  ;;  %1459 = vrcp.f32 %v2527_v55  ;;  %v1259_v5 = vmax.f32 %v2522_v31, 1e-20  ;;  %v1260_v21 = vmin.f32 %v2522_v31, -1e-20  ;;  %v1450_v18 = vpop.eup %1449 }
 0x118   :  { %v891_v11 = vsel %vm878_vm14, 0.0, %v890_v1  ;;  %v902_v34 = vmul.f32 %v901_v12, %v1975_v23  ;;  %v1055_v61 = vmul.f32 %v1440_v30, %v1054_v39  ;;  %vm1258_vm12 = vcmp.gt.f32.partialorder %v2522_v31, 0.0 }
 0x119   :  { %v915_v15 = vmul.f32 %v2412_v27, %v914_v53  ;;  %v1042_v20 = vmul.f32 %v1041_v22, %v2289_v17  ;;  %v1114_v14 = vsub.f32 2.0, %v1113_v52  ;;  %1461 = vrcp.f32 %v2544_v46 }
 0x11a   :  { %v2561_v54 = vadd.f32 %v2248_v26, %v1705_v48  ;;  %v1069_v4 = vsub.f32 2.0, %v1068_v16  ;;  %v1129_v23 = vsub.f32 2.0, %v1128_v44  ;;  %v859_v12 = vmax.f32 %v845_v13, %v2511_v35 }
 0x11b   :  { %v1452_v30 = vpop.eup %1451  ;;  %v889_v27 = vsel %vm878_vm14, %v888_v40, 1.0  ;;  %v1115_v39 = vmul.f32 %v1444_v42, %v1114_v14  ;;  %v2570_v17 = vsel %vm1258_vm12, %v1259_v5, %v1260_v21  ;;  %v905_v53 = vmax.f32 %v891_v11, %v902_v34 }
 0x11c   :  { %v1454_v47 = vpop.eup %1453  ;;  %v1056_v48 = vsub.f32 0.0, %v1055_v61  ;;  %v1143_v26 = vmul.f32 %v1450_v18, %v2443_v50  ;;  %v1188_v22 = vmul.f32 %v1452_v30, %v2480_v43  ;;  %v916_v16 = vsub.f32 0.0, %v915_v15 }
 0x11d   :  { %v1045_v52 = vmax.f32 %v1042_v20, 0.0  ;;  %v1116_v44 = vsub.f32 0.0, %v1115_v39  ;;  %v1203_v1 = vmul.f32 %v1454_v47, %v2485_v62  ;;  %v1456_v9 = vpop.eup %1455  ;;  %v1070_v29 = vmul.f32 %v1442_v8, %v1069_v4 }
 0x11e   :  { %v1083_v40 = vmul.f32 %v2546_v51, %v2416_v2  ;;  %v1130_v42 = vmul.f32 %v1446_v28, %v1129_v23  ;;  %1463 = vrcp.f32 %v2570_v17  ;;  %v903_v5 = vmin.f32 %v889_v27, %v902_v34  ;;  %v2953_v2 = vld [vmem:[#allocation28_spill] sm:$0xff] }
 0x11f   :  { %v1043_v21 = vmin.f32 %v1042_v20, 1.0  ;;  %v1117_v61 = vmul.f32 %v1116_v44, %v2298_v36  ;;  %v1189_v50 = vsub.f32 2.0, %v1188_v22  ;;  %v860_v43 = vsel %vm847_vm13, %v845_v13, %v859_v12 }
 0x120   :  { %v1057_v15 = vmul.f32 %v1056_v48, %v2292_v57  ;;  %v1144_v39 = vsub.f32 2.0, %v1143_v26  ;;  %v1204_v62 = vsub.f32 2.0, %v1203_v1  ;;  %v2584_v4 = vsel %vm893_vm15, %v891_v11, %v905_v53 }
 0x121   :  { %v1458_v31 = vpop.eup %1457  ;;  %v2587_v28 = vmul.f32 %v916_v16, %v2953_v2  ;;  %v928_v34 = vmul.f32 %v1456_v9, %v2458_v6  ;;  %v1046_v36 = vsel %vm1033_vm1, 0.0, %v1045_v52  ;;  %v1071_v20 = vsub.f32 0.0, %v1070_v29 }
 0x122   :  { %v1084_v23 = vsub.f32 2.0, %v1083_v40  ;;  %v1131_v13 = vsub.f32 0.0, %v1130_v42  ;;  %v1190_v12 = vmul.f32 %v1452_v30, %v1189_v50  ;;  %v2592_v48 = vmin.f32 %v860_v43, 1.0 }
 0x123   :  { %v2596_v1 = vsel %vm893_vm15, %v903_v5, %v889_v27  ;;  %v1044_v11 = vsel %vm1033_vm1, %v1043_v21, 1.0  ;;  %v1120_v53 = vmax.f32 %v1117_v61, 0.0  ;;  %v1060_v22 = vmax.f32 %v1046_v36, %v1057_v15 }
 0x124   :  { %v1460_v26 = vpop.eup %1459  ;;  %v1145_v6 = vmul.f32 %v1450_v18, %v1144_v39  ;;  %v1158_v16 = vmul.f32 %v1458_v31, %v2505_v45  ;;  %v1205_v52 = vmul.f32 %v1454_v47, %v1204_v62  ;;  %v920_v44 = vmax.f32 %v2584_v4, %v2587_v28 }
 0x125   :  { %v929_v30 = vsub.f32 2.0, %v928_v34  ;;  %v1118_v29 = vmin.f32 %v1117_v61, 1.0  ;;  %v1191_v40 = vsub.f32 0.0, %v1190_v12  ;;  %v1072_v27 = vmul.f32 %v1071_v20, %v2295_v60 }
 0x126   :  { %v1462_v42 = vpop.eup %1461  ;;  %v1085_v5 = vmul.f32 %v2546_v51, %v1084_v23  ;;  %v1132_v24 = vmul.f32 %v1131_v13, %v2301_v25  ;;  %v2608_v21 = vsub.f32 %v2292_v57, %v2402_v3  ;;  %v1058_v18 = vmin.f32 %v1044_v11, %v1057_v15 }
 0x127   :  { %v1121_v45 = vsel %vm1108_vm6, 0.0, %v1120_v53  ;;  %v1192_v47 = vmul.f32 %v1191_v40, %v2337_v49  ;;  %v1218_v61 = vmul.f32 %v1460_v26, %v2527_v55  ;;  %v1061_v50 = vsel %vm1048_vm2, %v1046_v36, %v1060_v22 }
 0x128   :  { %v1146_v43 = vsub.f32 0.0, %v1145_v6  ;;  %v1159_v39 = vsub.f32 2.0, %v1158_v16  ;;  %v1206_v51 = vsub.f32 0.0, %v1205_v52  ;;  %v930_v62 = vmul.f32 %v1456_v9, %v929_v30 }
 0x129   :  { %v1119_v25 = vsel %vm1108_vm6, %v1118_v29, 1.0  ;;  %v1195_v57 = vmax.f32 %v1192_v47, 0.0  ;;  %v1233_v15 = vmul.f32 %v1462_v42, %v2544_v46  ;;  %v1135_v8 = vmax.f32 %v1121_v45, %v1132_v24 }
 0x12a   :  { %vm1273_vm14 = vcmp.gt.f32.partialorder %v2608_v21, 0.0  ;;  %v1274_v49 = vmax.f32 %v2608_v21, 1e-20  ;;  %v1275_v55 = vmin.f32 %v2608_v21, -1e-20  ;;  %v1059_v34 = vsel %vm1048_vm2, %v1058_v18, %v1044_v11  ;;  %v2987_v21 = vld [vmem:[#allocation36_spill] sm:$0xff] }
 0x12b   :  { %v1464_v2 = vpop.eup %1463  ;;  %v1075_v36 = vmax.f32 %v1061_v50, %v1072_v27  ;;  %v1086_v20 = vsub.f32 0.0, %v1085_v5  ;;  %v1219_v9 = vsub.f32 2.0, %v1218_v61  ;;  %v1133_v23 = vmin.f32 %v1119_v25, %v1132_v24  ;;  %v2971_v61 = vld [vmem:[#allocation16_spill] sm:$0xff] }
 0x12c   :  { %v1147_v37 = vmul.f32 %v1146_v43, %v2304_v56  ;;  %v1160_v13 = vmul.f32 %v1458_v31, %v1159_v39  ;;  %v1207_v46 = vmul.f32 %v1206_v51, %v2340_v41  ;;  %v1193_v12 = vmin.f32 %v1192_v47, 1.0  ;;  %v2955_v43 = vld [vmem:[#allocation42_spill] sm:$0xff] }
 0x12d   :  { %v1196_v53 = vsel %vm1183_vm9, 0.0, %v1195_v57  ;;  %v1220_v22 = vmul.f32 %v1460_v26, %v1219_v9  ;;  %v1234_v6 = vsub.f32 2.0, %v1233_v15  ;;  %v1136_v16 = vsel %vm1123_vm7, %v1121_v45, %v1135_v8  ;;  %v2957_v15 = vld [vmem:[#allocation41_spill] sm:$0xff] }
 0x12e   :  { %v1263_v10 = vmul.f32 %v1464_v2, %v2570_v17  ;;  %v2633_v11 = vsel %vm1273_vm14, %v1274_v49, %v1275_v55  ;;  %v2637_v56 = vsub.f32 %v2295_v60, %v2429_v32  ;;  %v931_v41 = vsub.f32 0.0, %v930_v62  ;;  %v2959_v55 = vld [vmem:[#allocation38_spill] sm:$0xff] }
 0x12f   :  { %v1073_v31 = vmin.f32 %v1059_v34, %v1072_v27  ;;  %v1087_v52 = vmul.f32 %v1086_v20, %v2322_v7  ;;  %v1221_v30 = vsub.f32 0.0, %v1220_v22  ;;  %v1076_v26 = vsel %vm1063_vm4, %v1061_v50, %v1075_v36  ;;  %v2963_v22 = vld [vmem:[#allocation44_spill] sm:$0xff] }
 0x130   :  { %v1161_v29 = vsub.f32 0.0, %v1160_v13  ;;  %v1210_v40 = vmax.f32 %v1196_v53, %v1207_v46  ;;  %1465 = vrcp.f32 %v2633_v11  ;;  %v1134_v17 = vsel %vm1123_vm7, %v1133_v23, %v1119_v25 }
 0x131   :  { %v1150_v5 = vmax.f32 %v1136_v16, %v1147_v37  ;;  %v1194_v60 = vsel %vm1183_vm9, %v1193_v12, 1.0  ;;  %v1235_v24 = vmul.f32 %v1462_v42, %v1234_v6  ;;  %v1264_v18 = vsub.f32 2.0, %v1263_v10 }
 0x132   :  { %vm1288_vm15 = vcmp.gt.f32.partialorder %v2637_v56, 0.0  ;;  %v1289_v27 = vmax.f32 %v2637_v56, 1e-20  ;;  %v1290_v45 = vmin.f32 %v2637_v56, -1e-20  ;;  %v918_v47 = vmin.f32 %v2596_v1, %v2587_v28 }
 0x133   :  { %v921_v63 = vsel %vm908_vm0, %v2584_v4, %v920_v44  ;;  %v932_v50 = vmul.f32 %v931_v41, %v2014_v38  ;;  %v1222_v0 = vmul.f32 %v1221_v30, %v2955_v43  ;;  %v1074_v42 = vsel %vm1063_vm4, %v1073_v31, %v1059_v34  ;;  %v2965_v30 = vld [vmem:[#allocation50_spill] sm:$0xff] }
 0x134   :  { %v1090_v39 = vmax.f32 %v1076_v26, %v1087_v52  ;;  %v1208_v51 = vmin.f32 %v1194_v60, %v1207_v46  ;;  %v1211_v25 = vsel %vm1198_vm10, %v1196_v53, %v1210_v40  ;;  %v1148_v57 = vmin.f32 %v1134_v17, %v1147_v37  ;;  %v2974_v4 = vld [vmem:[#allocation18_spill] sm:$0xff] }
 0x135   :  { %v1162_v8 = vmul.f32 %v1161_v29, %v2957_v15  ;;  %v2664_v28 = vsel %vm1288_vm15, %v1289_v27, %v1290_v45  ;;  %v2668_v38 = vsub.f32 %v2322_v7, %v2461_v58  ;;  %v1151_v33 = vsel %vm1138_vm8, %v1136_v16, %v1150_v5  ;;  %v2961_v7 = vld [vmem:[#allocation32_spill] sm:$0xff]  ;;  %v2969_v45 = vld [vmem:[#allocation47_spill] sm:$0xff] }
 0x136   :  { %v1236_v44 = vsub.f32 0.0, %v1235_v24  ;;  %v1265_v49 = vmul.f32 %v1464_v2, %v1264_v18  ;;  %1467 = vrcp.f32 %v2664_v28  ;;  %v2675_v34 = vmul.f32 %v2561_v54, %v2959_v55 }
 0x137   :  { %v2960_v36 = vmin.f32 %v2535_v59, %v2511_v35  ;;  %v863_v9 = vmul.f32 %v2592_v48, %v2961_v7  ;;  %v1225_v23 = vmax.f32 %v1211_v25, %v1222_v0  ;;  %v919_v2 = vsel %vm908_vm0, %v918_v47, %v2596_v1 }
 0x138   :  { %v1209_v37 = vsel %vm1198_vm10, %v1208_v51, %v1194_v60  ;;  %vm1303_vm1 = vcmp.gt.f32.partialorder %v2668_v38, 0.0  ;;  %v1304_v54 = vmax.f32 %v2668_v38, 1e-20  ;;  %v935_v13 = vmax.f32 %v921_v63, %v932_v50  ;;  %v2967_v60 = vld [vmem:[#allocation40_spill] sm:$0xff] }
 0x139   :  { %v858_v20 = vsel %vm847_vm13, %v2960_v36, %v2535_v59  ;;  %v1088_v35 = vmin.f32 %v1074_v42, %v1087_v52  ;;  %v1165_v46 = vmax.f32 %v1151_v33, %v1162_v8  ;;  %v1305_v59 = vmin.f32 %v2668_v38, -1e-20  ;;  %v2964_v52 = vld [vmem:[#allocation39_spill] sm:$0xff] }
 0x13a   :  { %v1091_v12 = vsel %vm1078_vm5, %v1076_v26, %v1090_v39  ;;  %v1149_v53 = vsel %vm1138_vm8, %v1148_v57, %v1134_v17  ;;  %v1237_v1 = vmul.f32 %v1236_v44, %v2963_v22  ;;  %v1266_v6 = vsub.f32 0.0, %v1265_v49  ;;  %v2966_v26 = vld [vmem:[#allocation33_spill] sm:$0xff]  ;;  %v2980_v22 = vld [vmem:[#allocation24_spill] sm:$0xff] }
 0x13b   :  { %v862_v16 = vmax.f32 %v858_v20, %v2592_v48  ;;  %v1223_v10 = vmin.f32 %v1209_v37, %v1222_v0  ;;  %v1226_v41 = vsel %vm1213_vm3, %v1211_v25, %v1225_v23  ;;  %v2703_v31 = vsel %vm1303_vm1, %v1304_v54, %v1305_v59  ;;  %v2973_v57 = vld [vmem:[#allocation17_spill] sm:$0xff] }
 0x13c   :  { %v2707_v29 = vmul.f32 %v2965_v30, %v2964_v52  ;;  %v865_v40 = vmul.f32 %v2592_v48, %v2966_v26  ;;  %v933_v17 = vmin.f32 %v919_v2, %v932_v50  ;;  %1469 = vrcp.f32 %v2703_v31  ;;  %v2972_v48 = vld [vmem:[#allocation45_spill] sm:$0xff] }
 0x13d   :  { %v1466_v5 = vpop.eup %1465  ;;  %vm2968_vm13 = vcmp.gt.f32.partialorder %v2967_v60, 0.0  ;;  %v1092_v18 = vmin.f32 %v1091_v12, 1.0  ;;  %v1163_v27 = vmin.f32 %v1149_v53, %v1162_v8  ;;  %vm2970_vm0 = vcmp.gt.f32.partialorder %v2969_v45, 0.0 }
 0x13e   :  { %v936_v24 = vsel %vm2968_vm13, %v921_v63, %v935_v13  ;;  %v1166_v47 = vsel %vm2970_vm0, %v1151_v33, %v1165_v46  ;;  %v2717_v43 = vadd.f32 %v863_v9, %v2971_v61  ;;  %v1089_v0 = vsel %vm1078_vm5, %v1088_v35, %v1074_v42  ;;  %v2975_v33 = vld [vmem:[#allocation12_spill] sm:$0xff]  ;;  %vm2976_vm2 = vmmov %vm2968_vm13 }
 0x13f   :  { %v1240_v39 = vmax.f32 %v1226_v41, %v1237_v1  ;;  %v1267_v50 = vmul.f32 %v1266_v6, %v2972_v48  ;;  %v867_v51 = vmul.f32 %v862_v16, %v2961_v7  ;;  %v869_v62 = vmul.f32 %v862_v16, %v2966_v26  ;;  %vm2977_vm4 = vmmov %vm2970_vm0 }
 0x140   :  { %v1224_v63 = vsel %vm1213_vm3, %v1223_v10, %v1209_v37  ;;  %v1278_v25 = vmul.f32 %v1466_v5, %v2633_v11  ;;  %v2728_v15 = vadd.f32 %v865_v40, %v2973_v57  ;;  %v937_v8 = vmin.f32 %v936_v24, 1.0 }
 0x141   :  { %v1031_v44 = vsub.f32 %v2975_v33, %v2974_v4  ;;  %v1167_v42 = vmin.f32 %v1166_v47, 1.0  ;;  %v934_v49 = vsel %vm2976_vm2, %v933_v17, %v919_v2  ;;  %v1093_v55 = vmax.f32 %v1089_v0, %v1092_v18  ;;  %v2979_v2 = vld [vmem:[#allocation14_spill] sm:$0xff] }
 0x142   :  { %v1164_v36 = vsel %vm2977_vm4, %v1163_v27, %v1149_v53  ;;  %v1279_v20 = vsub.f32 2.0, %v1278_v25  ;;  %v1238_v19 = vmin.f32 %v1224_v63, %v1237_v1  ;;  %v1241_v11 = vsel %vm1228_vm11, %v1226_v41, %v1240_v39  ;;  %v2983_v27 = vld [vmem:[#allocation25_spill] sm:$0xff] }
 0x143   :  { %v1268_v9 = vmin.f32 %v1267_v50, 1.0  ;;  %v1270_v23 = vmax.f32 %v1267_v50, 0.0  ;;  %v1468_v37 = vpop.eup %1467  ;;  %v2739_v54 = vadd.f32 %v867_v51, %v2971_v61  ;;  %v2742_v13 = vadd.f32 %v869_v62, %v2973_v57  ;;  %v2984_v62 = vld [vmem:[#allocation19_spill] sm:$0xff] }
 0x144   :  { %v1106_v35 = vsub.f32 %v2979_v2, %v2975_v33  ;;  %v1280_v46 = vmul.f32 %v1466_v5, %v1279_v20  ;;  %v938_v59 = vmax.f32 %v934_v49, %v937_v8  ;;  %v1094_v14 = vmul.f32 %v1092_v18, %v1031_v44 }
 0x145   :  { %v1168_v12 = vmax.f32 %v1164_v36, %v1167_v42  ;;  %v1293_v53 = vmul.f32 %v1468_v37, %v2664_v28  ;;  %v1096_v1 = vmul.f32 %v1092_v18, %v2980_v22  ;;  %v1098_v6 = vmul.f32 %v1093_v55, %v1031_v44  ;;  %v2982_v28 = vld [vmem:[#allocation20_spill] sm:$0xff]  ;;  %v2985_v36 = vld [vmem:[#allocation13_spill] sm:$0xff] }
 0x146   :  { %v1242_v16 = vmin.f32 %v1241_v11, 1.0  ;;  %v1281_v10 = vsub.f32 0.0, %v1280_v46  ;;  %v1239_v41 = vsel %vm1228_vm11, %v1238_v19, %v1224_v63  ;;  %v1269_v30 = vsel %vm1258_vm12, %v1268_v9, 1.0 }
 0x147   :  { %v1271_v26 = vsel %vm1258_vm12, 0.0, %v1270_v23  ;;  %v1294_v40 = vsub.f32 2.0, %v1293_v53  ;;  %v1100_v17 = vmul.f32 %v1093_v55, %v2980_v22  ;;  %v1169_v5 = vmul.f32 %v1167_v42, %v1106_v35  ;;  %v2986_v23 = vld [vmem:[#allocation26_spill] sm:$0xff] }
 0x148   :  { %v1181_v60 = vsub.f32 %v2982_v28, %v2979_v2  ;;  %v1282_v24 = vmul.f32 %v1281_v10, %v2402_v3  ;;  %v1095_v18 = vadd.f32 %v1094_v14, %v2974_v4  ;;  %v1171_v45 = vmul.f32 %v1167_v42, %v2983_v27 }
 0x149   :  { %v1175_v47 = vmul.f32 %v1168_v12, %v2983_v27  ;;  %v1295_v61 = vmul.f32 %v1468_v37, %v1294_v40  ;;  %v1470_v0 = vpop.eup %1469  ;;  %v1173_v39 = vmul.f32 %v1168_v12, %v1106_v35  ;;  %v1243_v48 = vmax.f32 %v1239_v41, %v1242_v16 }
 0x14a   :  { %v1283_v50 = vmin.f32 %v1269_v30, %v1282_v24  ;;  %v1285_v51 = vmax.f32 %v1271_v26, %v1282_v24  ;;  %v1097_v63 = vadd.f32 %v1096_v1, %v2984_v62  ;;  %v1099_v25 = vadd.f32 %v1098_v6, %v2974_v4  ;;  %v2988_v1 = vld [vmem:[#allocation37_spill] sm:$0xff] }
 0x14b   :  { %v1296_v57 = vsub.f32 0.0, %v1295_v61  ;;  %v1308_v44 = vmul.f32 %v1470_v0, %v2703_v31  ;;  %v1101_v3 = vadd.f32 %v1100_v17, %v2984_v62  ;;  %v1170_v49 = vadd.f32 %v1169_v5, %v2975_v33  ;;  %v2989_v5 = vld [vmem:[#allocation15_spill] sm:$0xff]  ;;  %v2992_v62 = vld [vmem:[#allocation34_spill] sm:$0xff] }
 0x14c   :  { %v1284_v42 = vsel %vm1273_vm14, %v1283_v50, %v1269_v30  ;;  %v1286_v55 = vsel %vm1273_vm14, %v1271_v26, %v1285_v51  ;;  %v1172_v20 = vadd.f32 %v1171_v45, %v2985_v36  ;;  %v1176_v19 = vadd.f32 %v1175_v47, %v2985_v36  ;;  %v2990_v47 = vld [vmem:[#allocation22_spill] sm:$0xff]  ;;  %v2991_v61 = vld [vmem:[#allocation23_spill] sm:$0xff] }
 0x14d   :  { %v1297_v7 = vmul.f32 %v1296_v57, %v2429_v32  ;;  %v1309_v11 = vsub.f32 2.0, %v1308_v44  ;;  %v1174_v9 = vadd.f32 %v1173_v39, %v2975_v33  ;;  %v1244_v31 = vmul.f32 %v1242_v16, %v1181_v60  ;;  %v2995_v36 = vld [vmem:[#allocation27_spill] sm:$0xff] }
 0x14e   :  { %v1246_v37 = vmul.f32 %v1242_v16, %v2986_v23  ;;  %v1248_v35 = vmul.f32 %v1243_v48, %v1181_v60  ;;  %v1250_v46 = vmul.f32 %v1243_v48, %v2986_v23  ;;  %v939_v22 = vmul.f32 %v937_v8, %v2987_v21  ;;  %v1475_v23 = vld [vmem:[#allocation2] sm:$0xff] }
 0x14f   :  { %v1298_v14 = vmin.f32 %v1284_v42, %v1297_v7  ;;  %v1300_v12 = vmax.f32 %v1286_v55, %v1297_v7  ;;  %v1310_v53 = vmul.f32 %v1470_v0, %v1309_v11  ;;  %v941_v6 = vmul.f32 %v937_v8, %v2988_v1  ;;  %v2996_v11 = vld [vmem:[#allocation21_spill] sm:$0xff] }
 0x150   :  { %v943_v10 = vmul.f32 %v938_v59, %v2987_v21  ;;  %v945_v32 = vmul.f32 %v938_v59, %v2988_v1  ;;  %v1102_v41 = vmul.f32 %v1101_v3, %v1095_v18  ;;  %v1103_v52 = vmul.f32 %v1099_v25, %v1097_v63  ;;  %v2993_v63 = vld [vmem:[#allocation35_spill] sm:$0xff]  ;;  %v1480_v21 = vld [vmem:[#allocation5 + $0x10] sm:$0xff]  ;;  %v1481_v1 = vld [vmem:[#allocation5 + $0x8] sm:$0xff] }
 0x151   :  { %v1177_v33 = vmul.f32 %v1176_v19, %v1170_v49  ;;  %v1311_v30 = vsub.f32 0.0, %v1310_v53  ;;  %v1178_v26 = vmul.f32 %v1174_v9, %v1172_v20  ;;  %v1245_v16 = vadd.f32 %v1244_v31, %v2979_v2  ;;  %v1479_v53 = vld [vmem:[#allocation5] sm:$0xff] }
 0x152   :  { %v1299_v40 = vsel %vm1288_vm15, %v1298_v14, %v1284_v42  ;;  %v1301_v17 = vsel %vm1288_vm15, %v1286_v55, %v1300_v12  ;;  %v1247_v60 = vadd.f32 %v1246_v37, %v2989_v5  ;;  %v1249_v8 = vadd.f32 %v1248_v35, %v2979_v2  ;;  %v1476_v37 = vld [vmem:[#allocation2 + $0x10] sm:$0xff]  ;;  %v1478_v14 = vld [vmem:[#allocation2 + $0x18] sm:$0xff] }
 0x153   :  { %v1251_v24 = vadd.f32 %v1250_v46, %v2989_v5  ;;  %v1312_v59 = vmul.f32 %v1311_v30, %v2461_v58  ;;  %v797_v18 = vsub.f32 %v2675_v34, %v2707_v29  ;;  %v871_v27 = vmul.f32 %v2742_v13, %v2717_v43  ;;  %v1477_v46 = vld [vmem:[#allocation2 + $0x8] sm:$0xff] }
 0x154   :  { %v872_v45 = vmul.f32 %v2739_v54, %v2728_v15  ;;  %v940_v56 = vadd.f32 %v939_v22, %v2990_v47  ;;  %v942_v0 = vadd.f32 %v941_v6, %v2991_v61  ;;  %v946_v39 = vadd.f32 %v945_v32, %v2991_v61  ;;  %v1482_v6 = vld [vmem:[#allocation5 + $0x18] sm:$0xff] }
 0x155   :  { %v1313_v2 = vmin.f32 %v1299_v40, %v1312_v59  ;;  %v1315_v48 = vmax.f32 %v1301_v17, %v1312_v59  ;;  %v944_v50 = vadd.f32 %v943_v10, %v2990_v47  ;;  %v1104_v58 = vsub.f32 %v1102_v41, %v1103_v52 }
 0x156   :  { %v1179_v51 = vsub.f32 %v1177_v33, %v1178_v26  ;;  %v1256_v34 = vsub.f32 %v2974_v4, %v2982_v28  ;;  %v1252_v29 = vmul.f32 %v1251_v24, %v1245_v16  ;;  %v1253_v43 = vmul.f32 %v1249_v8, %v1247_v60 }
 0x157   :  { %v1314_v15 = vsel %vm1303_vm1, %v1313_v2, %v1299_v40  ;;  %v1316_v54 = vsel %vm1303_vm1, %v1301_v17, %v1315_v48  ;;  %v2994_v25 = vsub.f32 %v2992_v62, %v2993_v63  ;;  %v873_v44 = vsub.f32 %v871_v27, %v872_v45 }
 0x158   :  { %v1317_v13 = vmin.f32 %v1316_v54, 1.0  ;;  %v947_v3 = vmul.f32 %v946_v39, %v940_v56  ;;  %v948_v49 = vmul.f32 %v944_v50, %v942_v0  ;;  %v1180_v20 = vadd.f32 %v1179_v51, %v1104_v58 }
 0x159   :  { %v798_v57 = vadd.f32 %v797_v18, %v2994_v25  ;;  %v1254_v19 = vsub.f32 %v1252_v29, %v1253_v43  ;;  %v77_v35 = vadd.f32 %v1476_v37, %v1475_v23  ;;  %v78_v12 = vadd.f32 %v1478_v14, %v1477_v46 }
 0x15a   :  { %v1318_v42 = vmax.f32 %v1314_v15, %v1317_v13  ;;  %v1319_v55 = vmul.f32 %v1317_v13, %v1256_v34  ;;  %v1321_v4 = vmul.f32 %v1317_v13, %v2995_v36  ;;  %v80_v22 = vadd.f32 %v1480_v21, %v1479_v53 }
 0x15b   :  { %v81_v10 = vadd.f32 %v1482_v6, %v1481_v1  ;;  %v874_v32 = vadd.f32 %v873_v44, %v798_v57  ;;  %v949_v41 = vsub.f32 %v947_v3, %v948_v49  ;;  %v1255_v30 = vadd.f32 %v1254_v19, %v1180_v20 }
 0x15c   :  { %v1320_v7 = vadd.f32 %v1319_v55, %v2982_v28  ;;  %v1322_v9 = vadd.f32 %v1321_v4, %v2996_v11  ;;  %v1323_v38 = vmul.f32 %v1318_v42, %v1256_v34  ;;  %v1325_v31 = vmul.f32 %v1318_v42, %v2995_v36 }
 0x15d   :  { %v79_v40 = vmul.f32 %v78_v12, %v77_v35  ;;  %v82_v17 = vmul.f32 %v81_v10, %v80_v22  ;;  %v950_v5 = vadd.f32 %v949_v41, %v874_v32 }
 0x15e   :  { %v1324_v52 = vadd.f32 %v1323_v38, %v2982_v28  ;;  %v1326_v33 = vadd.f32 %v1325_v31, %v2996_v11 }
 0x15f   :  { %v1333_v59 = vadd.f32 %v82_v17, %v79_v40 }
 0x160   :  { %v1327_v26 = vmul.f32 %v1326_v33, %v1320_v7  ;;  %v1328_v16 = vmul.f32 %v1324_v52, %v1322_v9 }
 0x162   :  { %v1329_v60 = vsub.f32 %v1327_v26, %v1328_v16 }
 0x164   :  { %v1330_v8 = vadd.f32 %v1329_v60, %v1255_v30 }
 0x166   :  { %v1331_v24 = vadd.f32 %v1330_v8, %v950_v5 }
 0x168   :  { %v1332_v18 = vmul.f32 0.5, %v1331_v24 }
 0x16a   :  { %v1334_v27 = vsub.f32 %v1333_v59, %v1332_v18 }
 0x16c   :  { %v1335_v45 = vmax.f32 %v1334_v27, 1e-20 }
 0x16e   :  { %1471 = vrcp.f32 %v1335_v45 }
 0x17b   :  { %v1472_v47 = vpop.eup %1471 }
 0x17c   :  { %v1337_v56 = vmul.f32 %v1472_v47, %v1335_v45 }
 0x17e   :  { %v1338_v61 = vsub.f32 2.0, %v1337_v56 }
 0x180   :  { %v1339_v28 = vmul.f32 %v1472_v47, %v1338_v61 }
 0x182   :  { %v1340_v0 = vmul.f32 %v1339_v28, %v1332_v18 }
 0x184   :  { %v1341_v39 = vmax.f32 %v1340_v0, 1e-06 }
 0x186   :  { %v1342_v2 = vmin.f32 %v1341_v39, 1.0 }
 0x188   :  { %1473 = vlog2.f32 %v1342_v2 }
 0x195   :  { %v1474_v48 = vpop.eup %1473 }
 0x196   :  { %v1344_v50 = vmul.f32 0.6931472, %v1474_v48 }
 0x198   :  { %v1345_v58 = vsub.f32 0.0, %v1344_v50 }
 0x19a   :  { %1346 = vst [vmem:[#allocation8] sm:$0xff] %v1345_v58 }
 0x19b   :  { %1554 = shalt.err (!%p1551_p5)
}
 0x19c   :  { %1356 = dma.vmem_to_hbm [thread:$0]  %s1354_s2, 128, %s2820_s3, [#allocation4]  }
 0x19d   :  { %1567 = dma.done.wait [#allocation4], 128  }
 0x19e   :  { %1568 = vsyncadd [#allocation4], 4294967168 }
 0x19f   :  { %1360 = vsyncpa [#allocation3], 1 }
 0x1a0   :  { %1361 = vsyncpa [#allocation6], 1 }
 0x1a1   :  { %1362 = vsyncpa [#allocation4], 1 }

</bundles_post_ra>
